<compile_context>
chip_gen: v6e
topology: v6e:2x2x1
jax: 0.10.0
libtpu: 0.0.40
codegen_flags: <defaults>
</compile_context>

<pallas_src>
import functools

import jax
import jax.numpy as jnp
from jax.experimental import pallas as pl
from jax.experimental.pallas import tpu as pltpu


# --------------------------- in-kernel helpers (trace-time) ---------------------------

def _mm(a, b):
    """MXU matmul: bf16 operands, f32 accumulation."""
    return jnp.dot(a.astype(jnp.bfloat16), b.astype(jnp.bfloat16),
                   preferred_element_type=jnp.float32)


def _layernorm(y, g, b, eps=1e-5):
    mu = jnp.mean(y, axis=-1, keepdims=True)
    var = jnp.mean((y - mu) ** 2, axis=-1, keepdims=True)
    return (y - mu) * jax.lax.rsqrt(var + eps) * g + b


def _mha(q, k, v, heads, scale, mask):
    """Multi-head attention. q:[B,Sq,D], k/v:[B,Sk,D], additive mask [Sq,Sk] or None."""
    _, _, D = q.shape
    Dh = D // heads
    outs = []
    for h in range(heads):                      # static head loop, contiguous lane slices
        sl = slice(h * Dh, (h + 1) * Dh)
        s = jnp.einsum('bqd,bkd->bqk',
                       q[:, :, sl].astype(jnp.bfloat16),
                       k[:, :, sl].astype(jnp.bfloat16),
                       preferred_element_type=jnp.float32) * scale
        if mask is not None:
            s = s + mask[None, :, :]
        m = jnp.max(s, axis=-1, keepdims=True)
        p = jnp.exp(s - m)
        p = p * pl.reciprocal(jnp.sum(p, axis=-1, keepdims=True), approx=True)
        outs.append(jnp.einsum('bqk,bkd->bqd',
                               p.astype(jnp.bfloat16),
                               v[:, :, sl].astype(jnp.bfloat16),
                               preferred_element_type=jnp.float32))
    return jnp.concatenate(outs, axis=-1)


# --------------------------------- fused kernels ---------------------------------

def _encoder_layer_kernel(x_ref, wqkv_ref, bqkv_ref, wo_ref, bo_ref,
                          ln1g_ref, ln1b_ref,
                          w1_ref, b1_ref, w2_ref, b2_ref,
                          ln2g_ref, ln2b_ref,
                          o_ref, *, heads):
    Bb, S, D = x_ref.shape
    scale = 1.0 / float((D // heads) ** 0.5)

    x2 = x_ref[...].reshape(Bb * S, D)

    # self-attention (no mask for the encoder) + add & LN
    qkv = _mm(x2, wqkv_ref[...]) + bqkv_ref[...]
    q = qkv[:, 0:D].reshape(Bb, S, D)
    k = qkv[:, D:2 * D].reshape(Bb, S, D)
    v = qkv[:, 2 * D:3 * D].reshape(Bb, S, D)
    sa = _mha(q, k, v, heads, scale, None).reshape(Bb * S, D)
    sa = _mm(sa, wo_ref[...]) + bo_ref[...]
    y = _layernorm(x2 + sa, ln1g_ref[...], ln1b_ref[...])

    # feed-forward + add & LN
    h1 = jnp.maximum(_mm(y, w1_ref[...]) + b1_ref[...], 0.0)
    ff = _mm(h1, w2_ref[...]) + b2_ref[...]
    z = _layernorm(y + ff, ln2g_ref[...], ln2b_ref[...])

    o_ref[...] = z.reshape(Bb, S, D)


def _decoder_layer_kernel(x_ref, mem_ref, mask_ref,
                          wqkv_ref, bqkv_ref, wo_ref, bo_ref, ln1g_ref, ln1b_ref,
                          cqw_ref, cqb_ref, ckvw_ref, ckvb_ref, cow_ref, cob_ref,
                          ln2g_ref, ln2b_ref,
                          w1_ref, b1_ref, w2_ref, b2_ref, ln3g_ref, ln3b_ref,
                          o_ref, *, heads):
    Bb, St, D = x_ref.shape
    Ss = mem_ref.shape[1]
    scale = 1.0 / float((D // heads) ** 0.5)

    x2 = x_ref[...].reshape(Bb * St, D)

    # masked self-attention + add & LN
    qkv = _mm(x2, wqkv_ref[...]) + bqkv_ref[...]
    q = qkv[:, 0:D].reshape(Bb, St, D)
    k = qkv[:, D:2 * D].reshape(Bb, St, D)
    v = qkv[:, 2 * D:3 * D].reshape(Bb, St, D)
    sa = _mha(q, k, v, heads, scale, mask_ref[...]).reshape(Bb * St, D)
    sa = _mm(sa, wo_ref[...]) + bo_ref[...]
    y = _layernorm(x2 + sa, ln1g_ref[...], ln1b_ref[...])

    # cross-attention over encoder memory + add & LN
    mem2 = mem_ref[...].reshape(Bb * Ss, D)
    qc = (_mm(y, cqw_ref[...]) + cqb_ref[...]).reshape(Bb, St, D)
    kvc = _mm(mem2, ckvw_ref[...]) + ckvb_ref[...]
    kc = kvc[:, 0:D].reshape(Bb, Ss, D)
    vc = kvc[:, D:2 * D].reshape(Bb, Ss, D)
    ca = _mha(qc, kc, vc, heads, scale, None).reshape(Bb * St, D)
    ca = _mm(ca, cow_ref[...]) + cob_ref[...]
    y2 = _layernorm(y + ca, ln2g_ref[...], ln2b_ref[...])

    # feed-forward + add & LN
    h1 = jnp.maximum(_mm(y2, w1_ref[...]) + b1_ref[...], 0.0)
    ff = _mm(h1, w2_ref[...]) + b2_ref[...]
    z = _layernorm(y2 + ff, ln3g_ref[...], ln3b_ref[...])

    o_ref[...] = z.reshape(Bb, St, D)


def _layernorm_kernel(x_ref, g_ref, b_ref, o_ref):
    Bb, S, D = x_ref.shape
    y = x_ref[...].reshape(Bb * S, D)
    o_ref[...] = _layernorm(y, g_ref[...], b_ref[...]).reshape(Bb, S, D)


def _norm_cls_softmax_kernel(x_ref, g_ref, b_ref, w_ref, bc_ref, o_ref):
    Bb, S, D = x_ref.shape
    V = w_ref.shape[1]
    y = _layernorm(x_ref[...].reshape(Bb * S, D), g_ref[...], b_ref[...])
    logits = _mm(y, w_ref[...]) + bc_ref[...]
    m = jnp.max(logits, axis=-1, keepdims=True)
    e = jnp.exp(logits - m)
    o_ref[...] = (e / jnp.sum(e, axis=-1, keepdims=True)).reshape(Bb, S, V)


# --------------------------------- pallas_call wrappers ---------------------------------

_PARALLEL = pltpu.CompilerParams(dimension_semantics=("parallel",))


def _full2d(shape):
    return pl.BlockSpec(shape, lambda b: (0, 0))


def encoder_layer(x, p, heads):
    B, S, D = x.shape
    dff = p["w1"].shape[1]
    return pl.pallas_call(
        functools.partial(_encoder_layer_kernel, heads=heads),
        out_shape=jax.ShapeDtypeStruct((B, S, D), jnp.float32),
        grid=(B,),
        in_specs=[
            pl.BlockSpec((1, S, D), lambda b: (b, 0, 0)),   # x
            _full2d((D, 3 * D)), _full2d((1, 3 * D)),       # packed QKV proj
            _full2d((D, D)), _full2d((1, D)),               # out proj
            _full2d((1, D)), _full2d((1, D)),               # ln1
            _full2d((D, dff)), _full2d((1, dff)),           # ffn w1/b1
            _full2d((dff, D)), _full2d((1, D)),             # ffn w2/b2
            _full2d((1, D)), _full2d((1, D)),               # ln2
        ],
        out_specs=pl.BlockSpec((1, S, D), lambda b: (b, 0, 0)),
        compiler_params=_PARALLEL,
    )(x, p["wqkv"], p["bqkv"], p["wo"], p["bo"],
      p["ln1_g"], p["ln1_b"],
      p["w1"], p["b1"], p["w2"], p["b2"],
      p["ln2_g"], p["ln2_b"])


def decoder_layer(x, memory, mask, p, heads):
    B, St, D = x.shape
    Ss = memory.shape[1]
    dff = p["w1"].shape[1]
    return pl.pallas_call(
        functools.partial(_decoder_layer_kernel, heads=heads),
        out_shape=jax.ShapeDtypeStruct((B, St, D), jnp.float32),
        grid=(B,),
        in_specs=[
            pl.BlockSpec((1, St, D), lambda b: (b, 0, 0)),  # x
            pl.BlockSpec((1, Ss, D), lambda b: (b, 0, 0)),  # memory
            _full2d((St, St)),                              # additive self-attn mask
            _full2d((D, 3 * D)), _full2d((1, 3 * D)),       # self-attn packed QKV
            _full2d((D, D)), _full2d((1, D)),               # self-attn out proj
            _full2d((1, D)), _full2d((1, D)),               # ln1
            _full2d((D, D)), _full2d((1, D)),               # cross q proj
            _full2d((D, 2 * D)), _full2d((1, 2 * D)),       # cross packed KV proj
            _full2d((D, D)), _full2d((1, D)),               # cross out proj
            _full2d((1, D)), _full2d((1, D)),               # ln2
            _full2d((D, dff)), _full2d((1, dff)),           # ffn w1/b1
            _full2d((dff, D)), _full2d((1, D)),             # ffn w2/b2
            _full2d((1, D)), _full2d((1, D)),               # ln3
        ],
        out_specs=pl.BlockSpec((1, St, D), lambda b: (b, 0, 0)),
        compiler_params=_PARALLEL,
    )(x, memory, mask,
      p["wqkv"], p["bqkv"], p["wo"], p["bo"], p["ln1_g"], p["ln1_b"],
      p["cq_w"], p["cq_b"], p["ckv_w"], p["ckv_b"], p["co_w"], p["co_b"],
      p["ln2_g"], p["ln2_b"],
      p["w1"], p["b1"], p["w2"], p["b2"], p["ln3_g"], p["ln3_b"])


def layernorm(x, g, b):
    B, S, D = x.shape
    return pl.pallas_call(
        _layernorm_kernel,
        out_shape=jax.ShapeDtypeStruct((B, S, D), jnp.float32),
        grid=(B,),
        in_specs=[
            pl.BlockSpec((1, S, D), lambda i: (i, 0, 0)),
            _full2d((1, D)), _full2d((1, D)),
        ],
        out_specs=pl.BlockSpec((1, S, D), lambda i: (i, 0, 0)),
        compiler_params=_PARALLEL,
    )(x, g, b)


def norm_classifier_softmax(x, g, b, w, bc):
    B, S, D = x.shape
    V = w.shape[1]
    return pl.pallas_call(
        _norm_cls_softmax_kernel,
        out_shape=jax.ShapeDtypeStruct((B, S, V), jnp.float32),
        grid=(B,),
        in_specs=[
            pl.BlockSpec((1, S, D), lambda i: (i, 0, 0)),
            _full2d((1, D)), _full2d((1, D)),
            _full2d((D, V)), _full2d((1, V)),
        ],
        out_specs=pl.BlockSpec((1, S, V), lambda i: (i, 0, 0)),
        compiler_params=_PARALLEL,
    )(x, g, b, w, bc)


# --------------------------------- model composition ---------------------------------

def transformer_forward(params, src, trg, heads, tgt_mask=None):
    St = trg.shape[1]
    if tgt_mask is None:
        tgt_mask = jnp.zeros((St, St), jnp.float32)

    # encoder stack + final encoder LayerNorm (nn.Transformer applies it)
    memory = src
    for p in params["enc_layers"]:
        memory = encoder_layer(memory, p, heads)
    memory = layernorm(memory, params["enc_norm_g"], params["enc_norm_b"])

    # decoder stack
    x = trg
    for p in params["dec_layers"]:
        x = decoder_layer(x, memory, tgt_mask, p, heads)

    # final decoder LayerNorm fused with classifier Linear + softmax(dim=2)
    return norm_classifier_softmax(x, params["dec_norm_g"], params["dec_norm_b"],
                                   params["cls_w"], params["cls_b"])


# ------------------------------------ param init ------------------------------------

def init_params(key, D, dff, V, num_layers):
    def nrm(k, shape, scale=0.05):
        return (jax.random.normal(k, shape, jnp.float32) * scale).astype(jnp.float32)

    ones = lambda n: jnp.ones((1, n), jnp.float32)
    zeros = lambda n: jnp.zeros((1, n), jnp.float32)

    def enc_layer(k):
        ks = jax.random.split(k, 4)
        return dict(
            wqkv=nrm(ks[0], (D, 3 * D)), bqkv=zeros(3 * D),
            wo=nrm(ks[1], (D, D)), bo=zeros(D),
            ln1_g=ones(D), ln1_b=zeros(D),
            w1=nrm(ks[2], (D, dff)), b1=zeros(dff),
            w2=nrm(ks[3], (dff, D)), b2=zeros(D),
            ln2_g=ones(D), ln2_b=zeros(D),
        )

    def dec_layer(k):
        ks = jax.random.split(k, 7)
        return dict(
            wqkv=nrm(ks[0], (D, 3 * D)), bqkv=zeros(3 * D),
            wo=nrm(ks[1], (D, D)), bo=zeros(D),
            ln1_g=ones(D), ln1_b=zeros(D),
            cq_w=nrm(ks[2], (D, D)), cq_b=zeros(D),
            ckv_w=nrm(ks[3], (D, 2 * D)), ckv_b=zeros(2 * D),
            co_w=nrm(ks[4], (D, D)), co_b=zeros(D),
            ln2_g=ones(D), ln2_b=zeros(D),
            w1=nrm(ks[5], (D, dff)), b1=zeros(dff),
            w2=nrm(ks[6], (dff, D)), b2=zeros(D),
            ln3_g=ones(D), ln3_b=zeros(D),
        )

    enc_layers = [enc_layer(jax.random.fold_in(key, l)) for l in range(num_layers)]
    dec_layers = [dec_layer(jax.random.fold_in(key, 100 + l)) for l in range(num_layers)]
    ck = jax.random.fold_in(key, 10_000)
    return dict(
        enc_layers=enc_layers,
        dec_layers=dec_layers,
        enc_norm_g=ones(D), enc_norm_b=zeros(D),
        dec_norm_g=ones(D), dec_norm_b=zeros(D),
        cls_w=nrm(ck, (D, V)), cls_b=zeros(V),
    )


# --------------------------------------- main ---------------------------------------

if __name__ == "__main__":
    # Small shapes consistent with the module: batch=2, src_seq=8, tgt_seq=8,
    # embedding_dim=32, heads=4, dim_feedforward=128 (=4*D), 2 enc + 2 dec layers, vocab=16.
    B, S_SRC, S_TGT = 2, 8, 8
    D, HEADS, DFF, LAYERS, VOCAB = 32, 4, 128, 2, 16

    key = jax.random.PRNGKey(0)
    k_src, k_trg, k_par = jax.random.split(key, 3)

    src = jax.random.normal(k_src, (B, S_SRC, D), jnp.float32)  # already-embedded source
    trg = jax.random.normal(k_trg, (B, S_TGT, D), jnp.float32)  # already-embedded target
    params = init_params(k_par, D, DFF, VOCAB, LAYERS)

    # Causal target mask (additive, like nn.Transformer.generate_square_subsequent_mask).
    tgt_mask = jnp.where(
        jnp.arange(S_TGT)[:, None] >= jnp.arange(S_TGT)[None, :], 0.0, -1e9
    ).astype(jnp.float32)

    fwd = jax.jit(functools.partial(transformer_forward, heads=HEADS))
    out = fwd(params, src, trg, tgt_mask=tgt_mask)
    out = jax.block_until_ready(out)

    assert out.shape == (B, S_TGT, VOCAB)
    assert bool(jnp.all(jnp.isfinite(out)))
    # classifier softmax rows sum to ~1
    assert bool(jnp.allclose(jnp.sum(out, axis=-1), 1.0, atol=1e-4))

    print("KERNEL_OK")
</pallas_src>

<mosaic_0001>
module attributes {stable_mosaic.version = 11 : i64} {
  func.func @_decoder_layer_kernel(%arg0: i32, %arg1: memref<1x8x32xf32, #tpu.memory_space<vmem>>, %arg2: memref<1x8x32xf32, #tpu.memory_space<vmem>>, %arg3: memref<8x8xf32, #tpu.memory_space<vmem>>, %arg4: memref<32x96xf32, #tpu.memory_space<vmem>>, %arg5: memref<1x96xf32, #tpu.memory_space<vmem>>, %arg6: memref<32x32xf32, #tpu.memory_space<vmem>>, %arg7: memref<1x32xf32, #tpu.memory_space<vmem>>, %arg8: memref<1x32xf32, #tpu.memory_space<vmem>>, %arg9: memref<1x32xf32, #tpu.memory_space<vmem>>, %arg10: memref<32x32xf32, #tpu.memory_space<vmem>>, %arg11: memref<1x32xf32, #tpu.memory_space<vmem>>, %arg12: memref<32x64xf32, #tpu.memory_space<vmem>>, %arg13: memref<1x64xf32, #tpu.memory_space<vmem>>, %arg14: memref<32x32xf32, #tpu.memory_space<vmem>>, %arg15: memref<1x32xf32, #tpu.memory_space<vmem>>, %arg16: memref<1x32xf32, #tpu.memory_space<vmem>>, %arg17: memref<1x32xf32, #tpu.memory_space<vmem>>, %arg18: memref<32x128xf32, #tpu.memory_space<vmem>>, %arg19: memref<1x128xf32, #tpu.memory_space<vmem>>, %arg20: memref<128x32xf32, #tpu.memory_space<vmem>>, %arg21: memref<1x32xf32, #tpu.memory_space<vmem>>, %arg22: memref<1x32xf32, #tpu.memory_space<vmem>>, %arg23: memref<1x32xf32, #tpu.memory_space<vmem>>, %arg24: memref<1x8x32xf32, #tpu.memory_space<vmem>>) attributes {dimension_semantics = [#tpu.dimension_semantics<parallel>], iteration_bounds = array<i64: 2>, scalar_prefetch = 0 : i64, scratch_operands = 0 : i64, tpu.core_type = #tpu.core_type<tc>, window_params = [{transform_indices = @transform_0, window_bounds = array<i64: 1, 8, 32>}, {transform_indices = @transform_1, window_bounds = array<i64: 1, 8, 32>}, {pipeline_mode = #tpu.pipeline_mode<synchronous>, transform_indices = @transform_2, window_bounds = array<i64: 8, 8>}, {pipeline_mode = #tpu.pipeline_mode<synchronous>, transform_indices = @transform_3, window_bounds = array<i64: 32, 96>}, {pipeline_mode = #tpu.pipeline_mode<synchronous>, transform_indices = @transform_4, window_bounds = array<i64: 1, 96>}, {pipeline_mode = #tpu.pipeline_mode<synchronous>, transform_indices = @transform_5, window_bounds = array<i64: 32, 32>}, {pipeline_mode = #tpu.pipeline_mode<synchronous>, transform_indices = @transform_6, window_bounds = array<i64: 1, 32>}, {pipeline_mode = #tpu.pipeline_mode<synchronous>, transform_indices = @transform_7, window_bounds = array<i64: 1, 32>}, {pipeline_mode = #tpu.pipeline_mode<synchronous>, transform_indices = @transform_8, window_bounds = array<i64: 1, 32>}, {pipeline_mode = #tpu.pipeline_mode<synchronous>, transform_indices = @transform_9, window_bounds = array<i64: 32, 32>}, {pipeline_mode = #tpu.pipeline_mode<synchronous>, transform_indices = @transform_10, window_bounds = array<i64: 1, 32>}, {pipeline_mode = #tpu.pipeline_mode<synchronous>, transform_indices = @transform_11, window_bounds = array<i64: 32, 64>}, {pipeline_mode = #tpu.pipeline_mode<synchronous>, transform_indices = @transform_12, window_bounds = array<i64: 1, 64>}, {pipeline_mode = #tpu.pipeline_mode<synchronous>, transform_indices = @transform_13, window_bounds = array<i64: 32, 32>}, {pipeline_mode = #tpu.pipeline_mode<synchronous>, transform_indices = @transform_14, window_bounds = array<i64: 1, 32>}, {pipeline_mode = #tpu.pipeline_mode<synchronous>, transform_indices = @transform_15, window_bounds = array<i64: 1, 32>}, {pipeline_mode = #tpu.pipeline_mode<synchronous>, transform_indices = @transform_16, window_bounds = array<i64: 1, 32>}, {pipeline_mode = #tpu.pipeline_mode<synchronous>, transform_indices = @transform_17, window_bounds = array<i64: 32, 128>}, {pipeline_mode = #tpu.pipeline_mode<synchronous>, transform_indices = @transform_18, window_bounds = array<i64: 1, 128>}, {pipeline_mode = #tpu.pipeline_mode<synchronous>, transform_indices = @transform_19, window_bounds = array<i64: 128, 32>}, {pipeline_mode = #tpu.pipeline_mode<synchronous>, transform_indices = @transform_20, window_bounds = array<i64: 1, 32>}, {pipeline_mode = #tpu.pipeline_mode<synchronous>, transform_indices = @transform_21, window_bounds = array<i64: 1, 32>}, {pipeline_mode = #tpu.pipeline_mode<synchronous>, transform_indices = @transform_22, window_bounds = array<i64: 1, 32>}, {transform_indices = @transform_23, window_bounds = array<i64: 1, 8, 32>}]} {
    %c0 = arith.constant 0 : index
    %c0_0 = arith.constant 0 : index
    %c0_1 = arith.constant 0 : index
    %0 = vector.load %arg1[%c0, %c0_0, %c0_1] : memref<1x8x32xf32, #tpu.memory_space<vmem>>, vector<1x8x32xf32>
    %1 = vector.shape_cast %0 : vector<1x8x32xf32> to vector<8x32xf32>
    %c0_2 = arith.constant 0 : index
    %c0_3 = arith.constant 0 : index
    %2 = vector.load %arg4[%c0_2, %c0_3] : memref<32x96xf32, #tpu.memory_space<vmem>>, vector<32x96xf32>
    %3 = arith.truncf %1 : vector<8x32xf32> to vector<8x32xbf16>
    %4 = arith.truncf %2 : vector<32x96xf32> to vector<32x96xbf16>
    %cst = arith.constant dense<0.000000e+00> : vector<8x96xf32>
    %5 = tpu.matmul %3, %4, %cst {dimension_numbers = #tpu.dot_dimension_numbers<[1], [0], [0], [1], [0, 0, 1, 1], [], []>} : vector<8x32xbf16>, vector<32x96xbf16>, vector<8x96xf32> -> vector<8x96xf32>
    %c0_4 = arith.constant 0 : index
    %c0_5 = arith.constant 0 : index
    %6 = vector.load %arg5[%c0_4, %c0_5] : memref<1x96xf32, #tpu.memory_space<vmem>>, vector<1x96xf32>
    %7 = vector.broadcast %6 : vector<1x96xf32> to vector<8x96xf32>
    %8 = arith.addf %5, %7 : vector<8x96xf32>
    %9 = vector.extract_strided_slice %8 {offsets = [0, 0], sizes = [8, 32], strides = [1, 1]} : vector<8x96xf32> to vector<8x32xf32>
    %10 = vector.shape_cast %9 : vector<8x32xf32> to vector<1x8x32xf32>
    %11 = vector.extract_strided_slice %8 {offsets = [0, 32], sizes = [8, 32], strides = [1, 1]} : vector<8x96xf32> to vector<8x32xf32>
    %12 = vector.shape_cast %11 : vector<8x32xf32> to vector<1x8x32xf32>
    %13 = vector.extract_strided_slice %8 {offsets = [0, 64], sizes = [8, 32], strides = [1, 1]} : vector<8x96xf32> to vector<8x32xf32>
    %14 = vector.shape_cast %13 : vector<8x32xf32> to vector<1x8x32xf32>
    %c0_6 = arith.constant 0 : index
    %c0_7 = arith.constant 0 : index
    %15 = vector.load %arg3[%c0_6, %c0_7] : memref<8x8xf32, #tpu.memory_space<vmem>>, vector<8x8xf32>
    %16 = vector.extract_strided_slice %10 {offsets = [0, 0, 0], sizes = [1, 8, 8], strides = [1, 1, 1]} : vector<1x8x32xf32> to vector<1x8x8xf32>
    %17 = arith.truncf %16 : vector<1x8x8xf32> to vector<1x8x8xbf16>
    %18 = vector.extract_strided_slice %12 {offsets = [0, 0, 0], sizes = [1, 8, 8], strides = [1, 1, 1]} : vector<1x8x32xf32> to vector<1x8x8xf32>
    %19 = arith.truncf %18 : vector<1x8x8xf32> to vector<1x8x8xbf16>
    "tpu.trace_start"() <{level = 10 : i32, message = "bqd,bkd->bqk"}> : () -> ()
    %cst_8 = arith.constant dense<0.000000e+00> : vector<1x8x8xf32>
    %20 = tpu.matmul %17, %19, %cst_8 {dimension_numbers = #tpu.dot_dimension_numbers<[2], [2], [1], [1], [0, 0, 0, 1, 1, 1], [0], [0]>} : vector<1x8x8xbf16>, vector<1x8x8xbf16>, vector<1x8x8xf32> -> vector<1x8x8xf32>
    "tpu.trace_stop"() : () -> ()
    %cst_9 = arith.constant 0.353553385 : f32
    %21 = vector.broadcast %cst_9 : f32 to vector<1x8x8xf32>
    %22 = arith.mulf %20, %21 : vector<1x8x8xf32>
    %23 = vector.shape_cast %15 : vector<8x8xf32> to vector<1x8x8xf32>
    %24 = arith.addf %22, %23 : vector<1x8x8xf32>
    %cst_10 = arith.constant dense<0xFF800000> : vector<1x8xf32>
    %25 = vector.multi_reduction <maximumf>, %24, %cst_10 [2] : vector<1x8x8xf32> to vector<1x8xf32>
    %26 = vector.shape_cast %25 : vector<1x8xf32> to vector<1x8x1xf32>
    %27 = vector.broadcast %26 : vector<1x8x1xf32> to vector<1x8x8xf32>
    %28 = arith.subf %24, %27 : vector<1x8x8xf32>
    %29 = math.exp %28 : vector<1x8x8xf32>
    %cst_11 = arith.constant dense<0.000000e+00> : vector<1x8xf32>
    %30 = vector.multi_reduction <add>, %29, %cst_11 [2] : vector<1x8x8xf32> to vector<1x8xf32>
    %31 = vector.shape_cast %30 : vector<1x8xf32> to vector<1x8x1xf32>
    %32 = tpu.reciprocal %31 {approx = true} : vector<1x8x1xf32> -> vector<1x8x1xf32>
    %33 = vector.broadcast %32 : vector<1x8x1xf32> to vector<1x8x8xf32>
    %34 = arith.mulf %29, %33 : vector<1x8x8xf32>
    %35 = arith.truncf %34 : vector<1x8x8xf32> to vector<1x8x8xbf16>
    %36 = vector.extract_strided_slice %14 {offsets = [0, 0, 0], sizes = [1, 8, 8], strides = [1, 1, 1]} : vector<1x8x32xf32> to vector<1x8x8xf32>
    %37 = arith.truncf %36 : vector<1x8x8xf32> to vector<1x8x8xbf16>
    "tpu.trace_start"() <{level = 10 : i32, message = "bqk,bkd->bqd"}> : () -> ()
    %cst_12 = arith.constant dense<0.000000e+00> : vector<1x8x8xf32>
    %38 = tpu.matmul %35, %37, %cst_12 {dimension_numbers = #tpu.dot_dimension_numbers<[2], [1], [1], [2], [0, 0, 0, 1, 1, 2], [0], [0]>} : vector<1x8x8xbf16>, vector<1x8x8xbf16>, vector<1x8x8xf32> -> vector<1x8x8xf32>
    "tpu.trace_stop"() : () -> ()
    %39 = vector.extract_strided_slice %10 {offsets = [0, 0, 8], sizes = [1, 8, 8], strides = [1, 1, 1]} : vector<1x8x32xf32> to vector<1x8x8xf32>
    %40 = arith.truncf %39 : vector<1x8x8xf32> to vector<1x8x8xbf16>
    %41 = vector.extract_strided_slice %12 {offsets = [0, 0, 8], sizes = [1, 8, 8], strides = [1, 1, 1]} : vector<1x8x32xf32> to vector<1x8x8xf32>
    %42 = arith.truncf %41 : vector<1x8x8xf32> to vector<1x8x8xbf16>
    "tpu.trace_start"() <{level = 10 : i32, message = "bqd,bkd->bqk"}> : () -> ()
    %cst_13 = arith.constant dense<0.000000e+00> : vector<1x8x8xf32>
    %43 = tpu.matmul %40, %42, %cst_13 {dimension_numbers = #tpu.dot_dimension_numbers<[2], [2], [1], [1], [0, 0, 0, 1, 1, 1], [0], [0]>} : vector<1x8x8xbf16>, vector<1x8x8xbf16>, vector<1x8x8xf32> -> vector<1x8x8xf32>
    "tpu.trace_stop"() : () -> ()
    %cst_14 = arith.constant 0.353553385 : f32
    %44 = vector.broadcast %cst_14 : f32 to vector<1x8x8xf32>
    %45 = arith.mulf %43, %44 : vector<1x8x8xf32>
    %46 = vector.shape_cast %15 : vector<8x8xf32> to vector<1x8x8xf32>
    %47 = arith.addf %45, %46 : vector<1x8x8xf32>
    %cst_15 = arith.constant dense<0xFF800000> : vector<1x8xf32>
    %48 = vector.multi_reduction <maximumf>, %47, %cst_15 [2] : vector<1x8x8xf32> to vector<1x8xf32>
    %49 = vector.shape_cast %48 : vector<1x8xf32> to vector<1x8x1xf32>
    %50 = vector.broadcast %49 : vector<1x8x1xf32> to vector<1x8x8xf32>
    %51 = arith.subf %47, %50 : vector<1x8x8xf32>
    %52 = math.exp %51 : vector<1x8x8xf32>
    %cst_16 = arith.constant dense<0.000000e+00> : vector<1x8xf32>
    %53 = vector.multi_reduction <add>, %52, %cst_16 [2] : vector<1x8x8xf32> to vector<1x8xf32>
    %54 = vector.shape_cast %53 : vector<1x8xf32> to vector<1x8x1xf32>
    %55 = tpu.reciprocal %54 {approx = true} : vector<1x8x1xf32> -> vector<1x8x1xf32>
    %56 = vector.broadcast %55 : vector<1x8x1xf32> to vector<1x8x8xf32>
    %57 = arith.mulf %52, %56 : vector<1x8x8xf32>
    %58 = arith.truncf %57 : vector<1x8x8xf32> to vector<1x8x8xbf16>
    %59 = vector.extract_strided_slice %14 {offsets = [0, 0, 8], sizes = [1, 8, 8], strides = [1, 1, 1]} : vector<1x8x32xf32> to vector<1x8x8xf32>
    %60 = arith.truncf %59 : vector<1x8x8xf32> to vector<1x8x8xbf16>
    "tpu.trace_start"() <{level = 10 : i32, message = "bqk,bkd->bqd"}> : () -> ()
    %cst_17 = arith.constant dense<0.000000e+00> : vector<1x8x8xf32>
    %61 = tpu.matmul %58, %60, %cst_17 {dimension_numbers = #tpu.dot_dimension_numbers<[2], [1], [1], [2], [0, 0, 0, 1, 1, 2], [0], [0]>} : vector<1x8x8xbf16>, vector<1x8x8xbf16>, vector<1x8x8xf32> -> vector<1x8x8xf32>
    "tpu.trace_stop"() : () -> ()
    %62 = vector.extract_strided_slice %10 {offsets = [0, 0, 16], sizes = [1, 8, 8], strides = [1, 1, 1]} : vector<1x8x32xf32> to vector<1x8x8xf32>
    %63 = arith.truncf %62 : vector<1x8x8xf32> to vector<1x8x8xbf16>
    %64 = vector.extract_strided_slice %12 {offsets = [0, 0, 16], sizes = [1, 8, 8], strides = [1, 1, 1]} : vector<1x8x32xf32> to vector<1x8x8xf32>
    %65 = arith.truncf %64 : vector<1x8x8xf32> to vector<1x8x8xbf16>
    "tpu.trace_start"() <{level = 10 : i32, message = "bqd,bkd->bqk"}> : () -> ()
    %cst_18 = arith.constant dense<0.000000e+00> : vector<1x8x8xf32>
    %66 = tpu.matmul %63, %65, %cst_18 {dimension_numbers = #tpu.dot_dimension_numbers<[2], [2], [1], [1], [0, 0, 0, 1, 1, 1], [0], [0]>} : vector<1x8x8xbf16>, vector<1x8x8xbf16>, vector<1x8x8xf32> -> vector<1x8x8xf32>
    "tpu.trace_stop"() : () -> ()
    %cst_19 = arith.constant 0.353553385 : f32
    %67 = vector.broadcast %cst_19 : f32 to vector<1x8x8xf32>
    %68 = arith.mulf %66, %67 : vector<1x8x8xf32>
    %69 = vector.shape_cast %15 : vector<8x8xf32> to vector<1x8x8xf32>
    %70 = arith.addf %68, %69 : vector<1x8x8xf32>
    %cst_20 = arith.constant dense<0xFF800000> : vector<1x8xf32>
    %71 = vector.multi_reduction <maximumf>, %70, %cst_20 [2] : vector<1x8x8xf32> to vector<1x8xf32>
    %72 = vector.shape_cast %71 : vector<1x8xf32> to vector<1x8x1xf32>
    %73 = vector.broadcast %72 : vector<1x8x1xf32> to vector<1x8x8xf32>
    %74 = arith.subf %70, %73 : vector<1x8x8xf32>
    %75 = math.exp %74 : vector<1x8x8xf32>
    %cst_21 = arith.constant dense<0.000000e+00> : vector<1x8xf32>
    %76 = vector.multi_reduction <add>, %75, %cst_21 [2] : vector<1x8x8xf32> to vector<1x8xf32>
    %77 = vector.shape_cast %76 : vector<1x8xf32> to vector<1x8x1xf32>
    %78 = tpu.reciprocal %77 {approx = true} : vector<1x8x1xf32> -> vector<1x8x1xf32>
    %79 = vector.broadcast %78 : vector<1x8x1xf32> to vector<1x8x8xf32>
    %80 = arith.mulf %75, %79 : vector<1x8x8xf32>
    %81 = arith.truncf %80 : vector<1x8x8xf32> to vector<1x8x8xbf16>
    %82 = vector.extract_strided_slice %14 {offsets = [0, 0, 16], sizes = [1, 8, 8], strides = [1, 1, 1]} : vector<1x8x32xf32> to vector<1x8x8xf32>
    %83 = arith.truncf %82 : vector<1x8x8xf32> to vector<1x8x8xbf16>
    "tpu.trace_start"() <{level = 10 : i32, message = "bqk,bkd->bqd"}> : () -> ()
    %cst_22 = arith.constant dense<0.000000e+00> : vector<1x8x8xf32>
    %84 = tpu.matmul %81, %83, %cst_22 {dimension_numbers = #tpu.dot_dimension_numbers<[2], [1], [1], [2], [0, 0, 0, 1, 1, 2], [0], [0]>} : vector<1x8x8xbf16>, vector<1x8x8xbf16>, vector<1x8x8xf32> -> vector<1x8x8xf32>
    "tpu.trace_stop"() : () -> ()
    %85 = vector.extract_strided_slice %10 {offsets = [0, 0, 24], sizes = [1, 8, 8], strides = [1, 1, 1]} : vector<1x8x32xf32> to vector<1x8x8xf32>
    %86 = arith.truncf %85 : vector<1x8x8xf32> to vector<1x8x8xbf16>
    %87 = vector.extract_strided_slice %12 {offsets = [0, 0, 24], sizes = [1, 8, 8], strides = [1, 1, 1]} : vector<1x8x32xf32> to vector<1x8x8xf32>
    %88 = arith.truncf %87 : vector<1x8x8xf32> to vector<1x8x8xbf16>
    "tpu.trace_start"() <{level = 10 : i32, message = "bqd,bkd->bqk"}> : () -> ()
    %cst_23 = arith.constant dense<0.000000e+00> : vector<1x8x8xf32>
    %89 = tpu.matmul %86, %88, %cst_23 {dimension_numbers = #tpu.dot_dimension_numbers<[2], [2], [1], [1], [0, 0, 0, 1, 1, 1], [0], [0]>} : vector<1x8x8xbf16>, vector<1x8x8xbf16>, vector<1x8x8xf32> -> vector<1x8x8xf32>
    "tpu.trace_stop"() : () -> ()
    %cst_24 = arith.constant 0.353553385 : f32
    %90 = vector.broadcast %cst_24 : f32 to vector<1x8x8xf32>
    %91 = arith.mulf %89, %90 : vector<1x8x8xf32>
    %92 = vector.shape_cast %15 : vector<8x8xf32> to vector<1x8x8xf32>
    %93 = arith.addf %91, %92 : vector<1x8x8xf32>
    %cst_25 = arith.constant dense<0xFF800000> : vector<1x8xf32>
    %94 = vector.multi_reduction <maximumf>, %93, %cst_25 [2] : vector<1x8x8xf32> to vector<1x8xf32>
    %95 = vector.shape_cast %94 : vector<1x8xf32> to vector<1x8x1xf32>
    %96 = vector.broadcast %95 : vector<1x8x1xf32> to vector<1x8x8xf32>
    %97 = arith.subf %93, %96 : vector<1x8x8xf32>
    %98 = math.exp %97 : vector<1x8x8xf32>
    %cst_26 = arith.constant dense<0.000000e+00> : vector<1x8xf32>
    %99 = vector.multi_reduction <add>, %98, %cst_26 [2] : vector<1x8x8xf32> to vector<1x8xf32>
    %100 = vector.shape_cast %99 : vector<1x8xf32> to vector<1x8x1xf32>
    %101 = tpu.reciprocal %100 {approx = true} : vector<1x8x1xf32> -> vector<1x8x1xf32>
    %102 = vector.broadcast %101 : vector<1x8x1xf32> to vector<1x8x8xf32>
    %103 = arith.mulf %98, %102 : vector<1x8x8xf32>
    %104 = arith.truncf %103 : vector<1x8x8xf32> to vector<1x8x8xbf16>
    %105 = vector.extract_strided_slice %14 {offsets = [0, 0, 24], sizes = [1, 8, 8], strides = [1, 1, 1]} : vector<1x8x32xf32> to vector<1x8x8xf32>
    %106 = arith.truncf %105 : vector<1x8x8xf32> to vector<1x8x8xbf16>
    "tpu.trace_start"() <{level = 10 : i32, message = "bqk,bkd->bqd"}> : () -> ()
    %cst_27 = arith.constant dense<0.000000e+00> : vector<1x8x8xf32>
    %107 = tpu.matmul %104, %106, %cst_27 {dimension_numbers = #tpu.dot_dimension_numbers<[2], [1], [1], [2], [0, 0, 0, 1, 1, 2], [0], [0]>} : vector<1x8x8xbf16>, vector<1x8x8xbf16>, vector<1x8x8xf32> -> vector<1x8x8xf32>
    "tpu.trace_stop"() : () -> ()
    %108 = tpu.concatenate %38, %61, %84, %107 in 2 : vector<1x8x8xf32>, vector<1x8x8xf32>, vector<1x8x8xf32>, vector<1x8x8xf32> -> vector<1x8x32xf32>
    %109 = vector.shape_cast %108 : vector<1x8x32xf32> to vector<8x32xf32>
    %c0_28 = arith.constant 0 : index
    %c0_29 = arith.constant 0 : index
    %110 = vector.load %arg6[%c0_28, %c0_29] : memref<32x32xf32, #tpu.memory_space<vmem>>, vector<32x32xf32>
    %111 = arith.truncf %109 : vector<8x32xf32> to vector<8x32xbf16>
    %112 = arith.truncf %110 : vector<32x32xf32> to vector<32x32xbf16>
    %cst_30 = arith.constant dense<0.000000e+00> : vector<8x32xf32>
    %113 = tpu.matmul %111, %112, %cst_30 {dimension_numbers = #tpu.dot_dimension_numbers<[1], [0], [0], [1], [0, 0, 1, 1], [], []>} : vector<8x32xbf16>, vector<32x32xbf16>, vector<8x32xf32> -> vector<8x32xf32>
    %c0_31 = arith.constant 0 : index
    %c0_32 = arith.constant 0 : index
    %114 = vector.load %arg7[%c0_31, %c0_32] : memref<1x32xf32, #tpu.memory_space<vmem>>, vector<1x32xf32>
    %115 = vector.broadcast %114 : vector<1x32xf32> to vector<8x32xf32>
    %116 = arith.addf %113, %115 : vector<8x32xf32>
    %117 = arith.addf %1, %116 : vector<8x32xf32>
    %c0_33 = arith.constant 0 : index
    %c0_34 = arith.constant 0 : index
    %118 = vector.load %arg8[%c0_33, %c0_34] : memref<1x32xf32, #tpu.memory_space<vmem>>, vector<1x32xf32>
    %c0_35 = arith.constant 0 : index
    %c0_36 = arith.constant 0 : index
    %119 = vector.load %arg9[%c0_35, %c0_36] : memref<1x32xf32, #tpu.memory_space<vmem>>, vector<1x32xf32>
    %cst_37 = arith.constant dense<0.000000e+00> : vector<8xf32>
    %120 = vector.multi_reduction <add>, %117, %cst_37 [1] : vector<8x32xf32> to vector<8xf32>
    %121 = vector.shape_cast %120 : vector<8xf32> to vector<8x1xf32>
    %cst_38 = arith.constant 3.200000e+01 : f32
    %122 = vector.broadcast %cst_38 : f32 to vector<8x1xf32>
    %123 = arith.divf %121, %122 : vector<8x1xf32>
    %124 = vector.broadcast %123 : vector<8x1xf32> to vector<8x32xf32>
    %125 = arith.subf %117, %124 : vector<8x32xf32>
    %126 = arith.mulf %125, %125 : vector<8x32xf32>
    %cst_39 = arith.constant dense<0.000000e+00> : vector<8xf32>
    %127 = vector.multi_reduction <add>, %126, %cst_39 [1] : vector<8x32xf32> to vector<8xf32>
    %128 = vector.shape_cast %127 : vector<8xf32> to vector<8x1xf32>
    %cst_40 = arith.constant 3.200000e+01 : f32
    %129 = vector.broadcast %cst_40 : f32 to vector<8x1xf32>
    %130 = arith.divf %128, %129 : vector<8x1xf32>
    %131 = vector.broadcast %123 : vector<8x1xf32> to vector<8x32xf32>
    %132 = arith.subf %117, %131 : vector<8x32xf32>
    %cst_41 = arith.constant 9.99999974E-6 : f32
    %133 = vector.broadcast %cst_41 : f32 to vector<8x1xf32>
    %134 = arith.addf %130, %133 : vector<8x1xf32>
    %135 = math.rsqrt %134 : vector<8x1xf32>
    %136 = vector.broadcast %135 : vector<8x1xf32> to vector<8x32xf32>
    %137 = arith.mulf %132, %136 : vector<8x32xf32>
    %138 = vector.broadcast %118 : vector<1x32xf32> to vector<8x32xf32>
    %139 = arith.mulf %137, %138 : vector<8x32xf32>
    %140 = vector.broadcast %119 : vector<1x32xf32> to vector<8x32xf32>
    %141 = arith.addf %139, %140 : vector<8x32xf32>
    %c0_42 = arith.constant 0 : index
    %c0_43 = arith.constant 0 : index
    %c0_44 = arith.constant 0 : index
    %142 = vector.load %arg2[%c0_42, %c0_43, %c0_44] : memref<1x8x32xf32, #tpu.memory_space<vmem>>, vector<1x8x32xf32>
    %143 = vector.shape_cast %142 : vector<1x8x32xf32> to vector<8x32xf32>
    %c0_45 = arith.constant 0 : index
    %c0_46 = arith.constant 0 : index
    %144 = vector.load %arg10[%c0_45, %c0_46] : memref<32x32xf32, #tpu.memory_space<vmem>>, vector<32x32xf32>
    %145 = arith.truncf %141 : vector<8x32xf32> to vector<8x32xbf16>
    %146 = arith.truncf %144 : vector<32x32xf32> to vector<32x32xbf16>
    %cst_47 = arith.constant dense<0.000000e+00> : vector<8x32xf32>
    %147 = tpu.matmul %145, %146, %cst_47 {dimension_numbers = #tpu.dot_dimension_numbers<[1], [0], [0], [1], [0, 0, 1, 1], [], []>} : vector<8x32xbf16>, vector<32x32xbf16>, vector<8x32xf32> -> vector<8x32xf32>
    %c0_48 = arith.constant 0 : index
    %c0_49 = arith.constant 0 : index
    %148 = vector.load %arg11[%c0_48, %c0_49] : memref<1x32xf32, #tpu.memory_space<vmem>>, vector<1x32xf32>
    %149 = vector.broadcast %148 : vector<1x32xf32> to vector<8x32xf32>
    %150 = arith.addf %147, %149 : vector<8x32xf32>
    %151 = vector.shape_cast %150 : vector<8x32xf32> to vector<1x8x32xf32>
    %c0_50 = arith.constant 0 : index
    %c0_51 = arith.constant 0 : index
    %152 = vector.load %arg12[%c0_50, %c0_51] : memref<32x64xf32, #tpu.memory_space<vmem>>, vector<32x64xf32>
    %153 = arith.truncf %143 : vector<8x32xf32> to vector<8x32xbf16>
    %154 = arith.truncf %152 : vector<32x64xf32> to vector<32x64xbf16>
    %cst_52 = arith.constant dense<0.000000e+00> : vector<8x64xf32>
    %155 = tpu.matmul %153, %154, %cst_52 {dimension_numbers = #tpu.dot_dimension_numbers<[1], [0], [0], [1], [0, 0, 1, 1], [], []>} : vector<8x32xbf16>, vector<32x64xbf16>, vector<8x64xf32> -> vector<8x64xf32>
    %c0_53 = arith.constant 0 : index
    %c0_54 = arith.constant 0 : index
    %156 = vector.load %arg13[%c0_53, %c0_54] : memref<1x64xf32, #tpu.memory_space<vmem>>, vector<1x64xf32>
    %157 = vector.broadcast %156 : vector<1x64xf32> to vector<8x64xf32>
    %158 = arith.addf %155, %157 : vector<8x64xf32>
    %159 = vector.extract_strided_slice %158 {offsets = [0, 0], sizes = [8, 32], strides = [1, 1]} : vector<8x64xf32> to vector<8x32xf32>
    %160 = vector.shape_cast %159 : vector<8x32xf32> to vector<1x8x32xf32>
    %161 = vector.extract_strided_slice %158 {offsets = [0, 32], sizes = [8, 32], strides = [1, 1]} : vector<8x64xf32> to vector<8x32xf32>
    %162 = vector.shape_cast %161 : vector<8x32xf32> to vector<1x8x32xf32>
    %163 = vector.extract_strided_slice %151 {offsets = [0, 0, 0], sizes = [1, 8, 8], strides = [1, 1, 1]} : vector<1x8x32xf32> to vector<1x8x8xf32>
    %164 = arith.truncf %163 : vector<1x8x8xf32> to vector<1x8x8xbf16>
    %165 = vector.extract_strided_slice %160 {offsets = [0, 0, 0], sizes = [1, 8, 8], strides = [1, 1, 1]} : vector<1x8x32xf32> to vector<1x8x8xf32>
    %166 = arith.truncf %165 : vector<1x8x8xf32> to vector<1x8x8xbf16>
    "tpu.trace_start"() <{level = 10 : i32, message = "bqd,bkd->bqk"}> : () -> ()
    %cst_55 = arith.constant dense<0.000000e+00> : vector<1x8x8xf32>
    %167 = tpu.matmul %164, %166, %cst_55 {dimension_numbers = #tpu.dot_dimension_numbers<[2], [2], [1], [1], [0, 0, 0, 1, 1, 1], [0], [0]>} : vector<1x8x8xbf16>, vector<1x8x8xbf16>, vector<1x8x8xf32> -> vector<1x8x8xf32>
    "tpu.trace_stop"() : () -> ()
    %cst_56 = arith.constant 0.353553385 : f32
    %168 = vector.broadcast %cst_56 : f32 to vector<1x8x8xf32>
    %169 = arith.mulf %167, %168 : vector<1x8x8xf32>
    %cst_57 = arith.constant dense<0xFF800000> : vector<1x8xf32>
    %170 = vector.multi_reduction <maximumf>, %169, %cst_57 [2] : vector<1x8x8xf32> to vector<1x8xf32>
    %171 = vector.shape_cast %170 : vector<1x8xf32> to vector<1x8x1xf32>
    %172 = vector.broadcast %171 : vector<1x8x1xf32> to vector<1x8x8xf32>
    %173 = arith.subf %169, %172 : vector<1x8x8xf32>
    %174 = math.exp %173 : vector<1x8x8xf32>
    %cst_58 = arith.constant dense<0.000000e+00> : vector<1x8xf32>
    %175 = vector.multi_reduction <add>, %174, %cst_58 [2] : vector<1x8x8xf32> to vector<1x8xf32>
    %176 = vector.shape_cast %175 : vector<1x8xf32> to vector<1x8x1xf32>
    %177 = tpu.reciprocal %176 {approx = true} : vector<1x8x1xf32> -> vector<1x8x1xf32>
    %178 = vector.broadcast %177 : vector<1x8x1xf32> to vector<1x8x8xf32>
    %179 = arith.mulf %174, %178 : vector<1x8x8xf32>
    %180 = arith.truncf %179 : vector<1x8x8xf32> to vector<1x8x8xbf16>
    %181 = vector.extract_strided_slice %162 {offsets = [0, 0, 0], sizes = [1, 8, 8], strides = [1, 1, 1]} : vector<1x8x32xf32> to vector<1x8x8xf32>
    %182 = arith.truncf %181 : vector<1x8x8xf32> to vector<1x8x8xbf16>
    "tpu.trace_start"() <{level = 10 : i32, message = "bqk,bkd->bqd"}> : () -> ()
    %cst_59 = arith.constant dense<0.000000e+00> : vector<1x8x8xf32>
    %183 = tpu.matmul %180, %182, %cst_59 {dimension_numbers = #tpu.dot_dimension_numbers<[2], [1], [1], [2], [0, 0, 0, 1, 1, 2], [0], [0]>} : vector<1x8x8xbf16>, vector<1x8x8xbf16>, vector<1x8x8xf32> -> vector<1x8x8xf32>
    "tpu.trace_stop"() : () -> ()
    %184 = vector.extract_strided_slice %151 {offsets = [0, 0, 8], sizes = [1, 8, 8], strides = [1, 1, 1]} : vector<1x8x32xf32> to vector<1x8x8xf32>
    %185 = arith.truncf %184 : vector<1x8x8xf32> to vector<1x8x8xbf16>
    %186 = vector.extract_strided_slice %160 {offsets = [0, 0, 8], sizes = [1, 8, 8], strides = [1, 1, 1]} : vector<1x8x32xf32> to vector<1x8x8xf32>
    %187 = arith.truncf %186 : vector<1x8x8xf32> to vector<1x8x8xbf16>
    "tpu.trace_start"() <{level = 10 : i32, message = "bqd,bkd->bqk"}> : () -> ()
    %cst_60 = arith.constant dense<0.000000e+00> : vector<1x8x8xf32>
    %188 = tpu.matmul %185, %187, %cst_60 {dimension_numbers = #tpu.dot_dimension_numbers<[2], [2], [1], [1], [0, 0, 0, 1, 1, 1], [0], [0]>} : vector<1x8x8xbf16>, vector<1x8x8xbf16>, vector<1x8x8xf32> -> vector<1x8x8xf32>
    "tpu.trace_stop"() : () -> ()
    %cst_61 = arith.constant 0.353553385 : f32
    %189 = vector.broadcast %cst_61 : f32 to vector<1x8x8xf32>
    %190 = arith.mulf %188, %189 : vector<1x8x8xf32>
    %cst_62 = arith.constant dense<0xFF800000> : vector<1x8xf32>
    %191 = vector.multi_reduction <maximumf>, %190, %cst_62 [2] : vector<1x8x8xf32> to vector<1x8xf32>
    %192 = vector.shape_cast %191 : vector<1x8xf32> to vector<1x8x1xf32>
    %193 = vector.broadcast %192 : vector<1x8x1xf32> to vector<1x8x8xf32>
    %194 = arith.subf %190, %193 : vector<1x8x8xf32>
    %195 = math.exp %194 : vector<1x8x8xf32>
    %cst_63 = arith.constant dense<0.000000e+00> : vector<1x8xf32>
    %196 = vector.multi_reduction <add>, %195, %cst_63 [2] : vector<1x8x8xf32> to vector<1x8xf32>
    %197 = vector.shape_cast %196 : vector<1x8xf32> to vector<1x8x1xf32>
    %198 = tpu.reciprocal %197 {approx = true} : vector<1x8x1xf32> -> vector<1x8x1xf32>
    %199 = vector.broadcast %198 : vector<1x8x1xf32> to vector<1x8x8xf32>
    %200 = arith.mulf %195, %199 : vector<1x8x8xf32>
    %201 = arith.truncf %200 : vector<1x8x8xf32> to vector<1x8x8xbf16>
    %202 = vector.extract_strided_slice %162 {offsets = [0, 0, 8], sizes = [1, 8, 8], strides = [1, 1, 1]} : vector<1x8x32xf32> to vector<1x8x8xf32>
    %203 = arith.truncf %202 : vector<1x8x8xf32> to vector<1x8x8xbf16>
    "tpu.trace_start"() <{level = 10 : i32, message = "bqk,bkd->bqd"}> : () -> ()
    %cst_64 = arith.constant dense<0.000000e+00> : vector<1x8x8xf32>
    %204 = tpu.matmul %201, %203, %cst_64 {dimension_numbers = #tpu.dot_dimension_numbers<[2], [1], [1], [2], [0, 0, 0, 1, 1, 2], [0], [0]>} : vector<1x8x8xbf16>, vector<1x8x8xbf16>, vector<1x8x8xf32> -> vector<1x8x8xf32>
    "tpu.trace_stop"() : () -> ()
    %205 = vector.extract_strided_slice %151 {offsets = [0, 0, 16], sizes = [1, 8, 8], strides = [1, 1, 1]} : vector<1x8x32xf32> to vector<1x8x8xf32>
    %206 = arith.truncf %205 : vector<1x8x8xf32> to vector<1x8x8xbf16>
    %207 = vector.extract_strided_slice %160 {offsets = [0, 0, 16], sizes = [1, 8, 8], strides = [1, 1, 1]} : vector<1x8x32xf32> to vector<1x8x8xf32>
    %208 = arith.truncf %207 : vector<1x8x8xf32> to vector<1x8x8xbf16>
    "tpu.trace_start"() <{level = 10 : i32, message = "bqd,bkd->bqk"}> : () -> ()
    %cst_65 = arith.constant dense<0.000000e+00> : vector<1x8x8xf32>
    %209 = tpu.matmul %206, %208, %cst_65 {dimension_numbers = #tpu.dot_dimension_numbers<[2], [2], [1], [1], [0, 0, 0, 1, 1, 1], [0], [0]>} : vector<1x8x8xbf16>, vector<1x8x8xbf16>, vector<1x8x8xf32> -> vector<1x8x8xf32>
    "tpu.trace_stop"() : () -> ()
    %cst_66 = arith.constant 0.353553385 : f32
    %210 = vector.broadcast %cst_66 : f32 to vector<1x8x8xf32>
    %211 = arith.mulf %209, %210 : vector<1x8x8xf32>
    %cst_67 = arith.constant dense<0xFF800000> : vector<1x8xf32>
    %212 = vector.multi_reduction <maximumf>, %211, %cst_67 [2] : vector<1x8x8xf32> to vector<1x8xf32>
    %213 = vector.shape_cast %212 : vector<1x8xf32> to vector<1x8x1xf32>
    %214 = vector.broadcast %213 : vector<1x8x1xf32> to vector<1x8x8xf32>
    %215 = arith.subf %211, %214 : vector<1x8x8xf32>
    %216 = math.exp %215 : vector<1x8x8xf32>
    %cst_68 = arith.constant dense<0.000000e+00> : vector<1x8xf32>
    %217 = vector.multi_reduction <add>, %216, %cst_68 [2] : vector<1x8x8xf32> to vector<1x8xf32>
    %218 = vector.shape_cast %217 : vector<1x8xf32> to vector<1x8x1xf32>
    %219 = tpu.reciprocal %218 {approx = true} : vector<1x8x1xf32> -> vector<1x8x1xf32>
    %220 = vector.broadcast %219 : vector<1x8x1xf32> to vector<1x8x8xf32>
    %221 = arith.mulf %216, %220 : vector<1x8x8xf32>
    %222 = arith.truncf %221 : vector<1x8x8xf32> to vector<1x8x8xbf16>
    %223 = vector.extract_strided_slice %162 {offsets = [0, 0, 16], sizes = [1, 8, 8], strides = [1, 1, 1]} : vector<1x8x32xf32> to vector<1x8x8xf32>
    %224 = arith.truncf %223 : vector<1x8x8xf32> to vector<1x8x8xbf16>
    "tpu.trace_start"() <{level = 10 : i32, message = "bqk,bkd->bqd"}> : () -> ()
    %cst_69 = arith.constant dense<0.000000e+00> : vector<1x8x8xf32>
    %225 = tpu.matmul %222, %224, %cst_69 {dimension_numbers = #tpu.dot_dimension_numbers<[2], [1], [1], [2], [0, 0, 0, 1, 1, 2], [0], [0]>} : vector<1x8x8xbf16>, vector<1x8x8xbf16>, vector<1x8x8xf32> -> vector<1x8x8xf32>
    "tpu.trace_stop"() : () -> ()
    %226 = vector.extract_strided_slice %151 {offsets = [0, 0, 24], sizes = [1, 8, 8], strides = [1, 1, 1]} : vector<1x8x32xf32> to vector<1x8x8xf32>
    %227 = arith.truncf %226 : vector<1x8x8xf32> to vector<1x8x8xbf16>
    %228 = vector.extract_strided_slice %160 {offsets = [0, 0, 24], sizes = [1, 8, 8], strides = [1, 1, 1]} : vector<1x8x32xf32> to vector<1x8x8xf32>
    %229 = arith.truncf %228 : vector<1x8x8xf32> to vector<1x8x8xbf16>
    "tpu.trace_start"() <{level = 10 : i32, message = "bqd,bkd->bqk"}> : () -> ()
    %cst_70 = arith.constant dense<0.000000e+00> : vector<1x8x8xf32>
    %230 = tpu.matmul %227, %229, %cst_70 {dimension_numbers = #tpu.dot_dimension_numbers<[2], [2], [1], [1], [0, 0, 0, 1, 1, 1], [0], [0]>} : vector<1x8x8xbf16>, vector<1x8x8xbf16>, vector<1x8x8xf32> -> vector<1x8x8xf32>
    "tpu.trace_stop"() : () -> ()
    %cst_71 = arith.constant 0.353553385 : f32
    %231 = vector.broadcast %cst_71 : f32 to vector<1x8x8xf32>
    %232 = arith.mulf %230, %231 : vector<1x8x8xf32>
    %cst_72 = arith.constant dense<0xFF800000> : vector<1x8xf32>
    %233 = vector.multi_reduction <maximumf>, %232, %cst_72 [2] : vector<1x8x8xf32> to vector<1x8xf32>
    %234 = vector.shape_cast %233 : vector<1x8xf32> to vector<1x8x1xf32>
    %235 = vector.broadcast %234 : vector<1x8x1xf32> to vector<1x8x8xf32>
    %236 = arith.subf %232, %235 : vector<1x8x8xf32>
    %237 = math.exp %236 : vector<1x8x8xf32>
    %cst_73 = arith.constant dense<0.000000e+00> : vector<1x8xf32>
    %238 = vector.multi_reduction <add>, %237, %cst_73 [2] : vector<1x8x8xf32> to vector<1x8xf32>
    %239 = vector.shape_cast %238 : vector<1x8xf32> to vector<1x8x1xf32>
    %240 = tpu.reciprocal %239 {approx = true} : vector<1x8x1xf32> -> vector<1x8x1xf32>
    %241 = vector.broadcast %240 : vector<1x8x1xf32> to vector<1x8x8xf32>
    %242 = arith.mulf %237, %241 : vector<1x8x8xf32>
    %243 = arith.truncf %242 : vector<1x8x8xf32> to vector<1x8x8xbf16>
    %244 = vector.extract_strided_slice %162 {offsets = [0, 0, 24], sizes = [1, 8, 8], strides = [1, 1, 1]} : vector<1x8x32xf32> to vector<1x8x8xf32>
    %245 = arith.truncf %244 : vector<1x8x8xf32> to vector<1x8x8xbf16>
    "tpu.trace_start"() <{level = 10 : i32, message = "bqk,bkd->bqd"}> : () -> ()
    %cst_74 = arith.constant dense<0.000000e+00> : vector<1x8x8xf32>
    %246 = tpu.matmul %243, %245, %cst_74 {dimension_numbers = #tpu.dot_dimension_numbers<[2], [1], [1], [2], [0, 0, 0, 1, 1, 2], [0], [0]>} : vector<1x8x8xbf16>, vector<1x8x8xbf16>, vector<1x8x8xf32> -> vector<1x8x8xf32>
    "tpu.trace_stop"() : () -> ()
    %247 = tpu.concatenate %183, %204, %225, %246 in 2 : vector<1x8x8xf32>, vector<1x8x8xf32>, vector<1x8x8xf32>, vector<1x8x8xf32> -> vector<1x8x32xf32>
    %248 = vector.shape_cast %247 : vector<1x8x32xf32> to vector<8x32xf32>
    %c0_75 = arith.constant 0 : index
    %c0_76 = arith.constant 0 : index
    %249 = vector.load %arg14[%c0_75, %c0_76] : memref<32x32xf32, #tpu.memory_space<vmem>>, vector<32x32xf32>
    %250 = arith.truncf %248 : vector<8x32xf32> to vector<8x32xbf16>
    %251 = arith.truncf %249 : vector<32x32xf32> to vector<32x32xbf16>
    %cst_77 = arith.constant dense<0.000000e+00> : vector<8x32xf32>
    %252 = tpu.matmul %250, %251, %cst_77 {dimension_numbers = #tpu.dot_dimension_numbers<[1], [0], [0], [1], [0, 0, 1, 1], [], []>} : vector<8x32xbf16>, vector<32x32xbf16>, vector<8x32xf32> -> vector<8x32xf32>
    %c0_78 = arith.constant 0 : index
    %c0_79 = arith.constant 0 : index
    %253 = vector.load %arg15[%c0_78, %c0_79] : memref<1x32xf32, #tpu.memory_space<vmem>>, vector<1x32xf32>
    %254 = vector.broadcast %253 : vector<1x32xf32> to vector<8x32xf32>
    %255 = arith.addf %252, %254 : vector<8x32xf32>
    %256 = arith.addf %141, %255 : vector<8x32xf32>
    %c0_80 = arith.constant 0 : index
    %c0_81 = arith.constant 0 : index
    %257 = vector.load %arg16[%c0_80, %c0_81] : memref<1x32xf32, #tpu.memory_space<vmem>>, vector<1x32xf32>
    %c0_82 = arith.constant 0 : index
    %c0_83 = arith.constant 0 : index
    %258 = vector.load %arg17[%c0_82, %c0_83] : memref<1x32xf32, #tpu.memory_space<vmem>>, vector<1x32xf32>
    %cst_84 = arith.constant dense<0.000000e+00> : vector<8xf32>
    %259 = vector.multi_reduction <add>, %256, %cst_84 [1] : vector<8x32xf32> to vector<8xf32>
    %260 = vector.shape_cast %259 : vector<8xf32> to vector<8x1xf32>
    %cst_85 = arith.constant 3.200000e+01 : f32
    %261 = vector.broadcast %cst_85 : f32 to vector<8x1xf32>
    %262 = arith.divf %260, %261 : vector<8x1xf32>
    %263 = vector.broadcast %262 : vector<8x1xf32> to vector<8x32xf32>
    %264 = arith.subf %256, %263 : vector<8x32xf32>
    %265 = arith.mulf %264, %264 : vector<8x32xf32>
    %cst_86 = arith.constant dense<0.000000e+00> : vector<8xf32>
    %266 = vector.multi_reduction <add>, %265, %cst_86 [1] : vector<8x32xf32> to vector<8xf32>
    %267 = vector.shape_cast %266 : vector<8xf32> to vector<8x1xf32>
    %cst_87 = arith.constant 3.200000e+01 : f32
    %268 = vector.broadcast %cst_87 : f32 to vector<8x1xf32>
    %269 = arith.divf %267, %268 : vector<8x1xf32>
    %270 = vector.broadcast %262 : vector<8x1xf32> to vector<8x32xf32>
    %271 = arith.subf %256, %270 : vector<8x32xf32>
    %cst_88 = arith.constant 9.99999974E-6 : f32
    %272 = vector.broadcast %cst_88 : f32 to vector<8x1xf32>
    %273 = arith.addf %269, %272 : vector<8x1xf32>
    %274 = math.rsqrt %273 : vector<8x1xf32>
    %275 = vector.broadcast %274 : vector<8x1xf32> to vector<8x32xf32>
    %276 = arith.mulf %271, %275 : vector<8x32xf32>
    %277 = vector.broadcast %257 : vector<1x32xf32> to vector<8x32xf32>
    %278 = arith.mulf %276, %277 : vector<8x32xf32>
    %279 = vector.broadcast %258 : vector<1x32xf32> to vector<8x32xf32>
    %280 = arith.addf %278, %279 : vector<8x32xf32>
    %c0_89 = arith.constant 0 : index
    %c0_90 = arith.constant 0 : index
    %281 = vector.load %arg18[%c0_89, %c0_90] : memref<32x128xf32, #tpu.memory_space<vmem>>, vector<32x128xf32>
    %282 = arith.truncf %280 : vector<8x32xf32> to vector<8x32xbf16>
    %283 = arith.truncf %281 : vector<32x128xf32> to vector<32x128xbf16>
    %cst_91 = arith.constant dense<0.000000e+00> : vector<8x128xf32>
    %284 = tpu.matmul %282, %283, %cst_91 {dimension_numbers = #tpu.dot_dimension_numbers<[1], [0], [0], [1], [0, 0, 1, 1], [], []>} : vector<8x32xbf16>, vector<32x128xbf16>, vector<8x128xf32> -> vector<8x128xf32>
    %c0_92 = arith.constant 0 : index
    %c0_93 = arith.constant 0 : index
    %285 = vector.load %arg19[%c0_92, %c0_93] : memref<1x128xf32, #tpu.memory_space<vmem>>, vector<1x128xf32>
    %286 = vector.broadcast %285 : vector<1x128xf32> to vector<8x128xf32>
    %287 = arith.addf %284, %286 : vector<8x128xf32>
    %cst_94 = arith.constant 0.000000e+00 : f32
    %288 = vector.broadcast %cst_94 : f32 to vector<8x128xf32>
    %289 = arith.maximumf %287, %288 : vector<8x128xf32>
    %c0_95 = arith.constant 0 : index
    %c0_96 = arith.constant 0 : index
    %290 = vector.load %arg20[%c0_95, %c0_96] : memref<128x32xf32, #tpu.memory_space<vmem>>, vector<128x32xf32>
    %291 = arith.truncf %289 : vector<8x128xf32> to vector<8x128xbf16>
    %292 = arith.truncf %290 : vector<128x32xf32> to vector<128x32xbf16>
    %cst_97 = arith.constant dense<0.000000e+00> : vector<8x32xf32>
    %293 = tpu.matmul %291, %292, %cst_97 {dimension_numbers = #tpu.dot_dimension_numbers<[1], [0], [0], [1], [0, 0, 1, 1], [], []>} : vector<8x128xbf16>, vector<128x32xbf16>, vector<8x32xf32> -> vector<8x32xf32>
    %c0_98 = arith.constant 0 : index
    %c0_99 = arith.constant 0 : index
    %294 = vector.load %arg21[%c0_98, %c0_99] : memref<1x32xf32, #tpu.memory_space<vmem>>, vector<1x32xf32>
    %295 = vector.broadcast %294 : vector<1x32xf32> to vector<8x32xf32>
    %296 = arith.addf %293, %295 : vector<8x32xf32>
    %297 = arith.addf %280, %296 : vector<8x32xf32>
    %c0_100 = arith.constant 0 : index
    %c0_101 = arith.constant 0 : index
    %298 = vector.load %arg22[%c0_100, %c0_101] : memref<1x32xf32, #tpu.memory_space<vmem>>, vector<1x32xf32>
    %c0_102 = arith.constant 0 : index
    %c0_103 = arith.constant 0 : index
    %299 = vector.load %arg23[%c0_102, %c0_103] : memref<1x32xf32, #tpu.memory_space<vmem>>, vector<1x32xf32>
    %cst_104 = arith.constant dense<0.000000e+00> : vector<8xf32>
    %300 = vector.multi_reduction <add>, %297, %cst_104 [1] : vector<8x32xf32> to vector<8xf32>
    %301 = vector.shape_cast %300 : vector<8xf32> to vector<8x1xf32>
    %cst_105 = arith.constant 3.200000e+01 : f32
    %302 = vector.broadcast %cst_105 : f32 to vector<8x1xf32>
    %303 = arith.divf %301, %302 : vector<8x1xf32>
    %304 = vector.broadcast %303 : vector<8x1xf32> to vector<8x32xf32>
    %305 = arith.subf %297, %304 : vector<8x32xf32>
    %306 = arith.mulf %305, %305 : vector<8x32xf32>
    %cst_106 = arith.constant dense<0.000000e+00> : vector<8xf32>
    %307 = vector.multi_reduction <add>, %306, %cst_106 [1] : vector<8x32xf32> to vector<8xf32>
    %308 = vector.shape_cast %307 : vector<8xf32> to vector<8x1xf32>
    %cst_107 = arith.constant 3.200000e+01 : f32
    %309 = vector.broadcast %cst_107 : f32 to vector<8x1xf32>
    %310 = arith.divf %308, %309 : vector<8x1xf32>
    %311 = vector.broadcast %303 : vector<8x1xf32> to vector<8x32xf32>
    %312 = arith.subf %297, %311 : vector<8x32xf32>
    %cst_108 = arith.constant 9.99999974E-6 : f32
    %313 = vector.broadcast %cst_108 : f32 to vector<8x1xf32>
    %314 = arith.addf %310, %313 : vector<8x1xf32>
    %315 = math.rsqrt %314 : vector<8x1xf32>
    %316 = vector.broadcast %315 : vector<8x1xf32> to vector<8x32xf32>
    %317 = arith.mulf %312, %316 : vector<8x32xf32>
    %318 = vector.broadcast %298 : vector<1x32xf32> to vector<8x32xf32>
    %319 = arith.mulf %317, %318 : vector<8x32xf32>
    %320 = vector.broadcast %299 : vector<1x32xf32> to vector<8x32xf32>
    %321 = arith.addf %319, %320 : vector<8x32xf32>
    %322 = vector.shape_cast %321 : vector<8x32xf32> to vector<1x8x32xf32>
    %c0_109 = arith.constant 0 : index
    %c0_110 = arith.constant 0 : index
    %c0_111 = arith.constant 0 : index
    %323 = vector.load %arg24[%c0_109, %c0_110, %c0_111] : memref<1x8x32xf32, #tpu.memory_space<vmem>>, vector<1x8x32xf32>
    tpu.vector_store %arg24[%c0_109, %c0_110, %c0_111], %322 {strides = array<i32>} : memref<1x8x32xf32, #tpu.memory_space<vmem>>, vector<1x8x32xf32>,
    return
  }
  func.func @transform_0(%arg0: i32) -> (i32, i32, i32) {
    %c0_i32 = arith.constant 0 : i32
    %c0_i32_0 = arith.constant 0 : i32
    %c0_i32_1 = arith.constant 0 : i32
    return %arg0, %c0_i32, %c0_i32_0 : i32, i32, i32
  }
  func.func @transform_1(%arg0: i32) -> (i32, i32, i32) {
    %c0_i32 = arith.constant 0 : i32
    %c0_i32_0 = arith.constant 0 : i32
    %c0_i32_1 = arith.constant 0 : i32
    return %arg0, %c0_i32, %c0_i32_0 : i32, i32, i32
  }
  func.func @transform_2(%arg0: i32) -> (i32, i32) {
    %c0_i32 = arith.constant 0 : i32
    %c0_i32_0 = arith.constant 0 : i32
    %c0_i32_1 = arith.constant 0 : i32
    return %c0_i32, %c0_i32_0 : i32, i32
  }
  func.func @transform_3(%arg0: i32) -> (i32, i32) {
    %c0_i32 = arith.constant 0 : i32
    %c0_i32_0 = arith.constant 0 : i32
    %c0_i32_1 = arith.constant 0 : i32
    return %c0_i32, %c0_i32_0 : i32, i32
  }
  func.func @transform_4(%arg0: i32) -> (i32, i32) {
    %c0_i32 = arith.constant 0 : i32
    %c0_i32_0 = arith.constant 0 : i32
    %c0_i32_1 = arith.constant 0 : i32
    return %c0_i32, %c0_i32_0 : i32, i32
  }
  func.func @transform_5(%arg0: i32) -> (i32, i32) {
    %c0_i32 = arith.constant 0 : i32
    %c0_i32_0 = arith.constant 0 : i32
    %c0_i32_1 = arith.constant 0 : i32
    return %c0_i32, %c0_i32_0 : i32, i32
  }
  func.func @transform_6(%arg0: i32) -> (i32, i32) {
    %c0_i32 = arith.constant 0 : i32
    %c0_i32_0 = arith.constant 0 : i32
    %c0_i32_1 = arith.constant 0 : i32
    return %c0_i32, %c0_i32_0 : i32, i32
  }
  func.func @transform_7(%arg0: i32) -> (i32, i32) {
    %c0_i32 = arith.constant 0 : i32
    %c0_i32_0 = arith.constant 0 : i32
    %c0_i32_1 = arith.constant 0 : i32
    return %c0_i32, %c0_i32_0 : i32, i32
  }
  func.func @transform_8(%arg0: i32) -> (i32, i32) {
    %c0_i32 = arith.constant 0 : i32
    %c0_i32_0 = arith.constant 0 : i32
    %c0_i32_1 = arith.constant 0 : i32
    return %c0_i32, %c0_i32_0 : i32, i32
  }
  func.func @transform_9(%arg0: i32) -> (i32, i32) {
    %c0_i32 = arith.constant 0 : i32
    %c0_i32_0 = arith.constant 0 : i32
    %c0_i32_1 = arith.constant 0 : i32
    return %c0_i32, %c0_i32_0 : i32, i32
  }
  func.func @transform_10(%arg0: i32) -> (i32, i32) {
    %c0_i32 = arith.constant 0 : i32
    %c0_i32_0 = arith.constant 0 : i32
    %c0_i32_1 = arith.constant 0 : i32
    return %c0_i32, %c0_i32_0 : i32, i32
  }
  func.func @transform_11(%arg0: i32) -> (i32, i32) {
    %c0_i32 = arith.constant 0 : i32
    %c0_i32_0 = arith.constant 0 : i32
    %c0_i32_1 = arith.constant 0 : i32
    return %c0_i32, %c0_i32_0 : i32, i32
  }
  func.func @transform_12(%arg0: i32) -> (i32, i32) {
    %c0_i32 = arith.constant 0 : i32
    %c0_i32_0 = arith.constant 0 : i32
    %c0_i32_1 = arith.constant 0 : i32
    return %c0_i32, %c0_i32_0 : i32, i32
  }
  func.func @transform_13(%arg0: i32) -> (i32, i32) {
    %c0_i32 = arith.constant 0 : i32
    %c0_i32_0 = arith.constant 0 : i32
    %c0_i32_1 = arith.constant 0 : i32
    return %c0_i32, %c0_i32_0 : i32, i32
  }
  func.func @transform_14(%arg0: i32) -> (i32, i32) {
    %c0_i32 = arith.constant 0 : i32
    %c0_i32_0 = arith.constant 0 : i32
    %c0_i32_1 = arith.constant 0 : i32
    return %c0_i32, %c0_i32_0 : i32, i32
  }
  func.func @transform_15(%arg0: i32) -> (i32, i32) {
    %c0_i32 = arith.constant 0 : i32
    %c0_i32_0 = arith.constant 0 : i32
    %c0_i32_1 = arith.constant 0 : i32
    return %c0_i32, %c0_i32_0 : i32, i32
  }
  func.func @transform_16(%arg0: i32) -> (i32, i32) {
    %c0_i32 = arith.constant 0 : i32
    %c0_i32_0 = arith.constant 0 : i32
    %c0_i32_1 = arith.constant 0 : i32
    return %c0_i32, %c0_i32_0 : i32, i32
  }
  func.func @transform_17(%arg0: i32) -> (i32, i32) {
    %c0_i32 = arith.constant 0 : i32
    %c0_i32_0 = arith.constant 0 : i32
    %c0_i32_1 = arith.constant 0 : i32
    return %c0_i32, %c0_i32_0 : i32, i32
  }
  func.func @transform_18(%arg0: i32) -> (i32, i32) {
    %c0_i32 = arith.constant 0 : i32
    %c0_i32_0 = arith.constant 0 : i32
    %c0_i32_1 = arith.constant 0 : i32
    return %c0_i32, %c0_i32_0 : i32, i32
  }
  func.func @transform_19(%arg0: i32) -> (i32, i32) {
    %c0_i32 = arith.constant 0 : i32
    %c0_i32_0 = arith.constant 0 : i32
    %c0_i32_1 = arith.constant 0 : i32
    return %c0_i32, %c0_i32_0 : i32, i32
  }
  func.func @transform_20(%arg0: i32) -> (i32, i32) {
    %c0_i32 = arith.constant 0 : i32
    %c0_i32_0 = arith.constant 0 : i32
    %c0_i32_1 = arith.constant 0 : i32
    return %c0_i32, %c0_i32_0 : i32, i32
  }
  func.func @transform_21(%arg0: i32) -> (i32, i32) {
    %c0_i32 = arith.constant 0 : i32
    %c0_i32_0 = arith.constant 0 : i32
    %c0_i32_1 = arith.constant 0 : i32
    return %c0_i32, %c0_i32_0 : i32, i32
  }
  func.func @transform_22(%arg0: i32) -> (i32, i32) {
    %c0_i32 = arith.constant 0 : i32
    %c0_i32_0 = arith.constant 0 : i32
    %c0_i32_1 = arith.constant 0 : i32
    return %c0_i32, %c0_i32_0 : i32, i32
  }
  func.func @transform_23(%arg0: i32) -> (i32, i32, i32) {
    %c0_i32 = arith.constant 0 : i32
    %c0_i32_0 = arith.constant 0 : i32
    %c0_i32_1 = arith.constant 0 : i32
    return %arg0, %c0_i32, %c0_i32_0 : i32, i32, i32
  }
}

module attributes {stable_mosaic.version = 11 : i64} {
  func.func @_layernorm_kernel(%arg0: i32, %arg1: memref<1x8x32xf32, #tpu.memory_space<vmem>>, %arg2: memref<1x32xf32, #tpu.memory_space<vmem>>, %arg3: memref<1x32xf32, #tpu.memory_space<vmem>>, %arg4: memref<1x8x32xf32, #tpu.memory_space<vmem>>) attributes {dimension_semantics = [#tpu.dimension_semantics<parallel>], iteration_bounds = array<i64: 2>, scalar_prefetch = 0 : i64, scratch_operands = 0 : i64, tpu.core_type = #tpu.core_type<tc>, window_params = [{transform_indices = @transform_0, window_bounds = array<i64: 1, 8, 32>}, {pipeline_mode = #tpu.pipeline_mode<synchronous>, transform_indices = @transform_1, window_bounds = array<i64: 1, 32>}, {pipeline_mode = #tpu.pipeline_mode<synchronous>, transform_indices = @transform_2, window_bounds = array<i64: 1, 32>}, {transform_indices = @transform_3, window_bounds = array<i64: 1, 8, 32>}]} {
    %c0 = arith.constant 0 : index
    %c0_0 = arith.constant 0 : index
    %c0_1 = arith.constant 0 : index
    %0 = vector.load %arg1[%c0, %c0_0, %c0_1] : memref<1x8x32xf32, #tpu.memory_space<vmem>>, vector<1x8x32xf32>
    %1 = vector.shape_cast %0 : vector<1x8x32xf32> to vector<8x32xf32>
    %c0_2 = arith.constant 0 : index
    %c0_3 = arith.constant 0 : index
    %2 = vector.load %arg2[%c0_2, %c0_3] : memref<1x32xf32, #tpu.memory_space<vmem>>, vector<1x32xf32>
    %c0_4 = arith.constant 0 : index
    %c0_5 = arith.constant 0 : index
    %3 = vector.load %arg3[%c0_4, %c0_5] : memref<1x32xf32, #tpu.memory_space<vmem>>, vector<1x32xf32>
    %cst = arith.constant dense<0.000000e+00> : vector<8xf32>
    %4 = vector.multi_reduction <add>, %1, %cst [1] : vector<8x32xf32> to vector<8xf32>
    %5 = vector.shape_cast %4 : vector<8xf32> to vector<8x1xf32>
    %cst_6 = arith.constant 3.200000e+01 : f32
    %6 = vector.broadcast %cst_6 : f32 to vector<8x1xf32>
    %7 = arith.divf %5, %6 : vector<8x1xf32>
    %8 = vector.broadcast %7 : vector<8x1xf32> to vector<8x32xf32>
    %9 = arith.subf %1, %8 : vector<8x32xf32>
    %10 = arith.mulf %9, %9 : vector<8x32xf32>
    %cst_7 = arith.constant dense<0.000000e+00> : vector<8xf32>
    %11 = vector.multi_reduction <add>, %10, %cst_7 [1] : vector<8x32xf32> to vector<8xf32>
    %12 = vector.shape_cast %11 : vector<8xf32> to vector<8x1xf32>
    %cst_8 = arith.constant 3.200000e+01 : f32
    %13 = vector.broadcast %cst_8 : f32 to vector<8x1xf32>
    %14 = arith.divf %12, %13 : vector<8x1xf32>
    %15 = vector.broadcast %7 : vector<8x1xf32> to vector<8x32xf32>
    %16 = arith.subf %1, %15 : vector<8x32xf32>
    %cst_9 = arith.constant 9.99999974E-6 : f32
    %17 = vector.broadcast %cst_9 : f32 to vector<8x1xf32>
    %18 = arith.addf %14, %17 : vector<8x1xf32>
    %19 = math.rsqrt %18 : vector<8x1xf32>
    %20 = vector.broadcast %19 : vector<8x1xf32> to vector<8x32xf32>
    %21 = arith.mulf %16, %20 : vector<8x32xf32>
    %22 = vector.broadcast %2 : vector<1x32xf32> to vector<8x32xf32>
    %23 = arith.mulf %21, %22 : vector<8x32xf32>
    %24 = vector.broadcast %3 : vector<1x32xf32> to vector<8x32xf32>
    %25 = arith.addf %23, %24 : vector<8x32xf32>
    %26 = vector.shape_cast %25 : vector<8x32xf32> to vector<1x8x32xf32>
    %c0_10 = arith.constant 0 : index
    %c0_11 = arith.constant 0 : index
    %c0_12 = arith.constant 0 : index
    %27 = vector.load %arg4[%c0_10, %c0_11, %c0_12] : memref<1x8x32xf32, #tpu.memory_space<vmem>>, vector<1x8x32xf32>
    tpu.vector_store %arg4[%c0_10, %c0_11, %c0_12], %26 {strides = array<i32>} : memref<1x8x32xf32, #tpu.memory_space<vmem>>, vector<1x8x32xf32>,
    return
  }
  func.func @transform_0(%arg0: i32) -> (i32, i32, i32) {
    %c0_i32 = arith.constant 0 : i32
    %c0_i32_0 = arith.constant 0 : i32
    %c0_i32_1 = arith.constant 0 : i32
    return %arg0, %c0_i32, %c0_i32_0 : i32, i32, i32
  }
  func.func @transform_1(%arg0: i32) -> (i32, i32) {
    %c0_i32 = arith.constant 0 : i32
    %c0_i32_0 = arith.constant 0 : i32
    %c0_i32_1 = arith.constant 0 : i32
    return %c0_i32, %c0_i32_0 : i32, i32
  }
  func.func @transform_2(%arg0: i32) -> (i32, i32) {
    %c0_i32 = arith.constant 0 : i32
    %c0_i32_0 = arith.constant 0 : i32
    %c0_i32_1 = arith.constant 0 : i32
    return %c0_i32, %c0_i32_0 : i32, i32
  }
  func.func @transform_3(%arg0: i32) -> (i32, i32, i32) {
    %c0_i32 = arith.constant 0 : i32
    %c0_i32_0 = arith.constant 0 : i32
    %c0_i32_1 = arith.constant 0 : i32
    return %arg0, %c0_i32, %c0_i32_0 : i32, i32, i32
  }
}

module attributes {stable_mosaic.version = 11 : i64} {
  func.func @_encoder_layer_kernel(%arg0: i32, %arg1: memref<1x8x32xf32, #tpu.memory_space<vmem>>, %arg2: memref<32x96xf32, #tpu.memory_space<vmem>>, %arg3: memref<1x96xf32, #tpu.memory_space<vmem>>, %arg4: memref<32x32xf32, #tpu.memory_space<vmem>>, %arg5: memref<1x32xf32, #tpu.memory_space<vmem>>, %arg6: memref<1x32xf32, #tpu.memory_space<vmem>>, %arg7: memref<1x32xf32, #tpu.memory_space<vmem>>, %arg8: memref<32x128xf32, #tpu.memory_space<vmem>>, %arg9: memref<1x128xf32, #tpu.memory_space<vmem>>, %arg10: memref<128x32xf32, #tpu.memory_space<vmem>>, %arg11: memref<1x32xf32, #tpu.memory_space<vmem>>, %arg12: memref<1x32xf32, #tpu.memory_space<vmem>>, %arg13: memref<1x32xf32, #tpu.memory_space<vmem>>, %arg14: memref<1x8x32xf32, #tpu.memory_space<vmem>>) attributes {dimension_semantics = [#tpu.dimension_semantics<parallel>], iteration_bounds = array<i64: 2>, scalar_prefetch = 0 : i64, scratch_operands = 0 : i64, tpu.core_type = #tpu.core_type<tc>, window_params = [{transform_indices = @transform_0, window_bounds = array<i64: 1, 8, 32>}, {pipeline_mode = #tpu.pipeline_mode<synchronous>, transform_indices = @transform_1, window_bounds = array<i64: 32, 96>}, {pipeline_mode = #tpu.pipeline_mode<synchronous>, transform_indices = @transform_2, window_bounds = array<i64: 1, 96>}, {pipeline_mode = #tpu.pipeline_mode<synchronous>, transform_indices = @transform_3, window_bounds = array<i64: 32, 32>}, {pipeline_mode = #tpu.pipeline_mode<synchronous>, transform_indices = @transform_4, window_bounds = array<i64: 1, 32>}, {pipeline_mode = #tpu.pipeline_mode<synchronous>, transform_indices = @transform_5, window_bounds = array<i64: 1, 32>}, {pipeline_mode = #tpu.pipeline_mode<synchronous>, transform_indices = @transform_6, window_bounds = array<i64: 1, 32>}, {pipeline_mode = #tpu.pipeline_mode<synchronous>, transform_indices = @transform_7, window_bounds = array<i64: 32, 128>}, {pipeline_mode = #tpu.pipeline_mode<synchronous>, transform_indices = @transform_8, window_bounds = array<i64: 1, 128>}, {pipeline_mode = #tpu.pipeline_mode<synchronous>, transform_indices = @transform_9, window_bounds = array<i64: 128, 32>}, {pipeline_mode = #tpu.pipeline_mode<synchronous>, transform_indices = @transform_10, window_bounds = array<i64: 1, 32>}, {pipeline_mode = #tpu.pipeline_mode<synchronous>, transform_indices = @transform_11, window_bounds = array<i64: 1, 32>}, {pipeline_mode = #tpu.pipeline_mode<synchronous>, transform_indices = @transform_12, window_bounds = array<i64: 1, 32>}, {transform_indices = @transform_13, window_bounds = array<i64: 1, 8, 32>}]} {
    %c0 = arith.constant 0 : index
    %c0_0 = arith.constant 0 : index
    %c0_1 = arith.constant 0 : index
    %0 = vector.load %arg1[%c0, %c0_0, %c0_1] : memref<1x8x32xf32, #tpu.memory_space<vmem>>, vector<1x8x32xf32>
    %1 = vector.shape_cast %0 : vector<1x8x32xf32> to vector<8x32xf32>
    %c0_2 = arith.constant 0 : index
    %c0_3 = arith.constant 0 : index
    %2 = vector.load %arg2[%c0_2, %c0_3] : memref<32x96xf32, #tpu.memory_space<vmem>>, vector<32x96xf32>
    %3 = arith.truncf %1 : vector<8x32xf32> to vector<8x32xbf16>
    %4 = arith.truncf %2 : vector<32x96xf32> to vector<32x96xbf16>
    %cst = arith.constant dense<0.000000e+00> : vector<8x96xf32>
    %5 = tpu.matmul %3, %4, %cst {dimension_numbers = #tpu.dot_dimension_numbers<[1], [0], [0], [1], [0, 0, 1, 1], [], []>} : vector<8x32xbf16>, vector<32x96xbf16>, vector<8x96xf32> -> vector<8x96xf32>
    %c0_4 = arith.constant 0 : index
    %c0_5 = arith.constant 0 : index
    %6 = vector.load %arg3[%c0_4, %c0_5] : memref<1x96xf32, #tpu.memory_space<vmem>>, vector<1x96xf32>
    %7 = vector.broadcast %6 : vector<1x96xf32> to vector<8x96xf32>
    %8 = arith.addf %5, %7 : vector<8x96xf32>
    %9 = vector.extract_strided_slice %8 {offsets = [0, 0], sizes = [8, 32], strides = [1, 1]} : vector<8x96xf32> to vector<8x32xf32>
    %10 = vector.shape_cast %9 : vector<8x32xf32> to vector<1x8x32xf32>
    %11 = vector.extract_strided_slice %8 {offsets = [0, 32], sizes = [8, 32], strides = [1, 1]} : vector<8x96xf32> to vector<8x32xf32>
    %12 = vector.shape_cast %11 : vector<8x32xf32> to vector<1x8x32xf32>
    %13 = vector.extract_strided_slice %8 {offsets = [0, 64], sizes = [8, 32], strides = [1, 1]} : vector<8x96xf32> to vector<8x32xf32>
    %14 = vector.shape_cast %13 : vector<8x32xf32> to vector<1x8x32xf32>
    %15 = vector.extract_strided_slice %10 {offsets = [0, 0, 0], sizes = [1, 8, 8], strides = [1, 1, 1]} : vector<1x8x32xf32> to vector<1x8x8xf32>
    %16 = arith.truncf %15 : vector<1x8x8xf32> to vector<1x8x8xbf16>
    %17 = vector.extract_strided_slice %12 {offsets = [0, 0, 0], sizes = [1, 8, 8], strides = [1, 1, 1]} : vector<1x8x32xf32> to vector<1x8x8xf32>
    %18 = arith.truncf %17 : vector<1x8x8xf32> to vector<1x8x8xbf16>
    "tpu.trace_start"() <{level = 10 : i32, message = "bqd,bkd->bqk"}> : () -> ()
    %cst_6 = arith.constant dense<0.000000e+00> : vector<1x8x8xf32>
    %19 = tpu.matmul %16, %18, %cst_6 {dimension_numbers = #tpu.dot_dimension_numbers<[2], [2], [1], [1], [0, 0, 0, 1, 1, 1], [0], [0]>} : vector<1x8x8xbf16>, vector<1x8x8xbf16>, vector<1x8x8xf32> -> vector<1x8x8xf32>
    "tpu.trace_stop"() : () -> ()
    %cst_7 = arith.constant 0.353553385 : f32
    %20 = vector.broadcast %cst_7 : f32 to vector<1x8x8xf32>
    %21 = arith.mulf %19, %20 : vector<1x8x8xf32>
    %cst_8 = arith.constant dense<0xFF800000> : vector<1x8xf32>
    %22 = vector.multi_reduction <maximumf>, %21, %cst_8 [2] : vector<1x8x8xf32> to vector<1x8xf32>
    %23 = vector.shape_cast %22 : vector<1x8xf32> to vector<1x8x1xf32>
    %24 = vector.broadcast %23 : vector<1x8x1xf32> to vector<1x8x8xf32>
    %25 = arith.subf %21, %24 : vector<1x8x8xf32>
    %26 = math.exp %25 : vector<1x8x8xf32>
    %cst_9 = arith.constant dense<0.000000e+00> : vector<1x8xf32>
    %27 = vector.multi_reduction <add>, %26, %cst_9 [2] : vector<1x8x8xf32> to vector<1x8xf32>
    %28 = vector.shape_cast %27 : vector<1x8xf32> to vector<1x8x1xf32>
    %29 = tpu.reciprocal %28 {approx = true} : vector<1x8x1xf32> -> vector<1x8x1xf32>
    %30 = vector.broadcast %29 : vector<1x8x1xf32> to vector<1x8x8xf32>
    %31 = arith.mulf %26, %30 : vector<1x8x8xf32>
    %32 = arith.truncf %31 : vector<1x8x8xf32> to vector<1x8x8xbf16>
    %33 = vector.extract_strided_slice %14 {offsets = [0, 0, 0], sizes = [1, 8, 8], strides = [1, 1, 1]} : vector<1x8x32xf32> to vector<1x8x8xf32>
    %34 = arith.truncf %33 : vector<1x8x8xf32> to vector<1x8x8xbf16>
    "tpu.trace_start"() <{level = 10 : i32, message = "bqk,bkd->bqd"}> : () -> ()
    %cst_10 = arith.constant dense<0.000000e+00> : vector<1x8x8xf32>
    %35 = tpu.matmul %32, %34, %cst_10 {dimension_numbers = #tpu.dot_dimension_numbers<[2], [1], [1], [2], [0, 0, 0, 1, 1, 2], [0], [0]>} : vector<1x8x8xbf16>, vector<1x8x8xbf16>, vector<1x8x8xf32> -> vector<1x8x8xf32>
    "tpu.trace_stop"() : () -> ()
    %36 = vector.extract_strided_slice %10 {offsets = [0, 0, 8], sizes = [1, 8, 8], strides = [1, 1, 1]} : vector<1x8x32xf32> to vector<1x8x8xf32>
    %37 = arith.truncf %36 : vector<1x8x8xf32> to vector<1x8x8xbf16>
    %38 = vector.extract_strided_slice %12 {offsets = [0, 0, 8], sizes = [1, 8, 8], strides = [1, 1, 1]} : vector<1x8x32xf32> to vector<1x8x8xf32>
    %39 = arith.truncf %38 : vector<1x8x8xf32> to vector<1x8x8xbf16>
    "tpu.trace_start"() <{level = 10 : i32, message = "bqd,bkd->bqk"}> : () -> ()
    %cst_11 = arith.constant dense<0.000000e+00> : vector<1x8x8xf32>
    %40 = tpu.matmul %37, %39, %cst_11 {dimension_numbers = #tpu.dot_dimension_numbers<[2], [2], [1], [1], [0, 0, 0, 1, 1, 1], [0], [0]>} : vector<1x8x8xbf16>, vector<1x8x8xbf16>, vector<1x8x8xf32> -> vector<1x8x8xf32>
    "tpu.trace_stop"() : () -> ()
    %cst_12 = arith.constant 0.353553385 : f32
    %41 = vector.broadcast %cst_12 : f32 to vector<1x8x8xf32>
    %42 = arith.mulf %40, %41 : vector<1x8x8xf32>
    %cst_13 = arith.constant dense<0xFF800000> : vector<1x8xf32>
    %43 = vector.multi_reduction <maximumf>, %42, %cst_13 [2] : vector<1x8x8xf32> to vector<1x8xf32>
    %44 = vector.shape_cast %43 : vector<1x8xf32> to vector<1x8x1xf32>
    %45 = vector.broadcast %44 : vector<1x8x1xf32> to vector<1x8x8xf32>
    %46 = arith.subf %42, %45 : vector<1x8x8xf32>
    %47 = math.exp %46 : vector<1x8x8xf32>
    %cst_14 = arith.constant dense<0.000000e+00> : vector<1x8xf32>
    %48 = vector.multi_reduction <add>, %47, %cst_14 [2] : vector<1x8x8xf32> to vector<1x8xf32>
    %49 = vector.shape_cast %48 : vector<1x8xf32> to vector<1x8x1xf32>
    %50 = tpu.reciprocal %49 {approx = true} : vector<1x8x1xf32> -> vector<1x8x1xf32>
    %51 = vector.broadcast %50 : vector<1x8x1xf32> to vector<1x8x8xf32>
    %52 = arith.mulf %47, %51 : vector<1x8x8xf32>
    %53 = arith.truncf %52 : vector<1x8x8xf32> to vector<1x8x8xbf16>
    %54 = vector.extract_strided_slice %14 {offsets = [0, 0, 8], sizes = [1, 8, 8], strides = [1, 1, 1]} : vector<1x8x32xf32> to vector<1x8x8xf32>
    %55 = arith.truncf %54 : vector<1x8x8xf32> to vector<1x8x8xbf16>
    "tpu.trace_start"() <{level = 10 : i32, message = "bqk,bkd->bqd"}> : () -> ()
    %cst_15 = arith.constant dense<0.000000e+00> : vector<1x8x8xf32>
    %56 = tpu.matmul %53, %55, %cst_15 {dimension_numbers = #tpu.dot_dimension_numbers<[2], [1], [1], [2], [0, 0, 0, 1, 1, 2], [0], [0]>} : vector<1x8x8xbf16>, vector<1x8x8xbf16>, vector<1x8x8xf32> -> vector<1x8x8xf32>
    "tpu.trace_stop"() : () -> ()
    %57 = vector.extract_strided_slice %10 {offsets = [0, 0, 16], sizes = [1, 8, 8], strides = [1, 1, 1]} : vector<1x8x32xf32> to vector<1x8x8xf32>
    %58 = arith.truncf %57 : vector<1x8x8xf32> to vector<1x8x8xbf16>
    %59 = vector.extract_strided_slice %12 {offsets = [0, 0, 16], sizes = [1, 8, 8], strides = [1, 1, 1]} : vector<1x8x32xf32> to vector<1x8x8xf32>
    %60 = arith.truncf %59 : vector<1x8x8xf32> to vector<1x8x8xbf16>
    "tpu.trace_start"() <{level = 10 : i32, message = "bqd,bkd->bqk"}> : () -> ()
    %cst_16 = arith.constant dense<0.000000e+00> : vector<1x8x8xf32>
    %61 = tpu.matmul %58, %60, %cst_16 {dimension_numbers = #tpu.dot_dimension_numbers<[2], [2], [1], [1], [0, 0, 0, 1, 1, 1], [0], [0]>} : vector<1x8x8xbf16>, vector<1x8x8xbf16>, vector<1x8x8xf32> -> vector<1x8x8xf32>
    "tpu.trace_stop"() : () -> ()
    %cst_17 = arith.constant 0.353553385 : f32
    %62 = vector.broadcast %cst_17 : f32 to vector<1x8x8xf32>
    %63 = arith.mulf %61, %62 : vector<1x8x8xf32>
    %cst_18 = arith.constant dense<0xFF800000> : vector<1x8xf32>
    %64 = vector.multi_reduction <maximumf>, %63, %cst_18 [2] : vector<1x8x8xf32> to vector<1x8xf32>
    %65 = vector.shape_cast %64 : vector<1x8xf32> to vector<1x8x1xf32>
    %66 = vector.broadcast %65 : vector<1x8x1xf32> to vector<1x8x8xf32>
    %67 = arith.subf %63, %66 : vector<1x8x8xf32>
    %68 = math.exp %67 : vector<1x8x8xf32>
    %cst_19 = arith.constant dense<0.000000e+00> : vector<1x8xf32>
    %69 = vector.multi_reduction <add>, %68, %cst_19 [2] : vector<1x8x8xf32> to vector<1x8xf32>
    %70 = vector.shape_cast %69 : vector<1x8xf32> to vector<1x8x1xf32>
    %71 = tpu.reciprocal %70 {approx = true} : vector<1x8x1xf32> -> vector<1x8x1xf32>
    %72 = vector.broadcast %71 : vector<1x8x1xf32> to vector<1x8x8xf32>
    %73 = arith.mulf %68, %72 : vector<1x8x8xf32>
    %74 = arith.truncf %73 : vector<1x8x8xf32> to vector<1x8x8xbf16>
    %75 = vector.extract_strided_slice %14 {offsets = [0, 0, 16], sizes = [1, 8, 8], strides = [1, 1, 1]} : vector<1x8x32xf32> to vector<1x8x8xf32>
    %76 = arith.truncf %75 : vector<1x8x8xf32> to vector<1x8x8xbf16>
    "tpu.trace_start"() <{level = 10 : i32, message = "bqk,bkd->bqd"}> : () -> ()
    %cst_20 = arith.constant dense<0.000000e+00> : vector<1x8x8xf32>
    %77 = tpu.matmul %74, %76, %cst_20 {dimension_numbers = #tpu.dot_dimension_numbers<[2], [1], [1], [2], [0, 0, 0, 1, 1, 2], [0], [0]>} : vector<1x8x8xbf16>, vector<1x8x8xbf16>, vector<1x8x8xf32> -> vector<1x8x8xf32>
    "tpu.trace_stop"() : () -> ()
    %78 = vector.extract_strided_slice %10 {offsets = [0, 0, 24], sizes = [1, 8, 8], strides = [1, 1, 1]} : vector<1x8x32xf32> to vector<1x8x8xf32>
    %79 = arith.truncf %78 : vector<1x8x8xf32> to vector<1x8x8xbf16>
    %80 = vector.extract_strided_slice %12 {offsets = [0, 0, 24], sizes = [1, 8, 8], strides = [1, 1, 1]} : vector<1x8x32xf32> to vector<1x8x8xf32>
    %81 = arith.truncf %80 : vector<1x8x8xf32> to vector<1x8x8xbf16>
    "tpu.trace_start"() <{level = 10 : i32, message = "bqd,bkd->bqk"}> : () -> ()
    %cst_21 = arith.constant dense<0.000000e+00> : vector<1x8x8xf32>
    %82 = tpu.matmul %79, %81, %cst_21 {dimension_numbers = #tpu.dot_dimension_numbers<[2], [2], [1], [1], [0, 0, 0, 1, 1, 1], [0], [0]>} : vector<1x8x8xbf16>, vector<1x8x8xbf16>, vector<1x8x8xf32> -> vector<1x8x8xf32>
    "tpu.trace_stop"() : () -> ()
    %cst_22 = arith.constant 0.353553385 : f32
    %83 = vector.broadcast %cst_22 : f32 to vector<1x8x8xf32>
    %84 = arith.mulf %82, %83 : vector<1x8x8xf32>
    %cst_23 = arith.constant dense<0xFF800000> : vector<1x8xf32>
    %85 = vector.multi_reduction <maximumf>, %84, %cst_23 [2] : vector<1x8x8xf32> to vector<1x8xf32>
    %86 = vector.shape_cast %85 : vector<1x8xf32> to vector<1x8x1xf32>
    %87 = vector.broadcast %86 : vector<1x8x1xf32> to vector<1x8x8xf32>
    %88 = arith.subf %84, %87 : vector<1x8x8xf32>
    %89 = math.exp %88 : vector<1x8x8xf32>
    %cst_24 = arith.constant dense<0.000000e+00> : vector<1x8xf32>
    %90 = vector.multi_reduction <add>, %89, %cst_24 [2] : vector<1x8x8xf32> to vector<1x8xf32>
    %91 = vector.shape_cast %90 : vector<1x8xf32> to vector<1x8x1xf32>
    %92 = tpu.reciprocal %91 {approx = true} : vector<1x8x1xf32> -> vector<1x8x1xf32>
    %93 = vector.broadcast %92 : vector<1x8x1xf32> to vector<1x8x8xf32>
    %94 = arith.mulf %89, %93 : vector<1x8x8xf32>
    %95 = arith.truncf %94 : vector<1x8x8xf32> to vector<1x8x8xbf16>
    %96 = vector.extract_strided_slice %14 {offsets = [0, 0, 24], sizes = [1, 8, 8], strides = [1, 1, 1]} : vector<1x8x32xf32> to vector<1x8x8xf32>
    %97 = arith.truncf %96 : vector<1x8x8xf32> to vector<1x8x8xbf16>
    "tpu.trace_start"() <{level = 10 : i32, message = "bqk,bkd->bqd"}> : () -> ()
    %cst_25 = arith.constant dense<0.000000e+00> : vector<1x8x8xf32>
    %98 = tpu.matmul %95, %97, %cst_25 {dimension_numbers = #tpu.dot_dimension_numbers<[2], [1], [1], [2], [0, 0, 0, 1, 1, 2], [0], [0]>} : vector<1x8x8xbf16>, vector<1x8x8xbf16>, vector<1x8x8xf32> -> vector<1x8x8xf32>
    "tpu.trace_stop"() : () -> ()
    %99 = tpu.concatenate %35, %56, %77, %98 in 2 : vector<1x8x8xf32>, vector<1x8x8xf32>, vector<1x8x8xf32>, vector<1x8x8xf32> -> vector<1x8x32xf32>
    %100 = vector.shape_cast %99 : vector<1x8x32xf32> to vector<8x32xf32>
    %c0_26 = arith.constant 0 : index
    %c0_27 = arith.constant 0 : index
    %101 = vector.load %arg4[%c0_26, %c0_27] : memref<32x32xf32, #tpu.memory_space<vmem>>, vector<32x32xf32>
    %102 = arith.truncf %100 : vector<8x32xf32> to vector<8x32xbf16>
    %103 = arith.truncf %101 : vector<32x32xf32> to vector<32x32xbf16>
    %cst_28 = arith.constant dense<0.000000e+00> : vector<8x32xf32>
    %104 = tpu.matmul %102, %103, %cst_28 {dimension_numbers = #tpu.dot_dimension_numbers<[1], [0], [0], [1], [0, 0, 1, 1], [], []>} : vector<8x32xbf16>, vector<32x32xbf16>, vector<8x32xf32> -> vector<8x32xf32>
    %c0_29 = arith.constant 0 : index
    %c0_30 = arith.constant 0 : index
    %105 = vector.load %arg5[%c0_29, %c0_30] : memref<1x32xf32, #tpu.memory_space<vmem>>, vector<1x32xf32>
    %106 = vector.broadcast %105 : vector<1x32xf32> to vector<8x32xf32>
    %107 = arith.addf %104, %106 : vector<8x32xf32>
    %108 = arith.addf %1, %107 : vector<8x32xf32>
    %c0_31 = arith.constant 0 : index
    %c0_32 = arith.constant 0 : index
    %109 = vector.load %arg6[%c0_31, %c0_32] : memref<1x32xf32, #tpu.memory_space<vmem>>, vector<1x32xf32>
    %c0_33 = arith.constant 0 : index
    %c0_34 = arith.constant 0 : index
    %110 = vector.load %arg7[%c0_33, %c0_34] : memref<1x32xf32, #tpu.memory_space<vmem>>, vector<1x32xf32>
    %cst_35 = arith.constant dense<0.000000e+00> : vector<8xf32>
    %111 = vector.multi_reduction <add>, %108, %cst_35 [1] : vector<8x32xf32> to vector<8xf32>
    %112 = vector.shape_cast %111 : vector<8xf32> to vector<8x1xf32>
    %cst_36 = arith.constant 3.200000e+01 : f32
    %113 = vector.broadcast %cst_36 : f32 to vector<8x1xf32>
    %114 = arith.divf %112, %113 : vector<8x1xf32>
    %115 = vector.broadcast %114 : vector<8x1xf32> to vector<8x32xf32>
    %116 = arith.subf %108, %115 : vector<8x32xf32>
    %117 = arith.mulf %116, %116 : vector<8x32xf32>
    %cst_37 = arith.constant dense<0.000000e+00> : vector<8xf32>
    %118 = vector.multi_reduction <add>, %117, %cst_37 [1] : vector<8x32xf32> to vector<8xf32>
    %119 = vector.shape_cast %118 : vector<8xf32> to vector<8x1xf32>
    %cst_38 = arith.constant 3.200000e+01 : f32
    %120 = vector.broadcast %cst_38 : f32 to vector<8x1xf32>
    %121 = arith.divf %119, %120 : vector<8x1xf32>
    %122 = vector.broadcast %114 : vector<8x1xf32> to vector<8x32xf32>
    %123 = arith.subf %108, %122 : vector<8x32xf32>
    %cst_39 = arith.constant 9.99999974E-6 : f32
    %124 = vector.broadcast %cst_39 : f32 to vector<8x1xf32>
    %125 = arith.addf %121, %124 : vector<8x1xf32>
    %126 = math.rsqrt %125 : vector<8x1xf32>
    %127 = vector.broadcast %126 : vector<8x1xf32> to vector<8x32xf32>
    %128 = arith.mulf %123, %127 : vector<8x32xf32>
    %129 = vector.broadcast %109 : vector<1x32xf32> to vector<8x32xf32>
    %130 = arith.mulf %128, %129 : vector<8x32xf32>
    %131 = vector.broadcast %110 : vector<1x32xf32> to vector<8x32xf32>
    %132 = arith.addf %130, %131 : vector<8x32xf32>
    %c0_40 = arith.constant 0 : index
    %c0_41 = arith.constant 0 : index
    %133 = vector.load %arg8[%c0_40, %c0_41] : memref<32x128xf32, #tpu.memory_space<vmem>>, vector<32x128xf32>
    %134 = arith.truncf %132 : vector<8x32xf32> to vector<8x32xbf16>
    %135 = arith.truncf %133 : vector<32x128xf32> to vector<32x128xbf16>
    %cst_42 = arith.constant dense<0.000000e+00> : vector<8x128xf32>
    %136 = tpu.matmul %134, %135, %cst_42 {dimension_numbers = #tpu.dot_dimension_numbers<[1], [0], [0], [1], [0, 0, 1, 1], [], []>} : vector<8x32xbf16>, vector<32x128xbf16>, vector<8x128xf32> -> vector<8x128xf32>
    %c0_43 = arith.constant 0 : index
    %c0_44 = arith.constant 0 : index
    %137 = vector.load %arg9[%c0_43, %c0_44] : memref<1x128xf32, #tpu.memory_space<vmem>>, vector<1x128xf32>
    %138 = vector.broadcast %137 : vector<1x128xf32> to vector<8x128xf32>
    %139 = arith.addf %136, %138 : vector<8x128xf32>
    %cst_45 = arith.constant 0.000000e+00 : f32
    %140 = vector.broadcast %cst_45 : f32 to vector<8x128xf32>
    %141 = arith.maximumf %139, %140 : vector<8x128xf32>
    %c0_46 = arith.constant 0 : index
    %c0_47 = arith.constant 0 : index
    %142 = vector.load %arg10[%c0_46, %c0_47] : memref<128x32xf32, #tpu.memory_space<vmem>>, vector<128x32xf32>
    %143 = arith.truncf %141 : vector<8x128xf32> to vector<8x128xbf16>
    %144 = arith.truncf %142 : vector<128x32xf32> to vector<128x32xbf16>
    %cst_48 = arith.constant dense<0.000000e+00> : vector<8x32xf32>
    %145 = tpu.matmul %143, %144, %cst_48 {dimension_numbers = #tpu.dot_dimension_numbers<[1], [0], [0], [1], [0, 0, 1, 1], [], []>} : vector<8x128xbf16>, vector<128x32xbf16>, vector<8x32xf32> -> vector<8x32xf32>
    %c0_49 = arith.constant 0 : index
    %c0_50 = arith.constant 0 : index
    %146 = vector.load %arg11[%c0_49, %c0_50] : memref<1x32xf32, #tpu.memory_space<vmem>>, vector<1x32xf32>
    %147 = vector.broadcast %146 : vector<1x32xf32> to vector<8x32xf32>
    %148 = arith.addf %145, %147 : vector<8x32xf32>
    %149 = arith.addf %132, %148 : vector<8x32xf32>
    %c0_51 = arith.constant 0 : index
    %c0_52 = arith.constant 0 : index
    %150 = vector.load %arg12[%c0_51, %c0_52] : memref<1x32xf32, #tpu.memory_space<vmem>>, vector<1x32xf32>
    %c0_53 = arith.constant 0 : index
    %c0_54 = arith.constant 0 : index
    %151 = vector.load %arg13[%c0_53, %c0_54] : memref<1x32xf32, #tpu.memory_space<vmem>>, vector<1x32xf32>
    %cst_55 = arith.constant dense<0.000000e+00> : vector<8xf32>
    %152 = vector.multi_reduction <add>, %149, %cst_55 [1] : vector<8x32xf32> to vector<8xf32>
    %153 = vector.shape_cast %152 : vector<8xf32> to vector<8x1xf32>
    %cst_56 = arith.constant 3.200000e+01 : f32
    %154 = vector.broadcast %cst_56 : f32 to vector<8x1xf32>
    %155 = arith.divf %153, %154 : vector<8x1xf32>
    %156 = vector.broadcast %155 : vector<8x1xf32> to vector<8x32xf32>
    %157 = arith.subf %149, %156 : vector<8x32xf32>
    %158 = arith.mulf %157, %157 : vector<8x32xf32>
    %cst_57 = arith.constant dense<0.000000e+00> : vector<8xf32>
    %159 = vector.multi_reduction <add>, %158, %cst_57 [1] : vector<8x32xf32> to vector<8xf32>
    %160 = vector.shape_cast %159 : vector<8xf32> to vector<8x1xf32>
    %cst_58 = arith.constant 3.200000e+01 : f32
    %161 = vector.broadcast %cst_58 : f32 to vector<8x1xf32>
    %162 = arith.divf %160, %161 : vector<8x1xf32>
    %163 = vector.broadcast %155 : vector<8x1xf32> to vector<8x32xf32>
    %164 = arith.subf %149, %163 : vector<8x32xf32>
    %cst_59 = arith.constant 9.99999974E-6 : f32
    %165 = vector.broadcast %cst_59 : f32 to vector<8x1xf32>
    %166 = arith.addf %162, %165 : vector<8x1xf32>
    %167 = math.rsqrt %166 : vector<8x1xf32>
    %168 = vector.broadcast %167 : vector<8x1xf32> to vector<8x32xf32>
    %169 = arith.mulf %164, %168 : vector<8x32xf32>
    %170 = vector.broadcast %150 : vector<1x32xf32> to vector<8x32xf32>
    %171 = arith.mulf %169, %170 : vector<8x32xf32>
    %172 = vector.broadcast %151 : vector<1x32xf32> to vector<8x32xf32>
    %173 = arith.addf %171, %172 : vector<8x32xf32>
    %174 = vector.shape_cast %173 : vector<8x32xf32> to vector<1x8x32xf32>
    %c0_60 = arith.constant 0 : index
    %c0_61 = arith.constant 0 : index
    %c0_62 = arith.constant 0 : index
    %175 = vector.load %arg14[%c0_60, %c0_61, %c0_62] : memref<1x8x32xf32, #tpu.memory_space<vmem>>, vector<1x8x32xf32>
    tpu.vector_store %arg14[%c0_60, %c0_61, %c0_62], %174 {strides = array<i32>} : memref<1x8x32xf32, #tpu.memory_space<vmem>>, vector<1x8x32xf32>,
    return
  }
  func.func @transform_0(%arg0: i32) -> (i32, i32, i32) {
    %c0_i32 = arith.constant 0 : i32
    %c0_i32_0 = arith.constant 0 : i32
    %c0_i32_1 = arith.constant 0 : i32
    return %arg0, %c0_i32, %c0_i32_0 : i32, i32, i32
  }
  func.func @transform_1(%arg0: i32) -> (i32, i32) {
    %c0_i32 = arith.constant 0 : i32
    %c0_i32_0 = arith.constant 0 : i32
    %c0_i32_1 = arith.constant 0 : i32
    return %c0_i32, %c0_i32_0 : i32, i32
  }
  func.func @transform_2(%arg0: i32) -> (i32, i32) {
    %c0_i32 = arith.constant 0 : i32
    %c0_i32_0 = arith.constant 0 : i32
    %c0_i32_1 = arith.constant 0 : i32
    return %c0_i32, %c0_i32_0 : i32, i32
  }
  func.func @transform_3(%arg0: i32) -> (i32, i32) {
    %c0_i32 = arith.constant 0 : i32
    %c0_i32_0 = arith.constant 0 : i32
    %c0_i32_1 = arith.constant 0 : i32
    return %c0_i32, %c0_i32_0 : i32, i32
  }
  func.func @transform_4(%arg0: i32) -> (i32, i32) {
    %c0_i32 = arith.constant 0 : i32
    %c0_i32_0 = arith.constant 0 : i32
    %c0_i32_1 = arith.constant 0 : i32
    return %c0_i32, %c0_i32_0 : i32, i32
  }
  func.func @transform_5(%arg0: i32) -> (i32, i32) {
    %c0_i32 = arith.constant 0 : i32
    %c0_i32_0 = arith.constant 0 : i32
    %c0_i32_1 = arith.constant 0 : i32
    return %c0_i32, %c0_i32_0 : i32, i32
  }
  func.func @transform_6(%arg0: i32) -> (i32, i32) {
    %c0_i32 = arith.constant 0 : i32
    %c0_i32_0 = arith.constant 0 : i32
    %c0_i32_1 = arith.constant 0 : i32
    return %c0_i32, %c0_i32_0 : i32, i32
  }
  func.func @transform_7(%arg0: i32) -> (i32, i32) {
    %c0_i32 = arith.constant 0 : i32
    %c0_i32_0 = arith.constant 0 : i32
    %c0_i32_1 = arith.constant 0 : i32
    return %c0_i32, %c0_i32_0 : i32, i32
  }
  func.func @transform_8(%arg0: i32) -> (i32, i32) {
    %c0_i32 = arith.constant 0 : i32
    %c0_i32_0 = arith.constant 0 : i32
    %c0_i32_1 = arith.constant 0 : i32
    return %c0_i32, %c0_i32_0 : i32, i32
  }
  func.func @transform_9(%arg0: i32) -> (i32, i32) {
    %c0_i32 = arith.constant 0 : i32
    %c0_i32_0 = arith.constant 0 : i32
    %c0_i32_1 = arith.constant 0 : i32
    return %c0_i32, %c0_i32_0 : i32, i32
  }
  func.func @transform_10(%arg0: i32) -> (i32, i32) {
    %c0_i32 = arith.constant 0 : i32
    %c0_i32_0 = arith.constant 0 : i32
    %c0_i32_1 = arith.constant 0 : i32
    return %c0_i32, %c0_i32_0 : i32, i32
  }
  func.func @transform_11(%arg0: i32) -> (i32, i32) {
    %c0_i32 = arith.constant 0 : i32
    %c0_i32_0 = arith.constant 0 : i32
    %c0_i32_1 = arith.constant 0 : i32
    return %c0_i32, %c0_i32_0 : i32, i32
  }
  func.func @transform_12(%arg0: i32) -> (i32, i32) {
    %c0_i32 = arith.constant 0 : i32
    %c0_i32_0 = arith.constant 0 : i32
    %c0_i32_1 = arith.constant 0 : i32
    return %c0_i32, %c0_i32_0 : i32, i32
  }
  func.func @transform_13(%arg0: i32) -> (i32, i32, i32) {
    %c0_i32 = arith.constant 0 : i32
    %c0_i32_0 = arith.constant 0 : i32
    %c0_i32_1 = arith.constant 0 : i32
    return %arg0, %c0_i32, %c0_i32_0 : i32, i32, i32
  }
}

module attributes {stable_mosaic.version = 11 : i64} {
  func.func @_decoder_layer_kernel(%arg0: i32, %arg1: memref<1x8x32xf32, #tpu.memory_space<vmem>>, %arg2: memref<1x8x32xf32, #tpu.memory_space<vmem>>, %arg3: memref<8x8xf32, #tpu.memory_space<vmem>>, %arg4: memref<32x96xf32, #tpu.memory_space<vmem>>, %arg5: memref<1x96xf32, #tpu.memory_space<vmem>>, %arg6: memref<32x32xf32, #tpu.memory_space<vmem>>, %arg7: memref<1x32xf32, #tpu.memory_space<vmem>>, %arg8: memref<1x32xf32, #tpu.memory_space<vmem>>, %arg9: memref<1x32xf32, #tpu.memory_space<vmem>>, %arg10: memref<32x32xf32, #tpu.memory_space<vmem>>, %arg11: memref<1x32xf32, #tpu.memory_space<vmem>>, %arg12: memref<32x64xf32, #tpu.memory_space<vmem>>, %arg13: memref<1x64xf32, #tpu.memory_space<vmem>>, %arg14: memref<32x32xf32, #tpu.memory_space<vmem>>, %arg15: memref<1x32xf32, #tpu.memory_space<vmem>>, %arg16: memref<1x32xf32, #tpu.memory_space<vmem>>, %arg17: memref<1x32xf32, #tpu.memory_space<vmem>>, %arg18: memref<32x128xf32, #tpu.memory_space<vmem>>, %arg19: memref<1x128xf32, #tpu.memory_space<vmem>>, %arg20: memref<128x32xf32, #tpu.memory_space<vmem>>, %arg21: memref<1x32xf32, #tpu.memory_space<vmem>>, %arg22: memref<1x32xf32, #tpu.memory_space<vmem>>, %arg23: memref<1x32xf32, #tpu.memory_space<vmem>>, %arg24: memref<1x8x32xf32, #tpu.memory_space<vmem>>) attributes {dimension_semantics = [#tpu.dimension_semantics<parallel>], iteration_bounds = array<i64: 2>, scalar_prefetch = 0 : i64, scratch_operands = 0 : i64, tpu.core_type = #tpu.core_type<tc>, window_params = [{transform_indices = @transform_0, window_bounds = array<i64: 1, 8, 32>}, {transform_indices = @transform_1, window_bounds = array<i64: 1, 8, 32>}, {pipeline_mode = #tpu.pipeline_mode<synchronous>, transform_indices = @transform_2, window_bounds = array<i64: 8, 8>}, {pipeline_mode = #tpu.pipeline_mode<synchronous>, transform_indices = @transform_3, window_bounds = array<i64: 32, 96>}, {pipeline_mode = #tpu.pipeline_mode<synchronous>, transform_indices = @transform_4, window_bounds = array<i64: 1, 96>}, {pipeline_mode = #tpu.pipeline_mode<synchronous>, transform_indices = @transform_5, window_bounds = array<i64: 32, 32>}, {pipeline_mode = #tpu.pipeline_mode<synchronous>, transform_indices = @transform_6, window_bounds = array<i64: 1, 32>}, {pipeline_mode = #tpu.pipeline_mode<synchronous>, transform_indices = @transform_7, window_bounds = array<i64: 1, 32>}, {pipeline_mode = #tpu.pipeline_mode<synchronous>, transform_indices = @transform_8, window_bounds = array<i64: 1, 32>}, {pipeline_mode = #tpu.pipeline_mode<synchronous>, transform_indices = @transform_9, window_bounds = array<i64: 32, 32>}, {pipeline_mode = #tpu.pipeline_mode<synchronous>, transform_indices = @transform_10, window_bounds = array<i64: 1, 32>}, {pipeline_mode = #tpu.pipeline_mode<synchronous>, transform_indices = @transform_11, window_bounds = array<i64: 32, 64>}, {pipeline_mode = #tpu.pipeline_mode<synchronous>, transform_indices = @transform_12, window_bounds = array<i64: 1, 64>}, {pipeline_mode = #tpu.pipeline_mode<synchronous>, transform_indices = @transform_13, window_bounds = array<i64: 32, 32>}, {pipeline_mode = #tpu.pipeline_mode<synchronous>, transform_indices = @transform_14, window_bounds = array<i64: 1, 32>}, {pipeline_mode = #tpu.pipeline_mode<synchronous>, transform_indices = @transform_15, window_bounds = array<i64: 1, 32>}, {pipeline_mode = #tpu.pipeline_mode<synchronous>, transform_indices = @transform_16, window_bounds = array<i64: 1, 32>}, {pipeline_mode = #tpu.pipeline_mode<synchronous>, transform_indices = @transform_17, window_bounds = array<i64: 32, 128>}, {pipeline_mode = #tpu.pipeline_mode<synchronous>, transform_indices = @transform_18, window_bounds = array<i64: 1, 128>}, {pipeline_mode = #tpu.pipeline_mode<synchronous>, transform_indices = @transform_19, window_bounds = array<i64: 128, 32>}, {pipeline_mode = #tpu.pipeline_mode<synchronous>, transform_indices = @transform_20, window_bounds = array<i64: 1, 32>}, {pipeline_mode = #tpu.pipeline_mode<synchronous>, transform_indices = @transform_21, window_bounds = array<i64: 1, 32>}, {pipeline_mode = #tpu.pipeline_mode<synchronous>, transform_indices = @transform_22, window_bounds = array<i64: 1, 32>}, {transform_indices = @transform_23, window_bounds = array<i64: 1, 8, 32>}]} {
    %c0 = arith.constant 0 : index
    %c0_0 = arith.constant 0 : index
    %c0_1 = arith.constant 0 : index
    %0 = vector.load %arg1[%c0, %c0_0, %c0_1] : memref<1x8x32xf32, #tpu.memory_space<vmem>>, vector<1x8x32xf32>
    %1 = vector.shape_cast %0 : vector<1x8x32xf32> to vector<8x32xf32>
    %c0_2 = arith.constant 0 : index
    %c0_3 = arith.constant 0 : index
    %2 = vector.load %arg4[%c0_2, %c0_3] : memref<32x96xf32, #tpu.memory_space<vmem>>, vector<32x96xf32>
    %3 = arith.truncf %1 : vector<8x32xf32> to vector<8x32xbf16>
    %4 = arith.truncf %2 : vector<32x96xf32> to vector<32x96xbf16>
    %cst = arith.constant dense<0.000000e+00> : vector<8x96xf32>
    %5 = tpu.matmul %3, %4, %cst {dimension_numbers = #tpu.dot_dimension_numbers<[1], [0], [0], [1], [0, 0, 1, 1], [], []>} : vector<8x32xbf16>, vector<32x96xbf16>, vector<8x96xf32> -> vector<8x96xf32>
    %c0_4 = arith.constant 0 : index
    %c0_5 = arith.constant 0 : index
    %6 = vector.load %arg5[%c0_4, %c0_5] : memref<1x96xf32, #tpu.memory_space<vmem>>, vector<1x96xf32>
    %7 = vector.broadcast %6 : vector<1x96xf32> to vector<8x96xf32>
    %8 = arith.addf %5, %7 : vector<8x96xf32>
    %9 = vector.extract_strided_slice %8 {offsets = [0, 0], sizes = [8, 32], strides = [1, 1]} : vector<8x96xf32> to vector<8x32xf32>
    %10 = vector.shape_cast %9 : vector<8x32xf32> to vector<1x8x32xf32>
    %11 = vector.extract_strided_slice %8 {offsets = [0, 32], sizes = [8, 32], strides = [1, 1]} : vector<8x96xf32> to vector<8x32xf32>
    %12 = vector.shape_cast %11 : vector<8x32xf32> to vector<1x8x32xf32>
    %13 = vector.extract_strided_slice %8 {offsets = [0, 64], sizes = [8, 32], strides = [1, 1]} : vector<8x96xf32> to vector<8x32xf32>
    %14 = vector.shape_cast %13 : vector<8x32xf32> to vector<1x8x32xf32>
    %c0_6 = arith.constant 0 : index
    %c0_7 = arith.constant 0 : index
    %15 = vector.load %arg3[%c0_6, %c0_7] : memref<8x8xf32, #tpu.memory_space<vmem>>, vector<8x8xf32>
    %16 = vector.extract_strided_slice %10 {offsets = [0, 0, 0], sizes = [1, 8, 8], strides = [1, 1, 1]} : vector<1x8x32xf32> to vector<1x8x8xf32>
    %17 = arith.truncf %16 : vector<1x8x8xf32> to vector<1x8x8xbf16>
    %18 = vector.extract_strided_slice %12 {offsets = [0, 0, 0], sizes = [1, 8, 8], strides = [1, 1, 1]} : vector<1x8x32xf32> to vector<1x8x8xf32>
    %19 = arith.truncf %18 : vector<1x8x8xf32> to vector<1x8x8xbf16>
    "tpu.trace_start"() <{level = 10 : i32, message = "bqd,bkd->bqk"}> : () -> ()
    %cst_8 = arith.constant dense<0.000000e+00> : vector<1x8x8xf32>
    %20 = tpu.matmul %17, %19, %cst_8 {dimension_numbers = #tpu.dot_dimension_numbers<[2], [2], [1], [1], [0, 0, 0, 1, 1, 1], [0], [0]>} : vector<1x8x8xbf16>, vector<1x8x8xbf16>, vector<1x8x8xf32> -> vector<1x8x8xf32>
    "tpu.trace_stop"() : () -> ()
    %cst_9 = arith.constant 0.353553385 : f32
    %21 = vector.broadcast %cst_9 : f32 to vector<1x8x8xf32>
    %22 = arith.mulf %20, %21 : vector<1x8x8xf32>
    %23 = vector.shape_cast %15 : vector<8x8xf32> to vector<1x8x8xf32>
    %24 = arith.addf %22, %23 : vector<1x8x8xf32>
    %cst_10 = arith.constant dense<0xFF800000> : vector<1x8xf32>
    %25 = vector.multi_reduction <maximumf>, %24, %cst_10 [2] : vector<1x8x8xf32> to vector<1x8xf32>
    %26 = vector.shape_cast %25 : vector<1x8xf32> to vector<1x8x1xf32>
    %27 = vector.broadcast %26 : vector<1x8x1xf32> to vector<1x8x8xf32>
    %28 = arith.subf %24, %27 : vector<1x8x8xf32>
    %29 = math.exp %28 : vector<1x8x8xf32>
    %cst_11 = arith.constant dense<0.000000e+00> : vector<1x8xf32>
    %30 = vector.multi_reduction <add>, %29, %cst_11 [2] : vector<1x8x8xf32> to vector<1x8xf32>
    %31 = vector.shape_cast %30 : vector<1x8xf32> to vector<1x8x1xf32>
    %32 = tpu.reciprocal %31 {approx = true} : vector<1x8x1xf32> -> vector<1x8x1xf32>
    %33 = vector.broadcast %32 : vector<1x8x1xf32> to vector<1x8x8xf32>
    %34 = arith.mulf %29, %33 : vector<1x8x8xf32>
    %35 = arith.truncf %34 : vector<1x8x8xf32> to vector<1x8x8xbf16>
    %36 = vector.extract_strided_slice %14 {offsets = [0, 0, 0], sizes = [1, 8, 8], strides = [1, 1, 1]} : vector<1x8x32xf32> to vector<1x8x8xf32>
    %37 = arith.truncf %36 : vector<1x8x8xf32> to vector<1x8x8xbf16>
    "tpu.trace_start"() <{level = 10 : i32, message = "bqk,bkd->bqd"}> : () -> ()
    %cst_12 = arith.constant dense<0.000000e+00> : vector<1x8x8xf32>
    %38 = tpu.matmul %35, %37, %cst_12 {dimension_numbers = #tpu.dot_dimension_numbers<[2], [1], [1], [2], [0, 0, 0, 1, 1, 2], [0], [0]>} : vector<1x8x8xbf16>, vector<1x8x8xbf16>, vector<1x8x8xf32> -> vector<1x8x8xf32>
    "tpu.trace_stop"() : () -> ()
    %39 = vector.extract_strided_slice %10 {offsets = [0, 0, 8], sizes = [1, 8, 8], strides = [1, 1, 1]} : vector<1x8x32xf32> to vector<1x8x8xf32>
    %40 = arith.truncf %39 : vector<1x8x8xf32> to vector<1x8x8xbf16>
    %41 = vector.extract_strided_slice %12 {offsets = [0, 0, 8], sizes = [1, 8, 8], strides = [1, 1, 1]} : vector<1x8x32xf32> to vector<1x8x8xf32>
    %42 = arith.truncf %41 : vector<1x8x8xf32> to vector<1x8x8xbf16>
    "tpu.trace_start"() <{level = 10 : i32, message = "bqd,bkd->bqk"}> : () -> ()
    %cst_13 = arith.constant dense<0.000000e+00> : vector<1x8x8xf32>
    %43 = tpu.matmul %40, %42, %cst_13 {dimension_numbers = #tpu.dot_dimension_numbers<[2], [2], [1], [1], [0, 0, 0, 1, 1, 1], [0], [0]>} : vector<1x8x8xbf16>, vector<1x8x8xbf16>, vector<1x8x8xf32> -> vector<1x8x8xf32>
    "tpu.trace_stop"() : () -> ()
    %cst_14 = arith.constant 0.353553385 : f32
    %44 = vector.broadcast %cst_14 : f32 to vector<1x8x8xf32>
    %45 = arith.mulf %43, %44 : vector<1x8x8xf32>
    %46 = vector.shape_cast %15 : vector<8x8xf32> to vector<1x8x8xf32>
    %47 = arith.addf %45, %46 : vector<1x8x8xf32>
    %cst_15 = arith.constant dense<0xFF800000> : vector<1x8xf32>
    %48 = vector.multi_reduction <maximumf>, %47, %cst_15 [2] : vector<1x8x8xf32> to vector<1x8xf32>
    %49 = vector.shape_cast %48 : vector<1x8xf32> to vector<1x8x1xf32>
    %50 = vector.broadcast %49 : vector<1x8x1xf32> to vector<1x8x8xf32>
    %51 = arith.subf %47, %50 : vector<1x8x8xf32>
    %52 = math.exp %51 : vector<1x8x8xf32>
    %cst_16 = arith.constant dense<0.000000e+00> : vector<1x8xf32>
    %53 = vector.multi_reduction <add>, %52, %cst_16 [2] : vector<1x8x8xf32> to vector<1x8xf32>
    %54 = vector.shape_cast %53 : vector<1x8xf32> to vector<1x8x1xf32>
    %55 = tpu.reciprocal %54 {approx = true} : vector<1x8x1xf32> -> vector<1x8x1xf32>
    %56 = vector.broadcast %55 : vector<1x8x1xf32> to vector<1x8x8xf32>
    %57 = arith.mulf %52, %56 : vector<1x8x8xf32>
    %58 = arith.truncf %57 : vector<1x8x8xf32> to vector<1x8x8xbf16>
    %59 = vector.extract_strided_slice %14 {offsets = [0, 0, 8], sizes = [1, 8, 8], strides = [1, 1, 1]} : vector<1x8x32xf32> to vector<1x8x8xf32>
    %60 = arith.truncf %59 : vector<1x8x8xf32> to vector<1x8x8xbf16>
    "tpu.trace_start"() <{level = 10 : i32, message = "bqk,bkd->bqd"}> : () -> ()
    %cst_17 = arith.constant dense<0.000000e+00> : vector<1x8x8xf32>
    %61 = tpu.matmul %58, %60, %cst_17 {dimension_numbers = #tpu.dot_dimension_numbers<[2], [1], [1], [2], [0, 0, 0, 1, 1, 2], [0], [0]>} : vector<1x8x8xbf16>, vector<1x8x8xbf16>, vector<1x8x8xf32> -> vector<1x8x8xf32>
    "tpu.trace_stop"() : () -> ()
    %62 = vector.extract_strided_slice %10 {offsets = [0, 0, 16], sizes = [1, 8, 8], strides = [1, 1, 1]} : vector<1x8x32xf32> to vector<1x8x8xf32>
    %63 = arith.truncf %62 : vector<1x8x8xf32> to vector<1x8x8xbf16>
    %64 = vector.extract_strided_slice %12 {offsets = [0, 0, 16], sizes = [1, 8, 8], strides = [1, 1, 1]} : vector<1x8x32xf32> to vector<1x8x8xf32>
    %65 = arith.truncf %64 : vector<1x8x8xf32> to vector<1x8x8xbf16>
    "tpu.trace_start"() <{level = 10 : i32, message = "bqd,bkd->bqk"}> : () -> ()
    %cst_18 = arith.constant dense<0.000000e+00> : vector<1x8x8xf32>
    %66 = tpu.matmul %63, %65, %cst_18 {dimension_numbers = #tpu.dot_dimension_numbers<[2], [2], [1], [1], [0, 0, 0, 1, 1, 1], [0], [0]>} : vector<1x8x8xbf16>, vector<1x8x8xbf16>, vector<1x8x8xf32> -> vector<1x8x8xf32>
    "tpu.trace_stop"() : () -> ()
    %cst_19 = arith.constant 0.353553385 : f32
    %67 = vector.broadcast %cst_19 : f32 to vector<1x8x8xf32>
    %68 = arith.mulf %66, %67 : vector<1x8x8xf32>
    %69 = vector.shape_cast %15 : vector<8x8xf32> to vector<1x8x8xf32>
    %70 = arith.addf %68, %69 : vector<1x8x8xf32>
    %cst_20 = arith.constant dense<0xFF800000> : vector<1x8xf32>
    %71 = vector.multi_reduction <maximumf>, %70, %cst_20 [2] : vector<1x8x8xf32> to vector<1x8xf32>
    %72 = vector.shape_cast %71 : vector<1x8xf32> to vector<1x8x1xf32>
    %73 = vector.broadcast %72 : vector<1x8x1xf32> to vector<1x8x8xf32>
    %74 = arith.subf %70, %73 : vector<1x8x8xf32>
    %75 = math.exp %74 : vector<1x8x8xf32>
    %cst_21 = arith.constant dense<0.000000e+00> : vector<1x8xf32>
    %76 = vector.multi_reduction <add>, %75, %cst_21 [2] : vector<1x8x8xf32> to vector<1x8xf32>
    %77 = vector.shape_cast %76 : vector<1x8xf32> to vector<1x8x1xf32>
    %78 = tpu.reciprocal %77 {approx = true} : vector<1x8x1xf32> -> vector<1x8x1xf32>
    %79 = vector.broadcast %78 : vector<1x8x1xf32> to vector<1x8x8xf32>
    %80 = arith.mulf %75, %79 : vector<1x8x8xf32>
    %81 = arith.truncf %80 : vector<1x8x8xf32> to vector<1x8x8xbf16>
    %82 = vector.extract_strided_slice %14 {offsets = [0, 0, 16], sizes = [1, 8, 8], strides = [1, 1, 1]} : vector<1x8x32xf32> to vector<1x8x8xf32>
    %83 = arith.truncf %82 : vector<1x8x8xf32> to vector<1x8x8xbf16>
    "tpu.trace_start"() <{level = 10 : i32, message = "bqk,bkd->bqd"}> : () -> ()
    %cst_22 = arith.constant dense<0.000000e+00> : vector<1x8x8xf32>
    %84 = tpu.matmul %81, %83, %cst_22 {dimension_numbers = #tpu.dot_dimension_numbers<[2], [1], [1], [2], [0, 0, 0, 1, 1, 2], [0], [0]>} : vector<1x8x8xbf16>, vector<1x8x8xbf16>, vector<1x8x8xf32> -> vector<1x8x8xf32>
    "tpu.trace_stop"() : () -> ()
    %85 = vector.extract_strided_slice %10 {offsets = [0, 0, 24], sizes = [1, 8, 8], strides = [1, 1, 1]} : vector<1x8x32xf32> to vector<1x8x8xf32>
    %86 = arith.truncf %85 : vector<1x8x8xf32> to vector<1x8x8xbf16>
    %87 = vector.extract_strided_slice %12 {offsets = [0, 0, 24], sizes = [1, 8, 8], strides = [1, 1, 1]} : vector<1x8x32xf32> to vector<1x8x8xf32>
    %88 = arith.truncf %87 : vector<1x8x8xf32> to vector<1x8x8xbf16>
    "tpu.trace_start"() <{level = 10 : i32, message = "bqd,bkd->bqk"}> : () -> ()
    %cst_23 = arith.constant dense<0.000000e+00> : vector<1x8x8xf32>
    %89 = tpu.matmul %86, %88, %cst_23 {dimension_numbers = #tpu.dot_dimension_numbers<[2], [2], [1], [1], [0, 0, 0, 1, 1, 1], [0], [0]>} : vector<1x8x8xbf16>, vector<1x8x8xbf16>, vector<1x8x8xf32> -> vector<1x8x8xf32>
    "tpu.trace_stop"() : () -> ()
    %cst_24 = arith.constant 0.353553385 : f32
    %90 = vector.broadcast %cst_24 : f32 to vector<1x8x8xf32>
    %91 = arith.mulf %89, %90 : vector<1x8x8xf32>
    %92 = vector.shape_cast %15 : vector<8x8xf32> to vector<1x8x8xf32>
    %93 = arith.addf %91, %92 : vector<1x8x8xf32>
    %cst_25 = arith.constant dense<0xFF800000> : vector<1x8xf32>
    %94 = vector.multi_reduction <maximumf>, %93, %cst_25 [2] : vector<1x8x8xf32> to vector<1x8xf32>
    %95 = vector.shape_cast %94 : vector<1x8xf32> to vector<1x8x1xf32>
    %96 = vector.broadcast %95 : vector<1x8x1xf32> to vector<1x8x8xf32>
    %97 = arith.subf %93, %96 : vector<1x8x8xf32>
    %98 = math.exp %97 : vector<1x8x8xf32>
    %cst_26 = arith.constant dense<0.000000e+00> : vector<1x8xf32>
    %99 = vector.multi_reduction <add>, %98, %cst_26 [2] : vector<1x8x8xf32> to vector<1x8xf32>
    %100 = vector.shape_cast %99 : vector<1x8xf32> to vector<1x8x1xf32>
    %101 = tpu.reciprocal %100 {approx = true} : vector<1x8x1xf32> -> vector<1x8x1xf32>
    %102 = vector.broadcast %101 : vector<1x8x1xf32> to vector<1x8x8xf32>
    %103 = arith.mulf %98, %102 : vector<1x8x8xf32>
    %104 = arith.truncf %103 : vector<1x8x8xf32> to vector<1x8x8xbf16>
    %105 = vector.extract_strided_slice %14 {offsets = [0, 0, 24], sizes = [1, 8, 8], strides = [1, 1, 1]} : vector<1x8x32xf32> to vector<1x8x8xf32>
    %106 = arith.truncf %105 : vector<1x8x8xf32> to vector<1x8x8xbf16>
    "tpu.trace_start"() <{level = 10 : i32, message = "bqk,bkd->bqd"}> : () -> ()
    %cst_27 = arith.constant dense<0.000000e+00> : vector<1x8x8xf32>
    %107 = tpu.matmul %104, %106, %cst_27 {dimension_numbers = #tpu.dot_dimension_numbers<[2], [1], [1], [2], [0, 0, 0, 1, 1, 2], [0], [0]>} : vector<1x8x8xbf16>, vector<1x8x8xbf16>, vector<1x8x8xf32> -> vector<1x8x8xf32>
    "tpu.trace_stop"() : () -> ()
    %108 = tpu.concatenate %38, %61, %84, %107 in 2 : vector<1x8x8xf32>, vector<1x8x8xf32>, vector<1x8x8xf32>, vector<1x8x8xf32> -> vector<1x8x32xf32>
    %109 = vector.shape_cast %108 : vector<1x8x32xf32> to vector<8x32xf32>
    %c0_28 = arith.constant 0 : index
    %c0_29 = arith.constant 0 : index
    %110 = vector.load %arg6[%c0_28, %c0_29] : memref<32x32xf32, #tpu.memory_space<vmem>>, vector<32x32xf32>
    %111 = arith.truncf %109 : vector<8x32xf32> to vector<8x32xbf16>
    %112 = arith.truncf %110 : vector<32x32xf32> to vector<32x32xbf16>
    %cst_30 = arith.constant dense<0.000000e+00> : vector<8x32xf32>
    %113 = tpu.matmul %111, %112, %cst_30 {dimension_numbers = #tpu.dot_dimension_numbers<[1], [0], [0], [1], [0, 0, 1, 1], [], []>} : vector<8x32xbf16>, vector<32x32xbf16>, vector<8x32xf32> -> vector<8x32xf32>
    %c0_31 = arith.constant 0 : index
    %c0_32 = arith.constant 0 : index
    %114 = vector.load %arg7[%c0_31, %c0_32] : memref<1x32xf32, #tpu.memory_space<vmem>>, vector<1x32xf32>
    %115 = vector.broadcast %114 : vector<1x32xf32> to vector<8x32xf32>
    %116 = arith.addf %113, %115 : vector<8x32xf32>
    %117 = arith.addf %1, %116 : vector<8x32xf32>
    %c0_33 = arith.constant 0 : index
    %c0_34 = arith.constant 0 : index
    %118 = vector.load %arg8[%c0_33, %c0_34] : memref<1x32xf32, #tpu.memory_space<vmem>>, vector<1x32xf32>
    %c0_35 = arith.constant 0 : index
    %c0_36 = arith.constant 0 : index
    %119 = vector.load %arg9[%c0_35, %c0_36] : memref<1x32xf32, #tpu.memory_space<vmem>>, vector<1x32xf32>
    %cst_37 = arith.constant dense<0.000000e+00> : vector<8xf32>
    %120 = vector.multi_reduction <add>, %117, %cst_37 [1] : vector<8x32xf32> to vector<8xf32>
    %121 = vector.shape_cast %120 : vector<8xf32> to vector<8x1xf32>
    %cst_38 = arith.constant 3.200000e+01 : f32
    %122 = vector.broadcast %cst_38 : f32 to vector<8x1xf32>
    %123 = arith.divf %121, %122 : vector<8x1xf32>
    %124 = vector.broadcast %123 : vector<8x1xf32> to vector<8x32xf32>
    %125 = arith.subf %117, %124 : vector<8x32xf32>
    %126 = arith.mulf %125, %125 : vector<8x32xf32>
    %cst_39 = arith.constant dense<0.000000e+00> : vector<8xf32>
    %127 = vector.multi_reduction <add>, %126, %cst_39 [1] : vector<8x32xf32> to vector<8xf32>
    %128 = vector.shape_cast %127 : vector<8xf32> to vector<8x1xf32>
    %cst_40 = arith.constant 3.200000e+01 : f32
    %129 = vector.broadcast %cst_40 : f32 to vector<8x1xf32>
    %130 = arith.divf %128, %129 : vector<8x1xf32>
    %131 = vector.broadcast %123 : vector<8x1xf32> to vector<8x32xf32>
    %132 = arith.subf %117, %131 : vector<8x32xf32>
    %cst_41 = arith.constant 9.99999974E-6 : f32
    %133 = vector.broadcast %cst_41 : f32 to vector<8x1xf32>
    %134 = arith.addf %130, %133 : vector<8x1xf32>
    %135 = math.rsqrt %134 : vector<8x1xf32>
    %136 = vector.broadcast %135 : vector<8x1xf32> to vector<8x32xf32>
    %137 = arith.mulf %132, %136 : vector<8x32xf32>
    %138 = vector.broadcast %118 : vector<1x32xf32> to vector<8x32xf32>
    %139 = arith.mulf %137, %138 : vector<8x32xf32>
    %140 = vector.broadcast %119 : vector<1x32xf32> to vector<8x32xf32>
    %141 = arith.addf %139, %140 : vector<8x32xf32>
    %c0_42 = arith.constant 0 : index
    %c0_43 = arith.constant 0 : index
    %c0_44 = arith.constant 0 : index
    %142 = vector.load %arg2[%c0_42, %c0_43, %c0_44] : memref<1x8x32xf32, #tpu.memory_space<vmem>>, vector<1x8x32xf32>
    %143 = vector.shape_cast %142 : vector<1x8x32xf32> to vector<8x32xf32>
    %c0_45 = arith.constant 0 : index
    %c0_46 = arith.constant 0 : index
    %144 = vector.load %arg10[%c0_45, %c0_46] : memref<32x32xf32, #tpu.memory_space<vmem>>, vector<32x32xf32>
    %145 = arith.truncf %141 : vector<8x32xf32> to vector<8x32xbf16>
    %146 = arith.truncf %144 : vector<32x32xf32> to vector<32x32xbf16>
    %cst_47 = arith.constant dense<0.000000e+00> : vector<8x32xf32>
    %147 = tpu.matmul %145, %146, %cst_47 {dimension_numbers = #tpu.dot_dimension_numbers<[1], [0], [0], [1], [0, 0, 1, 1], [], []>} : vector<8x32xbf16>, vector<32x32xbf16>, vector<8x32xf32> -> vector<8x32xf32>
    %c0_48 = arith.constant 0 : index
    %c0_49 = arith.constant 0 : index
    %148 = vector.load %arg11[%c0_48, %c0_49] : memref<1x32xf32, #tpu.memory_space<vmem>>, vector<1x32xf32>
    %149 = vector.broadcast %148 : vector<1x32xf32> to vector<8x32xf32>
    %150 = arith.addf %147, %149 : vector<8x32xf32>
    %151 = vector.shape_cast %150 : vector<8x32xf32> to vector<1x8x32xf32>
    %c0_50 = arith.constant 0 : index
    %c0_51 = arith.constant 0 : index
    %152 = vector.load %arg12[%c0_50, %c0_51] : memref<32x64xf32, #tpu.memory_space<vmem>>, vector<32x64xf32>
    %153 = arith.truncf %143 : vector<8x32xf32> to vector<8x32xbf16>
    %154 = arith.truncf %152 : vector<32x64xf32> to vector<32x64xbf16>
    %cst_52 = arith.constant dense<0.000000e+00> : vector<8x64xf32>
    %155 = tpu.matmul %153, %154, %cst_52 {dimension_numbers = #tpu.dot_dimension_numbers<[1], [0], [0], [1], [0, 0, 1, 1], [], []>} : vector<8x32xbf16>, vector<32x64xbf16>, vector<8x64xf32> -> vector<8x64xf32>
    %c0_53 = arith.constant 0 : index
    %c0_54 = arith.constant 0 : index
    %156 = vector.load %arg13[%c0_53, %c0_54] : memref<1x64xf32, #tpu.memory_space<vmem>>, vector<1x64xf32>
    %157 = vector.broadcast %156 : vector<1x64xf32> to vector<8x64xf32>
    %158 = arith.addf %155, %157 : vector<8x64xf32>
    %159 = vector.extract_strided_slice %158 {offsets = [0, 0], sizes = [8, 32], strides = [1, 1]} : vector<8x64xf32> to vector<8x32xf32>
    %160 = vector.shape_cast %159 : vector<8x32xf32> to vector<1x8x32xf32>
    %161 = vector.extract_strided_slice %158 {offsets = [0, 32], sizes = [8, 32], strides = [1, 1]} : vector<8x64xf32> to vector<8x32xf32>
    %162 = vector.shape_cast %161 : vector<8x32xf32> to vector<1x8x32xf32>
    %163 = vector.extract_strided_slice %151 {offsets = [0, 0, 0], sizes = [1, 8, 8], strides = [1, 1, 1]} : vector<1x8x32xf32> to vector<1x8x8xf32>
    %164 = arith.truncf %163 : vector<1x8x8xf32> to vector<1x8x8xbf16>
    %165 = vector.extract_strided_slice %160 {offsets = [0, 0, 0], sizes = [1, 8, 8], strides = [1, 1, 1]} : vector<1x8x32xf32> to vector<1x8x8xf32>
    %166 = arith.truncf %165 : vector<1x8x8xf32> to vector<1x8x8xbf16>
    "tpu.trace_start"() <{level = 10 : i32, message = "bqd,bkd->bqk"}> : () -> ()
    %cst_55 = arith.constant dense<0.000000e+00> : vector<1x8x8xf32>
    %167 = tpu.matmul %164, %166, %cst_55 {dimension_numbers = #tpu.dot_dimension_numbers<[2], [2], [1], [1], [0, 0, 0, 1, 1, 1], [0], [0]>} : vector<1x8x8xbf16>, vector<1x8x8xbf16>, vector<1x8x8xf32> -> vector<1x8x8xf32>
    "tpu.trace_stop"() : () -> ()
    %cst_56 = arith.constant 0.353553385 : f32
    %168 = vector.broadcast %cst_56 : f32 to vector<1x8x8xf32>
    %169 = arith.mulf %167, %168 : vector<1x8x8xf32>
    %cst_57 = arith.constant dense<0xFF800000> : vector<1x8xf32>
    %170 = vector.multi_reduction <maximumf>, %169, %cst_57 [2] : vector<1x8x8xf32> to vector<1x8xf32>
    %171 = vector.shape_cast %170 : vector<1x8xf32> to vector<1x8x1xf32>
    %172 = vector.broadcast %171 : vector<1x8x1xf32> to vector<1x8x8xf32>
    %173 = arith.subf %169, %172 : vector<1x8x8xf32>
    %174 = math.exp %173 : vector<1x8x8xf32>
    %cst_58 = arith.constant dense<0.000000e+00> : vector<1x8xf32>
    %175 = vector.multi_reduction <add>, %174, %cst_58 [2] : vector<1x8x8xf32> to vector<1x8xf32>
    %176 = vector.shape_cast %175 : vector<1x8xf32> to vector<1x8x1xf32>
    %177 = tpu.reciprocal %176 {approx = true} : vector<1x8x1xf32> -> vector<1x8x1xf32>
    %178 = vector.broadcast %177 : vector<1x8x1xf32> to vector<1x8x8xf32>
    %179 = arith.mulf %174, %178 : vector<1x8x8xf32>
    %180 = arith.truncf %179 : vector<1x8x8xf32> to vector<1x8x8xbf16>
    %181 = vector.extract_strided_slice %162 {offsets = [0, 0, 0], sizes = [1, 8, 8], strides = [1, 1, 1]} : vector<1x8x32xf32> to vector<1x8x8xf32>
    %182 = arith.truncf %181 : vector<1x8x8xf32> to vector<1x8x8xbf16>
    "tpu.trace_start"() <{level = 10 : i32, message = "bqk,bkd->bqd"}> : () -> ()
    %cst_59 = arith.constant dense<0.000000e+00> : vector<1x8x8xf32>
    %183 = tpu.matmul %180, %182, %cst_59 {dimension_numbers = #tpu.dot_dimension_numbers<[2], [1], [1], [2], [0, 0, 0, 1, 1, 2], [0], [0]>} : vector<1x8x8xbf16>, vector<1x8x8xbf16>, vector<1x8x8xf32> -> vector<1x8x8xf32>
    "tpu.trace_stop"() : () -> ()
    %184 = vector.extract_strided_slice %151 {offsets = [0, 0, 8], sizes = [1, 8, 8], strides = [1, 1, 1]} : vector<1x8x32xf32> to vector<1x8x8xf32>
    %185 = arith.truncf %184 : vector<1x8x8xf32> to vector<1x8x8xbf16>
    %186 = vector.extract_strided_slice %160 {offsets = [0, 0, 8], sizes = [1, 8, 8], strides = [1, 1, 1]} : vector<1x8x32xf32> to vector<1x8x8xf32>
    %187 = arith.truncf %186 : vector<1x8x8xf32> to vector<1x8x8xbf16>
    "tpu.trace_start"() <{level = 10 : i32, message = "bqd,bkd->bqk"}> : () -> ()
    %cst_60 = arith.constant dense<0.000000e+00> : vector<1x8x8xf32>
    %188 = tpu.matmul %185, %187, %cst_60 {dimension_numbers = #tpu.dot_dimension_numbers<[2], [2], [1], [1], [0, 0, 0, 1, 1, 1], [0], [0]>} : vector<1x8x8xbf16>, vector<1x8x8xbf16>, vector<1x8x8xf32> -> vector<1x8x8xf32>
    "tpu.trace_stop"() : () -> ()
    %cst_61 = arith.constant 0.353553385 : f32
    %189 = vector.broadcast %cst_61 : f32 to vector<1x8x8xf32>
    %190 = arith.mulf %188, %189 : vector<1x8x8xf32>
    %cst_62 = arith.constant dense<0xFF800000> : vector<1x8xf32>
    %191 = vector.multi_reduction <maximumf>, %190, %cst_62 [2] : vector<1x8x8xf32> to vector<1x8xf32>
    %192 = vector.shape_cast %191 : vector<1x8xf32> to vector<1x8x1xf32>
    %193 = vector.broadcast %192 : vector<1x8x1xf32> to vector<1x8x8xf32>
    %194 = arith.subf %190, %193 : vector<1x8x8xf32>
    %195 = math.exp %194 : vector<1x8x8xf32>
    %cst_63 = arith.constant dense<0.000000e+00> : vector<1x8xf32>
    %196 = vector.multi_reduction <add>, %195, %cst_63 [2] : vector<1x8x8xf32> to vector<1x8xf32>
    %197 = vector.shape_cast %196 : vector<1x8xf32> to vector<1x8x1xf32>
    %198 = tpu.reciprocal %197 {approx = true} : vector<1x8x1xf32> -> vector<1x8x1xf32>
    %199 = vector.broadcast %198 : vector<1x8x1xf32> to vector<1x8x8xf32>
    %200 = arith.mulf %195, %199 : vector<1x8x8xf32>
    %201 = arith.truncf %200 : vector<1x8x8xf32> to vector<1x8x8xbf16>
    %202 = vector.extract_strided_slice %162 {offsets = [0, 0, 8], sizes = [1, 8, 8], strides = [1, 1, 1]} : vector<1x8x32xf32> to vector<1x8x8xf32>
    %203 = arith.truncf %202 : vector<1x8x8xf32> to vector<1x8x8xbf16>
    "tpu.trace_start"() <{level = 10 : i32, message = "bqk,bkd->bqd"}> : () -> ()
    %cst_64 = arith.constant dense<0.000000e+00> : vector<1x8x8xf32>
    %204 = tpu.matmul %201, %203, %cst_64 {dimension_numbers = #tpu.dot_dimension_numbers<[2], [1], [1], [2], [0, 0, 0, 1, 1, 2], [0], [0]>} : vector<1x8x8xbf16>, vector<1x8x8xbf16>, vector<1x8x8xf32> -> vector<1x8x8xf32>
    "tpu.trace_stop"() : () -> ()
    %205 = vector.extract_strided_slice %151 {offsets = [0, 0, 16], sizes = [1, 8, 8], strides = [1, 1, 1]} : vector<1x8x32xf32> to vector<1x8x8xf32>
    %206 = arith.truncf %205 : vector<1x8x8xf32> to vector<1x8x8xbf16>
    %207 = vector.extract_strided_slice %160 {offsets = [0, 0, 16], sizes = [1, 8, 8], strides = [1, 1, 1]} : vector<1x8x32xf32> to vector<1x8x8xf32>
    %208 = arith.truncf %207 : vector<1x8x8xf32> to vector<1x8x8xbf16>
    "tpu.trace_start"() <{level = 10 : i32, message = "bqd,bkd->bqk"}> : () -> ()
    %cst_65 = arith.constant dense<0.000000e+00> : vector<1x8x8xf32>
    %209 = tpu.matmul %206, %208, %cst_65 {dimension_numbers = #tpu.dot_dimension_numbers<[2], [2], [1], [1], [0, 0, 0, 1, 1, 1], [0], [0]>} : vector<1x8x8xbf16>, vector<1x8x8xbf16>, vector<1x8x8xf32> -> vector<1x8x8xf32>
    "tpu.trace_stop"() : () -> ()
    %cst_66 = arith.constant 0.353553385 : f32
    %210 = vector.broadcast %cst_66 : f32 to vector<1x8x8xf32>
    %211 = arith.mulf %209, %210 : vector<1x8x8xf32>
    %cst_67 = arith.constant dense<0xFF800000> : vector<1x8xf32>
    %212 = vector.multi_reduction <maximumf>, %211, %cst_67 [2] : vector<1x8x8xf32> to vector<1x8xf32>
    %213 = vector.shape_cast %212 : vector<1x8xf32> to vector<1x8x1xf32>
    %214 = vector.broadcast %213 : vector<1x8x1xf32> to vector<1x8x8xf32>
    %215 = arith.subf %211, %214 : vector<1x8x8xf32>
    %216 = math.exp %215 : vector<1x8x8xf32>
    %cst_68 = arith.constant dense<0.000000e+00> : vector<1x8xf32>
    %217 = vector.multi_reduction <add>, %216, %cst_68 [2] : vector<1x8x8xf32> to vector<1x8xf32>
    %218 = vector.shape_cast %217 : vector<1x8xf32> to vector<1x8x1xf32>
    %219 = tpu.reciprocal %218 {approx = true} : vector<1x8x1xf32> -> vector<1x8x1xf32>
    %220 = vector.broadcast %219 : vector<1x8x1xf32> to vector<1x8x8xf32>
    %221 = arith.mulf %216, %220 : vector<1x8x8xf32>
    %222 = arith.truncf %221 : vector<1x8x8xf32> to vector<1x8x8xbf16>
    %223 = vector.extract_strided_slice %162 {offsets = [0, 0, 16], sizes = [1, 8, 8], strides = [1, 1, 1]} : vector<1x8x32xf32> to vector<1x8x8xf32>
    %224 = arith.truncf %223 : vector<1x8x8xf32> to vector<1x8x8xbf16>
    "tpu.trace_start"() <{level = 10 : i32, message = "bqk,bkd->bqd"}> : () -> ()
    %cst_69 = arith.constant dense<0.000000e+00> : vector<1x8x8xf32>
    %225 = tpu.matmul %222, %224, %cst_69 {dimension_numbers = #tpu.dot_dimension_numbers<[2], [1], [1], [2], [0, 0, 0, 1, 1, 2], [0], [0]>} : vector<1x8x8xbf16>, vector<1x8x8xbf16>, vector<1x8x8xf32> -> vector<1x8x8xf32>
    "tpu.trace_stop"() : () -> ()
    %226 = vector.extract_strided_slice %151 {offsets = [0, 0, 24], sizes = [1, 8, 8], strides = [1, 1, 1]} : vector<1x8x32xf32> to vector<1x8x8xf32>
    %227 = arith.truncf %226 : vector<1x8x8xf32> to vector<1x8x8xbf16>
    %228 = vector.extract_strided_slice %160 {offsets = [0, 0, 24], sizes = [1, 8, 8], strides = [1, 1, 1]} : vector<1x8x32xf32> to vector<1x8x8xf32>
    %229 = arith.truncf %228 : vector<1x8x8xf32> to vector<1x8x8xbf16>
    "tpu.trace_start"() <{level = 10 : i32, message = "bqd,bkd->bqk"}> : () -> ()
    %cst_70 = arith.constant dense<0.000000e+00> : vector<1x8x8xf32>
    %230 = tpu.matmul %227, %229, %cst_70 {dimension_numbers = #tpu.dot_dimension_numbers<[2], [2], [1], [1], [0, 0, 0, 1, 1, 1], [0], [0]>} : vector<1x8x8xbf16>, vector<1x8x8xbf16>, vector<1x8x8xf32> -> vector<1x8x8xf32>
    "tpu.trace_stop"() : () -> ()
    %cst_71 = arith.constant 0.353553385 : f32
    %231 = vector.broadcast %cst_71 : f32 to vector<1x8x8xf32>
    %232 = arith.mulf %230, %231 : vector<1x8x8xf32>
    %cst_72 = arith.constant dense<0xFF800000> : vector<1x8xf32>
    %233 = vector.multi_reduction <maximumf>, %232, %cst_72 [2] : vector<1x8x8xf32> to vector<1x8xf32>
    %234 = vector.shape_cast %233 : vector<1x8xf32> to vector<1x8x1xf32>
    %235 = vector.broadcast %234 : vector<1x8x1xf32> to vector<1x8x8xf32>
    %236 = arith.subf %232, %235 : vector<1x8x8xf32>
    %237 = math.exp %236 : vector<1x8x8xf32>
    %cst_73 = arith.constant dense<0.000000e+00> : vector<1x8xf32>
    %238 = vector.multi_reduction <add>, %237, %cst_73 [2] : vector<1x8x8xf32> to vector<1x8xf32>
    %239 = vector.shape_cast %238 : vector<1x8xf32> to vector<1x8x1xf32>
    %240 = tpu.reciprocal %239 {approx = true} : vector<1x8x1xf32> -> vector<1x8x1xf32>
    %241 = vector.broadcast %240 : vector<1x8x1xf32> to vector<1x8x8xf32>
    %242 = arith.mulf %237, %241 : vector<1x8x8xf32>
    %243 = arith.truncf %242 : vector<1x8x8xf32> to vector<1x8x8xbf16>
    %244 = vector.extract_strided_slice %162 {offsets = [0, 0, 24], sizes = [1, 8, 8], strides = [1, 1, 1]} : vector<1x8x32xf32> to vector<1x8x8xf32>
    %245 = arith.truncf %244 : vector<1x8x8xf32> to vector<1x8x8xbf16>
    "tpu.trace_start"() <{level = 10 : i32, message = "bqk,bkd->bqd"}> : () -> ()
    %cst_74 = arith.constant dense<0.000000e+00> : vector<1x8x8xf32>
    %246 = tpu.matmul %243, %245, %cst_74 {dimension_numbers = #tpu.dot_dimension_numbers<[2], [1], [1], [2], [0, 0, 0, 1, 1, 2], [0], [0]>} : vector<1x8x8xbf16>, vector<1x8x8xbf16>, vector<1x8x8xf32> -> vector<1x8x8xf32>
    "tpu.trace_stop"() : () -> ()
    %247 = tpu.concatenate %183, %204, %225, %246 in 2 : vector<1x8x8xf32>, vector<1x8x8xf32>, vector<1x8x8xf32>, vector<1x8x8xf32> -> vector<1x8x32xf32>
    %248 = vector.shape_cast %247 : vector<1x8x32xf32> to vector<8x32xf32>
    %c0_75 = arith.constant 0 : index
    %c0_76 = arith.constant 0 : index
    %249 = vector.load %arg14[%c0_75, %c0_76] : memref<32x32xf32, #tpu.memory_space<vmem>>, vector<32x32xf32>
    %250 = arith.truncf %248 : vector<8x32xf32> to vector<8x32xbf16>
    %251 = arith.truncf %249 : vector<32x32xf32> to vector<32x32xbf16>
    %cst_77 = arith.constant dense<0.000000e+00> : vector<8x32xf32>
    %252 = tpu.matmul %250, %251, %cst_77 {dimension_numbers = #tpu.dot_dimension_numbers<[1], [0], [0], [1], [0, 0, 1, 1], [], []>} : vector<8x32xbf16>, vector<32x32xbf16>, vector<8x32xf32> -> vector<8x32xf32>
    %c0_78 = arith.constant 0 : index
    %c0_79 = arith.constant 0 : index
    %253 = vector.load %arg15[%c0_78, %c0_79] : memref<1x32xf32, #tpu.memory_space<vmem>>, vector<1x32xf32>
    %254 = vector.broadcast %253 : vector<1x32xf32> to vector<8x32xf32>
    %255 = arith.addf %252, %254 : vector<8x32xf32>
    %256 = arith.addf %141, %255 : vector<8x32xf32>
    %c0_80 = arith.constant 0 : index
    %c0_81 = arith.constant 0 : index
    %257 = vector.load %arg16[%c0_80, %c0_81] : memref<1x32xf32, #tpu.memory_space<vmem>>, vector<1x32xf32>
    %c0_82 = arith.constant 0 : index
    %c0_83 = arith.constant 0 : index
    %258 = vector.load %arg17[%c0_82, %c0_83] : memref<1x32xf32, #tpu.memory_space<vmem>>, vector<1x32xf32>
    %cst_84 = arith.constant dense<0.000000e+00> : vector<8xf32>
    %259 = vector.multi_reduction <add>, %256, %cst_84 [1] : vector<8x32xf32> to vector<8xf32>
    %260 = vector.shape_cast %259 : vector<8xf32> to vector<8x1xf32>
    %cst_85 = arith.constant 3.200000e+01 : f32
    %261 = vector.broadcast %cst_85 : f32 to vector<8x1xf32>
    %262 = arith.divf %260, %261 : vector<8x1xf32>
    %263 = vector.broadcast %262 : vector<8x1xf32> to vector<8x32xf32>
    %264 = arith.subf %256, %263 : vector<8x32xf32>
    %265 = arith.mulf %264, %264 : vector<8x32xf32>
    %cst_86 = arith.constant dense<0.000000e+00> : vector<8xf32>
    %266 = vector.multi_reduction <add>, %265, %cst_86 [1] : vector<8x32xf32> to vector<8xf32>
    %267 = vector.shape_cast %266 : vector<8xf32> to vector<8x1xf32>
    %cst_87 = arith.constant 3.200000e+01 : f32
    %268 = vector.broadcast %cst_87 : f32 to vector<8x1xf32>
    %269 = arith.divf %267, %268 : vector<8x1xf32>
    %270 = vector.broadcast %262 : vector<8x1xf32> to vector<8x32xf32>
    %271 = arith.subf %256, %270 : vector<8x32xf32>
    %cst_88 = arith.constant 9.99999974E-6 : f32
    %272 = vector.broadcast %cst_88 : f32 to vector<8x1xf32>
    %273 = arith.addf %269, %272 : vector<8x1xf32>
    %274 = math.rsqrt %273 : vector<8x1xf32>
    %275 = vector.broadcast %274 : vector<8x1xf32> to vector<8x32xf32>
    %276 = arith.mulf %271, %275 : vector<8x32xf32>
    %277 = vector.broadcast %257 : vector<1x32xf32> to vector<8x32xf32>
    %278 = arith.mulf %276, %277 : vector<8x32xf32>
    %279 = vector.broadcast %258 : vector<1x32xf32> to vector<8x32xf32>
    %280 = arith.addf %278, %279 : vector<8x32xf32>
    %c0_89 = arith.constant 0 : index
    %c0_90 = arith.constant 0 : index
    %281 = vector.load %arg18[%c0_89, %c0_90] : memref<32x128xf32, #tpu.memory_space<vmem>>, vector<32x128xf32>
    %282 = arith.truncf %280 : vector<8x32xf32> to vector<8x32xbf16>
    %283 = arith.truncf %281 : vector<32x128xf32> to vector<32x128xbf16>
    %cst_91 = arith.constant dense<0.000000e+00> : vector<8x128xf32>
    %284 = tpu.matmul %282, %283, %cst_91 {dimension_numbers = #tpu.dot_dimension_numbers<[1], [0], [0], [1], [0, 0, 1, 1], [], []>} : vector<8x32xbf16>, vector<32x128xbf16>, vector<8x128xf32> -> vector<8x128xf32>
    %c0_92 = arith.constant 0 : index
    %c0_93 = arith.constant 0 : index
    %285 = vector.load %arg19[%c0_92, %c0_93] : memref<1x128xf32, #tpu.memory_space<vmem>>, vector<1x128xf32>
    %286 = vector.broadcast %285 : vector<1x128xf32> to vector<8x128xf32>
    %287 = arith.addf %284, %286 : vector<8x128xf32>
    %cst_94 = arith.constant 0.000000e+00 : f32
    %288 = vector.broadcast %cst_94 : f32 to vector<8x128xf32>
    %289 = arith.maximumf %287, %288 : vector<8x128xf32>
    %c0_95 = arith.constant 0 : index
    %c0_96 = arith.constant 0 : index
    %290 = vector.load %arg20[%c0_95, %c0_96] : memref<128x32xf32, #tpu.memory_space<vmem>>, vector<128x32xf32>
    %291 = arith.truncf %289 : vector<8x128xf32> to vector<8x128xbf16>
    %292 = arith.truncf %290 : vector<128x32xf32> to vector<128x32xbf16>
    %cst_97 = arith.constant dense<0.000000e+00> : vector<8x32xf32>
    %293 = tpu.matmul %291, %292, %cst_97 {dimension_numbers = #tpu.dot_dimension_numbers<[1], [0], [0], [1], [0, 0, 1, 1], [], []>} : vector<8x128xbf16>, vector<128x32xbf16>, vector<8x32xf32> -> vector<8x32xf32>
    %c0_98 = arith.constant 0 : index
    %c0_99 = arith.constant 0 : index
    %294 = vector.load %arg21[%c0_98, %c0_99] : memref<1x32xf32, #tpu.memory_space<vmem>>, vector<1x32xf32>
    %295 = vector.broadcast %294 : vector<1x32xf32> to vector<8x32xf32>
    %296 = arith.addf %293, %295 : vector<8x32xf32>
    %297 = arith.addf %280, %296 : vector<8x32xf32>
    %c0_100 = arith.constant 0 : index
    %c0_101 = arith.constant 0 : index
    %298 = vector.load %arg22[%c0_100, %c0_101] : memref<1x32xf32, #tpu.memory_space<vmem>>, vector<1x32xf32>
    %c0_102 = arith.constant 0 : index
    %c0_103 = arith.constant 0 : index
    %299 = vector.load %arg23[%c0_102, %c0_103] : memref<1x32xf32, #tpu.memory_space<vmem>>, vector<1x32xf32>
    %cst_104 = arith.constant dense<0.000000e+00> : vector<8xf32>
    %300 = vector.multi_reduction <add>, %297, %cst_104 [1] : vector<8x32xf32> to vector<8xf32>
    %301 = vector.shape_cast %300 : vector<8xf32> to vector<8x1xf32>
    %cst_105 = arith.constant 3.200000e+01 : f32
    %302 = vector.broadcast %cst_105 : f32 to vector<8x1xf32>
    %303 = arith.divf %301, %302 : vector<8x1xf32>
    %304 = vector.broadcast %303 : vector<8x1xf32> to vector<8x32xf32>
    %305 = arith.subf %297, %304 : vector<8x32xf32>
    %306 = arith.mulf %305, %305 : vector<8x32xf32>
    %cst_106 = arith.constant dense<0.000000e+00> : vector<8xf32>
    %307 = vector.multi_reduction <add>, %306, %cst_106 [1] : vector<8x32xf32> to vector<8xf32>
    %308 = vector.shape_cast %307 : vector<8xf32> to vector<8x1xf32>
    %cst_107 = arith.constant 3.200000e+01 : f32
    %309 = vector.broadcast %cst_107 : f32 to vector<8x1xf32>
    %310 = arith.divf %308, %309 : vector<8x1xf32>
    %311 = vector.broadcast %303 : vector<8x1xf32> to vector<8x32xf32>
    %312 = arith.subf %297, %311 : vector<8x32xf32>
    %cst_108 = arith.constant 9.99999974E-6 : f32
    %313 = vector.broadcast %cst_108 : f32 to vector<8x1xf32>
    %314 = arith.addf %310, %313 : vector<8x1xf32>
    %315 = math.rsqrt %314 : vector<8x1xf32>
    %316 = vector.broadcast %315 : vector<8x1xf32> to vector<8x32xf32>
    %317 = arith.mulf %312, %316 : vector<8x32xf32>
    %318 = vector.broadcast %298 : vector<1x32xf32> to vector<8x32xf32>
    %319 = arith.mulf %317, %318 : vector<8x32xf32>
    %320 = vector.broadcast %299 : vector<1x32xf32> to vector<8x32xf32>
    %321 = arith.addf %319, %320 : vector<8x32xf32>
    %322 = vector.shape_cast %321 : vector<8x32xf32> to vector<1x8x32xf32>
    %c0_109 = arith.constant 0 : index
    %c0_110 = arith.constant 0 : index
    %c0_111 = arith.constant 0 : index
    %323 = vector.load %arg24[%c0_109, %c0_110, %c0_111] : memref<1x8x32xf32, #tpu.memory_space<vmem>>, vector<1x8x32xf32>
    tpu.vector_store %arg24[%c0_109, %c0_110, %c0_111], %322 {strides = array<i32>} : memref<1x8x32xf32, #tpu.memory_space<vmem>>, vector<1x8x32xf32>,
    return
  }
  func.func @transform_0(%arg0: i32) -> (i32, i32, i32) {
    %c0_i32 = arith.constant 0 : i32
    %c0_i32_0 = arith.constant 0 : i32
    %c0_i32_1 = arith.constant 0 : i32
    return %arg0, %c0_i32, %c0_i32_0 : i32, i32, i32
  }
  func.func @transform_1(%arg0: i32) -> (i32, i32, i32) {
    %c0_i32 = arith.constant 0 : i32
    %c0_i32_0 = arith.constant 0 : i32
    %c0_i32_1 = arith.constant 0 : i32
    return %arg0, %c0_i32, %c0_i32_0 : i32, i32, i32
  }
  func.func @transform_2(%arg0: i32) -> (i32, i32) {
    %c0_i32 = arith.constant 0 : i32
    %c0_i32_0 = arith.constant 0 : i32
    %c0_i32_1 = arith.constant 0 : i32
    return %c0_i32, %c0_i32_0 : i32, i32
  }
  func.func @transform_3(%arg0: i32) -> (i32, i32) {
    %c0_i32 = arith.constant 0 : i32
    %c0_i32_0 = arith.constant 0 : i32
    %c0_i32_1 = arith.constant 0 : i32
    return %c0_i32, %c0_i32_0 : i32, i32
  }
  func.func @transform_4(%arg0: i32) -> (i32, i32) {
    %c0_i32 = arith.constant 0 : i32
    %c0_i32_0 = arith.constant 0 : i32
    %c0_i32_1 = arith.constant 0 : i32
    return %c0_i32, %c0_i32_0 : i32, i32
  }
  func.func @transform_5(%arg0: i32) -> (i32, i32) {
    %c0_i32 = arith.constant 0 : i32
    %c0_i32_0 = arith.constant 0 : i32
    %c0_i32_1 = arith.constant 0 : i32
    return %c0_i32, %c0_i32_0 : i32, i32
  }
  func.func @transform_6(%arg0: i32) -> (i32, i32) {
    %c0_i32 = arith.constant 0 : i32
    %c0_i32_0 = arith.constant 0 : i32
    %c0_i32_1 = arith.constant 0 : i32
    return %c0_i32, %c0_i32_0 : i32, i32
  }
  func.func @transform_7(%arg0: i32) -> (i32, i32) {
    %c0_i32 = arith.constant 0 : i32
    %c0_i32_0 = arith.constant 0 : i32
    %c0_i32_1 = arith.constant 0 : i32
    return %c0_i32, %c0_i32_0 : i32, i32
  }
  func.func @transform_8(%arg0: i32) -> (i32, i32) {
    %c0_i32 = arith.constant 0 : i32
    %c0_i32_0 = arith.constant 0 : i32
    %c0_i32_1 = arith.constant 0 : i32
    return %c0_i32, %c0_i32_0 : i32, i32
  }
  func.func @transform_9(%arg0: i32) -> (i32, i32) {
    %c0_i32 = arith.constant 0 : i32
    %c0_i32_0 = arith.constant 0 : i32
    %c0_i32_1 = arith.constant 0 : i32
    return %c0_i32, %c0_i32_0 : i32, i32
  }
  func.func @transform_10(%arg0: i32) -> (i32, i32) {
    %c0_i32 = arith.constant 0 : i32
    %c0_i32_0 = arith.constant 0 : i32
    %c0_i32_1 = arith.constant 0 : i32
    return %c0_i32, %c0_i32_0 : i32, i32
  }
  func.func @transform_11(%arg0: i32) -> (i32, i32) {
    %c0_i32 = arith.constant 0 : i32
    %c0_i32_0 = arith.constant 0 : i32
    %c0_i32_1 = arith.constant 0 : i32
    return %c0_i32, %c0_i32_0 : i32, i32
  }
  func.func @transform_12(%arg0: i32) -> (i32, i32) {
    %c0_i32 = arith.constant 0 : i32
    %c0_i32_0 = arith.constant 0 : i32
    %c0_i32_1 = arith.constant 0 : i32
    return %c0_i32, %c0_i32_0 : i32, i32
  }
  func.func @transform_13(%arg0: i32) -> (i32, i32) {
    %c0_i32 = arith.constant 0 : i32
    %c0_i32_0 = arith.constant 0 : i32
    %c0_i32_1 = arith.constant 0 : i32
    return %c0_i32, %c0_i32_0 : i32, i32
  }
  func.func @transform_14(%arg0: i32) -> (i32, i32) {
    %c0_i32 = arith.constant 0 : i32
    %c0_i32_0 = arith.constant 0 : i32
    %c0_i32_1 = arith.constant 0 : i32
    return %c0_i32, %c0_i32_0 : i32, i32
  }
  func.func @transform_15(%arg0: i32) -> (i32, i32) {
    %c0_i32 = arith.constant 0 : i32
    %c0_i32_0 = arith.constant 0 : i32
    %c0_i32_1 = arith.constant 0 : i32
    return %c0_i32, %c0_i32_0 : i32, i32
  }
  func.func @transform_16(%arg0: i32) -> (i32, i32) {
    %c0_i32 = arith.constant 0 : i32
    %c0_i32_0 = arith.constant 0 : i32
    %c0_i32_1 = arith.constant 0 : i32
    return %c0_i32, %c0_i32_0 : i32, i32
  }
  func.func @transform_17(%arg0: i32) -> (i32, i32) {
    %c0_i32 = arith.constant 0 : i32
    %c0_i32_0 = arith.constant 0 : i32
    %c0_i32_1 = arith.constant 0 : i32
    return %c0_i32, %c0_i32_0 : i32, i32
  }
  func.func @transform_18(%arg0: i32) -> (i32, i32) {
    %c0_i32 = arith.constant 0 : i32
    %c0_i32_0 = arith.constant 0 : i32
    %c0_i32_1 = arith.constant 0 : i32
    return %c0_i32, %c0_i32_0 : i32, i32
  }
  func.func @transform_19(%arg0: i32) -> (i32, i32) {
    %c0_i32 = arith.constant 0 : i32
    %c0_i32_0 = arith.constant 0 : i32
    %c0_i32_1 = arith.constant 0 : i32
    return %c0_i32, %c0_i32_0 : i32, i32
  }
  func.func @transform_20(%arg0: i32) -> (i32, i32) {
    %c0_i32 = arith.constant 0 : i32
    %c0_i32_0 = arith.constant 0 : i32
    %c0_i32_1 = arith.constant 0 : i32
    return %c0_i32, %c0_i32_0 : i32, i32
  }
  func.func @transform_21(%arg0: i32) -> (i32, i32) {
    %c0_i32 = arith.constant 0 : i32
    %c0_i32_0 = arith.constant 0 : i32
    %c0_i32_1 = arith.constant 0 : i32
    return %c0_i32, %c0_i32_0 : i32, i32
  }
  func.func @transform_22(%arg0: i32) -> (i32, i32) {
    %c0_i32 = arith.constant 0 : i32
    %c0_i32_0 = arith.constant 0 : i32
    %c0_i32_1 = arith.constant 0 : i32
    return %c0_i32, %c0_i32_0 : i32, i32
  }
  func.func @transform_23(%arg0: i32) -> (i32, i32, i32) {
    %c0_i32 = arith.constant 0 : i32
    %c0_i32_0 = arith.constant 0 : i32
    %c0_i32_1 = arith.constant 0 : i32
    return %arg0, %c0_i32, %c0_i32_0 : i32, i32, i32
  }
}

module attributes {stable_mosaic.version = 11 : i64} {
  func.func @_norm_cls_softmax_kernel(%arg0: i32, %arg1: memref<1x8x32xf32, #tpu.memory_space<vmem>>, %arg2: memref<1x32xf32, #tpu.memory_space<vmem>>, %arg3: memref<1x32xf32, #tpu.memory_space<vmem>>, %arg4: memref<32x16xf32, #tpu.memory_space<vmem>>, %arg5: memref<1x16xf32, #tpu.memory_space<vmem>>, %arg6: memref<1x8x16xf32, #tpu.memory_space<vmem>>) attributes {dimension_semantics = [#tpu.dimension_semantics<parallel>], iteration_bounds = array<i64: 2>, scalar_prefetch = 0 : i64, scratch_operands = 0 : i64, tpu.core_type = #tpu.core_type<tc>, window_params = [{transform_indices = @transform_0, window_bounds = array<i64: 1, 8, 32>}, {pipeline_mode = #tpu.pipeline_mode<synchronous>, transform_indices = @transform_1, window_bounds = array<i64: 1, 32>}, {pipeline_mode = #tpu.pipeline_mode<synchronous>, transform_indices = @transform_2, window_bounds = array<i64: 1, 32>}, {pipeline_mode = #tpu.pipeline_mode<synchronous>, transform_indices = @transform_3, window_bounds = array<i64: 32, 16>}, {pipeline_mode = #tpu.pipeline_mode<synchronous>, transform_indices = @transform_4, window_bounds = array<i64: 1, 16>}, {transform_indices = @transform_5, window_bounds = array<i64: 1, 8, 16>}]} {
    %c0 = arith.constant 0 : index
    %c0_0 = arith.constant 0 : index
    %c0_1 = arith.constant 0 : index
    %0 = vector.load %arg1[%c0, %c0_0, %c0_1] : memref<1x8x32xf32, #tpu.memory_space<vmem>>, vector<1x8x32xf32>
    %1 = vector.shape_cast %0 : vector<1x8x32xf32> to vector<8x32xf32>
    %c0_2 = arith.constant 0 : index
    %c0_3 = arith.constant 0 : index
    %2 = vector.load %arg2[%c0_2, %c0_3] : memref<1x32xf32, #tpu.memory_space<vmem>>, vector<1x32xf32>
    %c0_4 = arith.constant 0 : index
    %c0_5 = arith.constant 0 : index
    %3 = vector.load %arg3[%c0_4, %c0_5] : memref<1x32xf32, #tpu.memory_space<vmem>>, vector<1x32xf32>
    %cst = arith.constant dense<0.000000e+00> : vector<8xf32>
    %4 = vector.multi_reduction <add>, %1, %cst [1] : vector<8x32xf32> to vector<8xf32>
    %5 = vector.shape_cast %4 : vector<8xf32> to vector<8x1xf32>
    %cst_6 = arith.constant 3.200000e+01 : f32
    %6 = vector.broadcast %cst_6 : f32 to vector<8x1xf32>
    %7 = arith.divf %5, %6 : vector<8x1xf32>
    %8 = vector.broadcast %7 : vector<8x1xf32> to vector<8x32xf32>
    %9 = arith.subf %1, %8 : vector<8x32xf32>
    %10 = arith.mulf %9, %9 : vector<8x32xf32>
    %cst_7 = arith.constant dense<0.000000e+00> : vector<8xf32>
    %11 = vector.multi_reduction <add>, %10, %cst_7 [1] : vector<8x32xf32> to vector<8xf32>
    %12 = vector.shape_cast %11 : vector<8xf32> to vector<8x1xf32>
    %cst_8 = arith.constant 3.200000e+01 : f32
    %13 = vector.broadcast %cst_8 : f32 to vector<8x1xf32>
    %14 = arith.divf %12, %13 : vector<8x1xf32>
    %15 = vector.broadcast %7 : vector<8x1xf32> to vector<8x32xf32>
    %16 = arith.subf %1, %15 : vector<8x32xf32>
    %cst_9 = arith.constant 9.99999974E-6 : f32
    %17 = vector.broadcast %cst_9 : f32 to vector<8x1xf32>
    %18 = arith.addf %14, %17 : vector<8x1xf32>
    %19 = math.rsqrt %18 : vector<8x1xf32>
    %20 = vector.broadcast %19 : vector<8x1xf32> to vector<8x32xf32>
    %21 = arith.mulf %16, %20 : vector<8x32xf32>
    %22 = vector.broadcast %2 : vector<1x32xf32> to vector<8x32xf32>
    %23 = arith.mulf %21, %22 : vector<8x32xf32>
    %24 = vector.broadcast %3 : vector<1x32xf32> to vector<8x32xf32>
    %25 = arith.addf %23, %24 : vector<8x32xf32>
    %c0_10 = arith.constant 0 : index
    %c0_11 = arith.constant 0 : index
    %26 = vector.load %arg4[%c0_10, %c0_11] : memref<32x16xf32, #tpu.memory_space<vmem>>, vector<32x16xf32>
    %27 = arith.truncf %25 : vector<8x32xf32> to vector<8x32xbf16>
    %28 = arith.truncf %26 : vector<32x16xf32> to vector<32x16xbf16>
    %cst_12 = arith.constant dense<0.000000e+00> : vector<8x16xf32>
    %29 = tpu.matmul %27, %28, %cst_12 {dimension_numbers = #tpu.dot_dimension_numbers<[1], [0], [0], [1], [0, 0, 1, 1], [], []>} : vector<8x32xbf16>, vector<32x16xbf16>, vector<8x16xf32> -> vector<8x16xf32>
    %c0_13 = arith.constant 0 : index
    %c0_14 = arith.constant 0 : index
    %30 = vector.load %arg5[%c0_13, %c0_14] : memref<1x16xf32, #tpu.memory_space<vmem>>, vector<1x16xf32>
    %31 = vector.broadcast %30 : vector<1x16xf32> to vector<8x16xf32>
    %32 = arith.addf %29, %31 : vector<8x16xf32>
    %cst_15 = arith.constant dense<0xFF800000> : vector<8xf32>
    %33 = vector.multi_reduction <maximumf>, %32, %cst_15 [1] : vector<8x16xf32> to vector<8xf32>
    %34 = vector.shape_cast %33 : vector<8xf32> to vector<8x1xf32>
    %35 = vector.broadcast %34 : vector<8x1xf32> to vector<8x16xf32>
    %36 = arith.subf %32, %35 : vector<8x16xf32>
    %37 = math.exp %36 : vector<8x16xf32>
    %cst_16 = arith.constant dense<0.000000e+00> : vector<8xf32>
    %38 = vector.multi_reduction <add>, %37, %cst_16 [1] : vector<8x16xf32> to vector<8xf32>
    %39 = vector.shape_cast %38 : vector<8xf32> to vector<8x1xf32>
    %40 = vector.broadcast %39 : vector<8x1xf32> to vector<8x16xf32>
    %41 = arith.divf %37, %40 : vector<8x16xf32>
    %42 = vector.shape_cast %41 : vector<8x16xf32> to vector<1x8x16xf32>
    %c0_17 = arith.constant 0 : index
    %c0_18 = arith.constant 0 : index
    %c0_19 = arith.constant 0 : index
    %43 = vector.load %arg6[%c0_17, %c0_18, %c0_19] : memref<1x8x16xf32, #tpu.memory_space<vmem>>, vector<1x8x16xf32>
    tpu.vector_store %arg6[%c0_17, %c0_18, %c0_19], %42 {strides = array<i32>} : memref<1x8x16xf32, #tpu.memory_space<vmem>>, vector<1x8x16xf32>,
    return
  }
  func.func @transform_0(%arg0: i32) -> (i32, i32, i32) {
    %c0_i32 = arith.constant 0 : i32
    %c0_i32_0 = arith.constant 0 : i32
    %c0_i32_1 = arith.constant 0 : i32
    return %arg0, %c0_i32, %c0_i32_0 : i32, i32, i32
  }
  func.func @transform_1(%arg0: i32) -> (i32, i32) {
    %c0_i32 = arith.constant 0 : i32
    %c0_i32_0 = arith.constant 0 : i32
    %c0_i32_1 = arith.constant 0 : i32
    return %c0_i32, %c0_i32_0 : i32, i32
  }
  func.func @transform_2(%arg0: i32) -> (i32, i32) {
    %c0_i32 = arith.constant 0 : i32
    %c0_i32_0 = arith.constant 0 : i32
    %c0_i32_1 = arith.constant 0 : i32
    return %c0_i32, %c0_i32_0 : i32, i32
  }
  func.func @transform_3(%arg0: i32) -> (i32, i32) {
    %c0_i32 = arith.constant 0 : i32
    %c0_i32_0 = arith.constant 0 : i32
    %c0_i32_1 = arith.constant 0 : i32
    return %c0_i32, %c0_i32_0 : i32, i32
  }
  func.func @transform_4(%arg0: i32) -> (i32, i32) {
    %c0_i32 = arith.constant 0 : i32
    %c0_i32_0 = arith.constant 0 : i32
    %c0_i32_1 = arith.constant 0 : i32
    return %c0_i32, %c0_i32_0 : i32, i32
  }
  func.func @transform_5(%arg0: i32) -> (i32, i32, i32) {
    %c0_i32 = arith.constant 0 : i32
    %c0_i32_0 = arith.constant 0 : i32
    %c0_i32_1 = arith.constant 0 : i32
    return %arg0, %c0_i32, %c0_i32_0 : i32, i32, i32
  }
}

</mosaic_0001>

<bundles_post_ra>
// kernel: transformer_forward.8
= control target key start
LH: loop header
LB: loop body
LE: loop exit
PB: predicated region body
PF: predicated region fallthrough
CT: control target
= control target key end

     0   :  { %s301_s12 = smov 0   ;;  %s327_s0 = inlined_call_operand.vmem [shape: f32[2,8,32], index: 0, kind: input, shape index: {}]   ;;  %s328_s1 = inlined_call_operand.vmem [shape: f32[1,32], index: 1, kind: input, shape index: {}]   ;;  %s329_s2 = inlined_call_operand.vmem [shape: f32[1,32], index: 2, kind: input, shape index: {}]   ;;  %s330_s3 = inlined_call_operand.vmem [shape: f32[2,8,32], index: 3, kind: output, shape index: {}]  }
   0x1 LB: > { %s252_s13 = sadd.s32 4294967295, %s279_s12   ;;  %p256_p0 = scmp.ge.s32.totalorder %s279_s12, 1  ;;  %s279_s12 = sphi %s301_s12, %s13_s12  }
   0x2   : > { %p136_p1 = scmp.lt.s32.totalorder %s279_s12, 3 }
   0x4   : > { %p137_p2 = pnand %p256_p0, %p136_p1 }
   0x5   : > { %p158_p3 = scmp.lt.s32.totalorder (!%p137_p2), %s252_s13, 1 }
   0x6   : > { %140 = sbr.rel (%p137_p2) target bundleno = 324 (0x144), region = 32 }
   0xb   : > { %s332_s13 = smov (!%p158_p3, %s252_s13), 1  ;;  %vm169_vm0 = vcmask 261120   ;;  %v259_v11 = vld [vmem:[%s328_s1] ss:$0 sm:$0xff] }
   0xc   : > { %s257_s14 = sshll.u32 %s332_s13, 3  ;;  %v260_v13 = vld [vmem:[%s329_s2] ss:$0 sm:$0xff] }
   0xd   : > { %s161_s17 = scalar_lea.vmem %s327_s0, %s257_s14  ;;  %s165_s24 = scalar_lea.vmem %s330_s3, %s257_s14 }
   0xe   : > { %v166_v0 = vld [vmem:[%s161_s17] sm:$0xff] }
   0xf   : > { %v170_v1 = vsel %vm169_vm0, %v166_v0, 0.0 }
  0x10   : > { %171 = vadd.xlane.f32.xlu0 %v170_v1 }
  0x99   : > { %v172_v2 = vpop.xlane.xlu0 %171 }
  0x9a   : > { %v174_v3 = vmul.f32 0.03125, %v172_v2 }
  0x9c   : > { %v175_v4 = vsub.f32 %v166_v0, %v174_v3 }
  0x9e   : > { %v176_v5 = vmul.f32 %v175_v4, %v175_v4 }
  0xa0   : > { %v177_v6 = vsel %vm169_vm0, %v176_v5, 0.0 }
  0xa1   : > { %178 = vadd.xlane.f32.xlu0 %v177_v6 }
 0x12a   : > { %v179_v7 = vpop.xlane.xlu0 %178 }
 0x12b   : > { %v180_v8 = vmul.f32 0.03125, %v179_v7 }
 0x12d   : > { %v181_v9 = vadd.f32 1e-05, %v180_v8 }
 0x12f   : > { %271 = vrsqrt.f32 %v181_v9 }
 0x13c   : > { %v272_v10 = vpop.eup %271 }
 0x13d   : > { %v183_v12 = vmul.f32 %v272_v10, %v175_v4 }
 0x13f   : > { %v190_v14 = vmul.f32 %v259_v11, %v183_v12 }
 0x141   : > { %v197_v15 = vadd.f32 %v260_v13, %v190_v14 }
 0x143   : > { %198 = vst.msk [vmem:[%s165_s24] sm:$0xff] %vm169_vm0, %v197_v15 }
 0x144 PF: > { %s13_s12 = sadd.s32 1, %s279_s12  }
 0x145   : > { %p10_p4 = scmp.ge.s32.totalorder %s13_s12, 4  }
 0x147   :  { %12 = sbr.rel (!%p10_p4) target bundleno = 1 (0x1), region = 62 }

// kernel: transformer_forward.6
= control target key start
LH: loop header
LB: loop body
LE: loop exit
PB: predicated region body
PF: predicated region fallthrough
CT: control target
= control target key end

     0   :  { %s1553_s25 = smov 0   ;;  %s1783_s0 = inlined_call_operand.vmem [shape: f32[2,8,32], index: 0, kind: input, shape index: {}]   ;;  %s1784_s1 = inlined_call_operand.vmem [shape: f32[32,96], index: 1, kind: input, shape index: {}]   ;;  %s1785_s2 = inlined_call_operand.vmem [shape: f32[1,96], index: 2, kind: input, shape index: {}]   ;;  %s1786_s3 = inlined_call_operand.vmem [shape: f32[32,32], index: 3, kind: input, shape index: {}]   ;;  %s1787_s4 = inlined_call_operand.vmem [shape: f32[1,32], index: 4, kind: input, shape index: {}]   ;;  %s1788_s5 = inlined_call_operand.vmem [shape: f32[1,32], index: 5, kind: input, shape index: {}]   ;;  %s1789_s6 = inlined_call_operand.vmem [shape: f32[1,32], index: 6, kind: input, shape index: {}]   ;;  %s1790_s7 = inlined_call_operand.vmem [shape: f32[32,128], index: 7, kind: input, shape index: {}]   ;;  %s1791_s8 = inlined_call_operand.vmem [shape: f32[1,128], index: 8, kind: input, shape index: {}]   ;;  %s1792_s9 = inlined_call_operand.vmem [shape: f32[128,32], index: 9, kind: input, shape index: {}]   ;;  %s1793_s10 = inlined_call_operand.vmem [shape: f32[1,32], index: 10, kind: input, shape index: {}]   ;;  %s1794_s11 = inlined_call_operand.vmem [shape: f32[1,32], index: 11, kind: input, shape index: {}]   ;;  %s1795_s12 = inlined_call_operand.vmem [shape: f32[1,32], index: 12, kind: input, shape index: {}]   ;;  %s1796_s13 = inlined_call_operand.vmem [shape: f32[2,8,32], index: 13, kind: output, shape index: {}]  }
   0x1 LB: > { %s1261_s26 = sadd.s32 4294967295, %s1465_s25   ;;  %p1265_p0 = scmp.ge.s32.totalorder %s1465_s25, 1  ;;  %s1465_s25 = sphi %s1553_s25, %s23_s25  }
   0x2   : > { %p386_p1 = scmp.lt.s32.totalorder %s1465_s25, 3 }
   0x4   : > { %p387_p2 = pnand %p1265_p0, %p386_p1 }
   0x5   : > { %p428_p3 = scmp.lt.s32.totalorder (!%p387_p2), %s1261_s26, 1  ;;  %s1469_s24 = smov (!%p387_p2), 120  }
   0x6   : > { %390 = sbr.rel (%p387_p2) target bundleno = 2430 (0x97e), region = 72  ;;  %s1470_s27 = smov (!%p387_p2), 96  }
   0x7   : > { %s1471_s28 = smov (!%p387_p2), 80   ;;  %s1472_s29 = smov (!%p387_p2), 88  }
   0x8   : > { %s1473_s30 = smov (!%p387_p2), 72   ;;  %s1474_s14 = smov (!%p387_p2), 112  }
   0x9   : > { %s1475_s15 = smov (!%p387_p2), 104   ;;  %s1476_s16 = smov (!%p387_p2), 56  }
   0xa   : > { %s1477_s17 = smov (!%p387_p2), 64   ;;  %s1478_s19 = smov (!%p387_p2), 40  }
   0xb   : > { %v440_v0 = vld [vmem:[%s1784_s1 + $0x10] sm:$0xff]  ;;  %v441_v1 = vld [vmem:[%s1784_s1 + $0x18] sm:$0xff]  ;;  %v438_v2 = vld [vmem:[%s1784_s1] sm:$0xff]  ;;  %v1467_v3 = vmov 0.0   ;;  %vm1468_vm0 = vmmov 0   ;;  %s1798_s26 = smov (!%p428_p3, %s1261_s26), 1 }
   0xc   : > { %1323 = vmatprep.subr.bf16.mxu0 %v1467_v3  ;;  %v444_v4 = vpack.c.bf16 %v441_v1, %v440_v0  ;;  %v439_v5 = vld [vmem:[%s1784_s1 + $0x8] sm:$0xff]  ;;  %1327 = vmatprep.mubr.msk.bf16.mxu0 %vm1468_vm0, %v1467_v3  ;;  %s1266_s18 = sshll.u32 %s1798_s26, 3  ;;  %vm452_vm1 = vcmask 261120   ;;  %v1268_v9 = vld [vmem:[%s1785_s2] ss:$0 sm:$0xff]  ;;  %vm500_vm2 = vcmask 64512  }
   0xd   : > { %1343 = vmatprep.subr.bf16.mxu1 %v1467_v3  ;;  %1345 = vmatprep.mubr.msk.bf16.mxu1 %vm1468_vm0, %v1467_v3  ;;  %v443_v6 = vpack.c.bf16 %v439_v5, %v438_v2  ;;  %s431_s21 = scalar_lea.vmem %s1783_s0, %s1266_s18  ;;  %s1479_s20 = smov 48   ;;  %vm565_vm3 = vcmask 1043456   ;;  %vm955_vm4 = vcmask 130048   ;;  %vm957_vm5 = vcmask 195584  }
   0xe   : > { %1324 = vmatpush3.bf16.msra.mxu0 %v444_v4  ;;  %v1588_v7 = vld [vmem:[%s431_s21] sm:$0xff]  ;;  %s1480_s21 = smov 8  }
   0xf   : > { %1325 = vmatprep.subr.bf16.mxu0 %v1467_v3  ;;  %v442_v8 = vpack.c.bf16 %v1588_v7, %v1588_v7 }
  0x12   : > { %1326 = vmatpush3.bf16.msra.mxu0 %v443_v6 }
  0x13   : > { %1331 = vmatprep.subr.bf16.mxu0 %v1467_v3 }
  0x15   : > { %1328 = vmatmul.mubr.msk.bf16.vlgmr.msra.gmra.mxu0 %vm452_vm1, %v442_v8 }
  0x16   : > { %1333 = vmatprep.mubr.msk.bf16.mxu0 %vm1468_vm0, %v1467_v3 }
  0xd5   : > { %v490_v10 = vpop.f32.mrf.mxu0 }
  0xd6   : > { %v491_v11 = vadd.f32 %v1268_v9, %v490_v10 }
  0xd7   : > { %v1329_v12 = vpop.f32.mrf.mxu0 }
  0xd8   : > { %v1599_v13 = vpack.c.bf16 %v491_v11, %v491_v11 }
  0xd9   : > { %v493_v14 = vpop.f32.mrf.mxu0 }
  0xda   : > { %609 = vrot.lane.b32.xlu1 %v1599_v13, %s1469_s24  ;;  %498 = vrot.lane.b32.xlu0 %v1599_v13, %s1470_s27 }
  0xdb   : > { %v1330_v15 = vpop.f32.mrf.mxu0 }
  0xde   : > { %722 = vrot.lane.b32.xlu1 %v1599_v13, %s1471_s28  ;;  %611 = vrot.lane.b32.xlu0 %v1599_v13, %s1472_s29 }
  0xe2   : > { %833 = vrot.lane.b32.xlu1 %v1599_v13, %s1473_s30  ;;  %720 = vrot.lane.b32.xlu0 %v1599_v13, %s1474_s14 }
  0xe6   : > { %831 = vrot.lane.b32.xlu0 %v1599_v13, %s1475_s15  ;;  %s1481_s15 = smov 16  }
 0x14c   : > { %v499_v16 = vpop.permute.xlu0 %498  ;;  %v610_v18 = vpop.permute.xlu1 %609 }
 0x14d   : > { %v505_v17 = vsel %vm500_vm2, %v499_v16, 0 }
 0x14e   : > { %1332 = vmatpush3.bf16.xpose.msra.mxu0 %v505_v17 }
 0x14f   : > { %1337 = vmatprep.subr.bf16.mxu0 %v1467_v3 }
 0x150   : > { %v612_v19 = vpop.permute.xlu0 %611  ;;  %v723_v21 = vpop.permute.xlu1 %722 }
 0x151   : > { %v617_v20 = vsel %vm500_vm2, %v612_v19, 0  ;;  %v728_v22 = vsel %vm500_vm2, %v723_v21, 0 }
 0x152   : > { %1344 = vmatpush3.bf16.xpose.msra.mxu1 %v617_v20 }
 0x153   : > { %1355 = vmatprep.subr.bf16.mxu1 %v1467_v3 }
 0x154   : > { %v834_v23 = vpop.permute.xlu1 %833  ;;  %v721_v24 = vpop.permute.xlu0 %720 }
 0x155   : > { %1334 = vmatmul.mubr.msk.bf16.vlgmr.msra.gmra.mxu0 %vm500_vm2, %v1599_v13  ;;  %v839_v25 = vsel %vm500_vm2, %v834_v23, 0 }
 0x156   : > { %1339 = vmatprep.mubr.msk.bf16.mxu0 %vm1468_vm0, %v1467_v3 }
 0x158   : > { %v832_v26 = vpop.permute.xlu0 %831 }
 0x159   : > { %1346 = vmatmul.mubr.msk.bf16.vlgmr.msra.gmra.mxu1 %vm500_vm2, %v610_v18 }
 0x15a   : > { %1356 = vmatpush3.bf16.xpose.msra.mxu1 %v728_v22  ;;  %1357 = vmatprep.mubr.msk.bf16.mxu1 %vm1468_vm0, %v1467_v3 }
 0x15b   : > { %1367 = vmatprep.subr.bf16.mxu1 %v1467_v3 }
 0x161   : > { %1358 = vmatmul.mubr.msk.bf16.vlgmr.msra.gmra.mxu1 %vm500_vm2, %v721_v24 }
 0x162   : > { %1368 = vmatpush3.bf16.xpose.msra.mxu1 %v839_v25  ;;  %1369 = vmatprep.mubr.msk.bf16.mxu1 %vm1468_vm0, %v1467_v3 }
 0x163   : > { %1379 = vmatprep.subr.bf16.mxu1 %v1467_v3 }
 0x169   : > { %1370 = vmatmul.mubr.msk.bf16.vlgmr.msra.gmra.mxu1 %vm500_vm2, %v832_v26 }
 0x16a   : > { %1383 = vmatprep.mubr.msk.bf16.mxu1 %vm1468_vm0, %v1467_v3 }
 0x215   : > { %v541_v27 = vpop.f32.mrf.mxu0 }
 0x216   : > { %v547_v28 = vmul.f32 0.35355338, %v541_v27 }
 0x217   : > { %v1335_v29 = vpop.f32.mrf.mxu0 }
 0x218   : > { %v548_v30 = vsel %vm500_vm2, %v547_v28, -inf }
 0x219   : > { %v653_v31 = vpop.f32.mrf.mxu1  ;;  %549 = vmax.xlane.f32.xlu1 %v548_v30  ;;  %v544_v32 = vpop.f32.mrf.mxu0 }
 0x21a   : > { %v659_v33 = vmul.f32 0.35355338, %v653_v31 }
 0x21b   : > { %v1336_v34 = vpop.f32.mrf.mxu0  ;;  %v1347_v35 = vpop.f32.mrf.mxu1 }
 0x21c   : > { %v660_v36 = vsel %vm500_vm2, %v659_v33, -inf }
 0x21d   : > { %661 = vmax.xlane.f32.xlu0 %v660_v36  ;;  %v656_v37 = vpop.f32.mrf.mxu1 }
 0x21f   : > { %v1348_v38 = vpop.f32.mrf.mxu1 }
 0x221   : > { %v764_v39 = vpop.f32.mrf.mxu1 }
 0x222   : > { %v770_v40 = vmul.f32 0.35355338, %v764_v39 }
 0x223   : > { %v1359_v41 = vpop.f32.mrf.mxu1 }
 0x224   : > { %v771_v42 = vsel %vm500_vm2, %v770_v40, -inf  ;;  %v961_v41 = vld [vmem:[%s1786_s3 + $0x10] sm:$0xff] }
 0x225   : > { %772 = vmax.xlane.f32.xlu0 %v771_v42  ;;  %v767_v43 = vpop.f32.mrf.mxu1  ;;  %v962_v42 = vld [vmem:[%s1786_s3 + $0x18] sm:$0xff] }
 0x226   : > { %v965_v43 = vpack.c.bf16 %v962_v42, %v961_v41  ;;  %v1281_v42 = vld [vmem:[%s1789_s6] ss:$0 sm:$0xff] }
 0x227   : > { %v1360_v44 = vpop.f32.mrf.mxu1 }
 0x228   : > { %1380 = vmatpush3.bf16.msra.mxu1 %v965_v43  ;;  %v959_v44 = vld [vmem:[%s1786_s3] sm:$0xff] }
 0x229   : > { %v875_v45 = vpop.f32.mrf.mxu1  ;;  %1381 = vmatprep.subr.bf16.mxu1 %v1467_v3 }
 0x22a   : > { %v881_v46 = vmul.f32 0.35355338, %v875_v45  ;;  %v960_v45 = vld [vmem:[%s1786_s3 + $0x8] sm:$0xff] }
 0x22b   : > { %v1371_v47 = vpop.f32.mrf.mxu1 }
 0x22c   : > { %v882_v48 = vsel %vm500_vm2, %v881_v46, -inf }
 0x22d   : > { %v878_v49 = vpop.f32.mrf.mxu1  ;;  %883 = vmax.xlane.f32.xlu1 %v882_v48 }
 0x22f   : > { %v1372_v50 = vpop.f32.mrf.mxu1 }
 0x2a2   : > { %v550_v51 = vpop.xlane.xlu1 %549 }
 0x2a3   : > { %v551_v52 = vsub.f32 %v547_v28, %v550_v51 }
 0x2a5   : > { %v552_v53 = vmul.f32 1.442695, %v551_v52 }
 0x2a6   : > { %v662_v54 = vpop.xlane.xlu0 %661 }
 0x2a7   : > { %1439 = vpow2.f32 %v552_v53  ;;  %v663_v55 = vsub.f32 %v659_v33, %v662_v54 }
 0x2a9   : > { %v664_v56 = vmul.f32 1.442695, %v663_v55 }
 0x2ab   : > { %1441 = vpow2.f32 %v664_v56 }
 0x2ae   : > { %v773_v57 = vpop.xlane.xlu0 %772 }
 0x2af   : > { %v774_v58 = vsub.f32 %v770_v40, %v773_v57 }
 0x2b1   : > { %v775_v59 = vmul.f32 1.442695, %v774_v58 }
 0x2b3   : > { %1443 = vpow2.f32 %v775_v59 }
 0x2b4   : > { %v1440_v60 = vpop.eup %1439 }
 0x2b5   : > { %v554_v61 = vsel %vm500_vm2, %v1440_v60, 0.0 }
 0x2b6   : > { %555 = vadd.xlane.f32.xlu0 %v554_v61  ;;  %v884_v2 = vpop.xlane.xlu1 %883 }
 0x2b7   : > { %v885_v4 = vsub.f32 %v881_v46, %v884_v2  ;;  %v964_v46 = vpack.c.bf16 %v960_v45, %v959_v44 }
 0x2b8   : > { %v1442_v62 = vpop.eup %1441 }
 0x2b9   : > { %v666_v63 = vsel %vm500_vm2, %v1442_v62, 0.0  ;;  %v886_v5 = vmul.f32 1.442695, %v885_v4  ;;  %1382 = vmatpush3.bf16.msra.mxu1 %v964_v46  ;;  %v1107_v46 = vld [vmem:[%s1792_s9 + $0x10] sm:$0xff] }
 0x2ba   : > { %667 = vadd.xlane.f32.xlu1 %v666_v63  ;;  %1395 = vmatprep.subr.bf16.mxu1 %v1467_v3 }
 0x2bb   : > { %1445 = vpow2.f32 %v886_v5 }
 0x2c0   : > { %v1444_v0 = vpop.eup %1443 }
 0x2c1   : > { %v777_v1 = vsel %vm500_vm2, %v1444_v0, 0.0 }
 0x2c2   : > { %778 = vadd.xlane.f32.xlu0 %v777_v1 }
 0x2c8   : > { %v1446_v6 = vpop.eup %1445 }
 0x2c9   : > { %v888_v8 = vsel %vm500_vm2, %v1446_v6, 0.0 }
 0x2cb   : > { %672 = vrot.lane.b32.xlu1 %v1599_v13, %s1476_s16  ;;  %s1482_s16 = smov 24  }
 0x2d8   : > { %560 = vrot.lane.b32.xlu0 %v1599_v13, %s1477_s17  ;;  %s435_s17 = scalar_lea.vmem %s1796_s13, %s1266_s18 }
 0x2dc   : > { %894 = vrot.lane.b32.xlu0 %v1599_v13, %s1478_s19 }
 0x2ef   : > { %889 = vadd.xlane.f32.xlu1 %v888_v8 }
 0x300   : > { %783 = vrot.lane.b32.xlu1 %v1599_v13, %s1479_s20 }
 0x33f   : > { %v556_v9 = vpop.xlane.xlu0 %555 }
 0x340   : > { %1447 = vrcp.f32 %v556_v9 }
 0x343   : > { %v668_v10 = vpop.xlane.xlu1 %667 }
 0x344   : > { %1449 = vrcp.f32 %v668_v10 }
 0x347   : > { %v673_v17 = vpop.permute.xlu1 %672 }
 0x348   : > { %v678_v20 = vsel %vm565_vm3, %v673_v17, 0  ;;  %v1048_v17 = vld [vmem:[%s1790_s7 + $0x8] sm:$0xff] }
 0x34b   : > { %v779_v11 = vpop.xlane.xlu0 %778 }
 0x34c   : > { %1451 = vrcp.f32 %v779_v11 }
 0x34d   : > { %v1448_v12 = vpop.eup %1447 }
 0x34e   : > { %v558_v14 = vmul.f32 %v1448_v12, %v1440_v60 }
 0x34f   : > { %v561_v15 = vpop.permute.xlu0 %560 }
 0x350   : > { %v567_v16 = vsel %vm565_vm3, %v561_v15, 0  ;;  %v559_v18 = vpack.c.bf16 %v558_v14, %v558_v14  ;;  %v1049_v14 = vld [vmem:[%s1790_s7 + $0x10] sm:$0xff] }
 0x351   : > { %1338 = vmatpush3.bf16.msra.mxu0 %v567_v16  ;;  %v1450_v19 = vpop.eup %1449  ;;  %v1047_v16 = vld [vmem:[%s1790_s7] sm:$0xff] }
 0x352   : > { %1349 = vmatprep.subr.bf16.mxu0 %v1467_v3  ;;  %v670_v13 = vmul.f32 %v1450_v19, %v1442_v62  ;;  %v1278_v62 = vld [vmem:[%s1787_s4] ss:$0 sm:$0xff]  ;;  %v1119_v19 = vld [vmem:[%s1792_s9 + $0x70] sm:$0xff] }
 0x353   : > { %v895_v27 = vpop.permute.xlu0 %894 }
 0x354   : > { %1340 = vmatmul.mubr.msk.bf16.vlgmr.msra.gmra.mxu0 %vm500_vm2, %v559_v18  ;;  %v671_v21 = vpack.c.bf16 %v670_v13, %v670_v13  ;;  %v900_v29 = vsel %vm565_vm3, %v895_v27, 0  ;;  %v1052_v18 = vpack.c.bf16 %v1048_v17, %v1047_v16  ;;  %v1117_v13 = vld [vmem:[%s1792_s9 + $0x60] sm:$0xff] }
 0x355   : > { %1350 = vmatpush3.bf16.msra.mxu0 %v678_v20  ;;  %1351 = vmatprep.mubr.msk.bf16.mxu0 %vm1468_vm0, %v1467_v3  ;;  %v1120_v20 = vld [vmem:[%s1792_s9 + $0x78] sm:$0xff]  ;;  %v1113_v27 = vld [vmem:[%s1792_s9 + $0x40] sm:$0xff] }
 0x356   : > { %1361 = vmatprep.subr.bf16.mxu0 %v1467_v3  ;;  %v1286_v16 = vld [vmem:[%s1795_s12] ss:$0 sm:$0xff] }
 0x359   : > { %v1452_v22 = vpop.eup %1451 }
 0x35a   : > { %v781_v24 = vmul.f32 %v1452_v22, %v1444_v0  ;;  %v1118_v22 = vld [vmem:[%s1792_s9 + $0x68] sm:$0xff] }
 0x35c   : > { %1352 = vmatmul.mubr.msk.bf16.vlgmr.msra.gmra.mxu0 %vm500_vm2, %v671_v21  ;;  %v782_v28 = vpack.c.bf16 %v781_v24, %v781_v24  ;;  %v1129_v21 = vpack.c.bf16 %v1120_v20, %v1119_v19  ;;  %v1115_v24 = vld [vmem:[%s1792_s9 + $0x50] sm:$0xff] }
 0x35d   : > { %1363 = vmatprep.mubr.msk.bf16.mxu0 %vm1468_vm0, %v1467_v3 }
 0x378   : > { %v890_v23 = vpop.xlane.xlu1 %889 }
 0x379   : > { %1453 = vrcp.f32 %v890_v23  ;;  %v1128_v23 = vpack.c.bf16 %v1118_v22, %v1117_v13 }
 0x37c   : > { %v784_v25 = vpop.permute.xlu1 %783 }
 0x37d   : > { %v789_v26 = vsel %vm565_vm3, %v784_v25, 0  ;;  %v1116_v25 = vld [vmem:[%s1792_s9 + $0x58] sm:$0xff] }
 0x37e   : > { %1362 = vmatpush3.bf16.msra.mxu0 %v789_v26  ;;  %v1127_v26 = vpack.c.bf16 %v1116_v25, %v1115_v24 }
 0x37f   : > { %1373 = vmatprep.subr.bf16.mxu0 %v1467_v3 }
 0x381   : > { %1364 = vmatmul.mubr.msk.bf16.vlgmr.msra.gmra.mxu0 %vm500_vm2, %v782_v28  ;;  %v1114_v28 = vld [vmem:[%s1792_s9 + $0x48] sm:$0xff] }
 0x382   : > { %1374 = vmatpush3.bf16.msra.mxu0 %v900_v29  ;;  %1375 = vmatprep.mubr.msk.bf16.mxu0 %vm1468_vm0, %v1467_v3  ;;  %v1126_v29 = vpack.c.bf16 %v1114_v28, %v1113_v27 }
 0x383   : > { %1387 = vmatprep.subr.bf16.mxu0 %v1467_v3 }
 0x386   : > { %v1454_v30 = vpop.eup %1453 }
 0x387   : > { %v892_v31 = vmul.f32 %v1454_v30, %v1446_v6  ;;  %v1111_v30 = vld [vmem:[%s1792_s9 + $0x30] sm:$0xff] }
 0x389   : > { %v893_v32 = vpack.c.bf16 %v892_v31, %v892_v31  ;;  %v1112_v31 = vld [vmem:[%s1792_s9 + $0x38] sm:$0xff] }
 0x38b   : > { %1376 = vmatmul.mubr.msk.bf16.vlgmr.msra.gmra.mxu0 %vm500_vm2, %v893_v32  ;;  %v1125_v32 = vpack.c.bf16 %v1112_v31, %v1111_v30 }
 0x38c   : > { %1391 = vmatprep.mubr.msk.bf16.mxu0 %vm1468_vm0, %v1467_v3 }
 0x414   : > { %v603_v33 = vpop.f32.mrf.mxu0 }
 0x416   : > { %v1341_v34 = vpop.f32.mrf.mxu0 }
 0x417   : > { %v1110_v34 = vld [vmem:[%s1792_s9 + $0x28] sm:$0xff] }
 0x418   : > { %v606_v35 = vpop.f32.mrf.mxu0 }
 0x41a   : > { %v1342_v36 = vpop.f32.mrf.mxu0 }
 0x41c   : > { %v714_v37 = vpop.f32.mrf.mxu0 }
 0x41d   : > { %943 = vrot.lane.b32.xlu1 %v714_v37, %s1480_s21 }
 0x41e   : > { %v1353_v38 = vpop.f32.mrf.mxu0 }
 0x420   : > { %v717_v39 = vpop.f32.mrf.mxu0 }
 0x422   : > { %v1354_v40 = vpop.f32.mrf.mxu0 }
 0x423   : > { %v1280_v40 = vld [vmem:[%s1788_s5] ss:$0 sm:$0xff] }
 0x441   : > { %v825_v47 = vpop.f32.mrf.mxu0 }
 0x442   : > { %947 = vrot.lane.b32.xlu0 %v825_v47, %s1481_s15  ;;  %v1108_v47 = vld [vmem:[%s1792_s9 + $0x18] sm:$0xff] }
 0x443   : > { %v1365_v48 = vpop.f32.mrf.mxu0 }
 0x444   : > { %v1123_v48 = vpack.c.bf16 %v1108_v47, %v1107_v46 }
 0x445   : > { %v828_v49 = vpop.f32.mrf.mxu0 }
 0x446   : > { %v1105_v49 = vld [vmem:[%s1792_s9] sm:$0xff] }
 0x447   : > { %v1366_v50 = vpop.f32.mrf.mxu0 }
 0x448   : > { %v1106_v50 = vld [vmem:[%s1792_s9 + $0x8] sm:$0xff] }
 0x44b   : > { %v936_v51 = vpop.f32.mrf.mxu0 }
 0x44c   : > { %951 = vrot.lane.b32.xlu1 %v936_v51, %s1482_s16  ;;  %v1122_v51 = vpack.c.bf16 %v1106_v50, %v1105_v49 }
 0x44d   : > { %v1377_v52 = vpop.f32.mrf.mxu0 }
 0x44e   : > { %v1282_v52 = vld [vmem:[%s1791_s8] ss:$0 sm:$0xff] }
 0x44f   : > { %v939_v53 = vpop.f32.mrf.mxu0 }
 0x451   : > { %v1378_v54 = vpop.f32.mrf.mxu0 }
 0x48f   : > { %v944_v55 = vpop.permute.xlu1 %943 }
 0x490   : > { %v954_v57 = vsel %vm500_vm2, %v603_v33, %v944_v55  ;;  %v1109_v33 = vld [vmem:[%s1792_s9 + $0x20] sm:$0xff] }
 0x491   : > { %v1124_v35 = vpack.c.bf16 %v1110_v34, %v1109_v33 }
 0x4b4   : > { %v948_v56 = vpop.permute.xlu0 %947 }
 0x4b5   : > { %v956_v58 = vsel %vm955_vm4, %v954_v57, %v948_v56 }
 0x4be   : > { %v952_v59 = vpop.permute.xlu1 %951 }
 0x4bf   : > { %v958_v60 = vsel %vm957_vm5, %v956_v58, %v952_v59  ;;  %v1284_v59 = vld [vmem:[%s1793_s10] ss:$0 sm:$0xff] }
 0x4c0   : > { %v963_v61 = vpack.c.bf16 %v958_v60, %v958_v60 }
 0x4c2   : > { %1384 = vmatmul.mubr.msk.bf16.vlgmr.msra.gmra.mxu1 %vm452_vm1, %v963_v61 }
 0x4c3   : > { %1411 = vmatprep.mubr.msk.bf16.mxu1 %vm1468_vm0, %v1467_v3  ;;  %1396 = vmatpush3.bf16.msra.mxu1 %v1129_v21 }
 0x4c4   : > { %1397 = vmatprep.subr.bf16.mxu1 %v1467_v3 }
 0x4c7   : > { %1398 = vmatpush3.bf16.msra.mxu1 %v1128_v23 }
 0x4c8   : > { %1399 = vmatprep.subr.bf16.mxu1 %v1467_v3 }
 0x4cb   : > { %1400 = vmatpush3.bf16.msra.mxu1 %v1127_v26 }
 0x4cc   : > { %1401 = vmatprep.subr.bf16.mxu1 %v1467_v3 }
 0x4cf   : > { %1402 = vmatpush3.bf16.msra.mxu1 %v1126_v29 }
 0x4d0   : > { %1403 = vmatprep.subr.bf16.mxu1 %v1467_v3 }
 0x4d3   : > { %1404 = vmatpush3.bf16.msra.mxu1 %v1125_v32 }
 0x4d4   : > { %1405 = vmatprep.subr.bf16.mxu1 %v1467_v3 }
 0x4d7   : > { %1406 = vmatpush3.bf16.msra.mxu1 %v1124_v35 }
 0x4d8   : > { %1407 = vmatprep.subr.bf16.mxu1 %v1467_v3 }
 0x4db   : > { %1408 = vmatpush3.bf16.msra.mxu1 %v1123_v48 }
 0x4dc   : > { %1409 = vmatprep.subr.bf16.mxu1 %v1467_v3 }
 0x4df   : > { %1410 = vmatpush3.bf16.msra.mxu1 %v1122_v51 }
 0x582   : > { %v1010_v63 = vpop.f32.mrf.mxu1 }
 0x583   : > { %v1011_v0 = vadd.f32 %v1278_v62, %v1010_v63 }
 0x584   : > { %v1385_v1 = vpop.f32.mrf.mxu1 }
 0x585   : > { %v1016_v2 = vadd.f32 %v1011_v0, %v1588_v7  ;;  %v1050_v7 = vld [vmem:[%s1790_s7 + $0x18] sm:$0xff] }
 0x586   : > { %v1013_v4 = vpop.f32.mrf.mxu1  ;;  %v1053_v15 = vpack.c.bf16 %v1050_v7, %v1049_v14  ;;  %v1285_v7 = vld [vmem:[%s1794_s11] ss:$0 sm:$0xff] }
 0x587   : > { %v1019_v5 = vsel %vm452_vm1, %v1016_v2, 0.0 }
 0x588   : > { %1020 = vadd.xlane.f32.xlu0 %v1019_v5  ;;  %v1386_v6 = vpop.f32.mrf.mxu1  ;;  %1388 = vmatpush3.bf16.msra.mxu0 %v1053_v15 }
 0x589   : > { %1389 = vmatprep.subr.bf16.mxu0 %v1467_v3 }
 0x58c   : > { %1390 = vmatpush3.bf16.msra.mxu0 %v1052_v18 }
 0x611   : > { %v1021_v8 = vpop.xlane.xlu0 %1020 }
 0x612   : > { %v1023_v9 = vmul.f32 0.03125, %v1021_v8 }
 0x614   : > { %v1024_v10 = vsub.f32 %v1016_v2, %v1023_v9 }
 0x616   : > { %v1025_v11 = vmul.f32 %v1024_v10, %v1024_v10 }
 0x618   : > { %v1026_v12 = vsel %vm452_vm1, %v1025_v11, 0.0 }
 0x619   : > { %1027 = vadd.xlane.f32.xlu1 %v1026_v12 }
 0x6a2   : > { %v1028_v36 = vpop.xlane.xlu1 %1027 }
 0x6a3   : > { %v1029_v37 = vmul.f32 0.03125, %v1028_v36 }
 0x6a5   : > { %v1030_v38 = vadd.f32 1e-05, %v1029_v37 }
 0x6a7   : > { %1455 = vrsqrt.f32 %v1030_v38 }
 0x6b4   : > { %v1456_v39 = vpop.eup %1455 }
 0x6b5   : > { %v1032_v41 = vmul.f32 %v1456_v39, %v1024_v10 }
 0x6b7   : > { %v1039_v43 = vmul.f32 %v1280_v40, %v1032_v41 }
 0x6b9   : > { %v1046_v44 = vadd.f32 %v1281_v42, %v1039_v43 }
 0x6bb   : > { %v1051_v45 = vpack.c.bf16 %v1046_v44, %v1046_v44 }
 0x6bd   : > { %1392 = vmatmul.mubr.msk.bf16.vlgmr.msra.gmra.mxu0 %vm452_vm1, %v1051_v45 }
 0x77d   : > { %v1098_v53 = vpop.f32.mrf.mxu0 }
 0x77e   : > { %v1099_v54 = vadd.f32 %v1282_v52, %v1098_v53 }
 0x77f   : > { %v1393_v55 = vpop.f32.mrf.mxu0 }
 0x780   : > { %v1104_v56 = vmax.f32 %v1099_v54, 0.0 }
 0x781   : > { %v1101_v57 = vpop.f32.mrf.mxu0 }
 0x782   : > { %v1121_v3 = vpack.c.bf16 %v1104_v56, %v1104_v56 }
 0x783   : > { %v1394_v58 = vpop.f32.mrf.mxu0 }
 0x784   : > { %1412 = vmatmul.mubr.bf16.vlgmr.msra.gmra.mxu1 %v1121_v3 }
 0x844   : > { %v1171_v60 = vpop.f32.mrf.mxu1 }
 0x845   : > { %v1172_v61 = vadd.f32 %v1284_v59, %v1171_v60 }
 0x846   : > { %v1413_v62 = vpop.f32.mrf.mxu1 }
 0x847   : > { %v1177_v63 = vadd.f32 %v1172_v61, %v1046_v44 }
 0x848   : > { %v1174_v0 = vpop.f32.mrf.mxu1 }
 0x849   : > { %v1180_v1 = vsel %vm452_vm1, %v1177_v63, 0.0 }
 0x84a   : > { %1181 = vadd.xlane.f32.xlu0 %v1180_v1  ;;  %v1414_v2 = vpop.f32.mrf.mxu1 }
 0x8d3   : > { %v1182_v4 = vpop.xlane.xlu0 %1181 }
 0x8d4   : > { %v1183_v5 = vmul.f32 0.03125, %v1182_v4 }
 0x8d6   : > { %v1184_v6 = vsub.f32 %v1177_v63, %v1183_v5 }
 0x8d8   : > { %v1185_v8 = vmul.f32 %v1184_v6, %v1184_v6 }
 0x8da   : > { %v1186_v9 = vsel %vm452_vm1, %v1185_v8, 0.0 }
 0x8db   : > { %1187 = vadd.xlane.f32.xlu0 %v1186_v9 }
 0x964   : > { %v1188_v10 = vpop.xlane.xlu0 %1187 }
 0x965   : > { %v1189_v11 = vmul.f32 0.03125, %v1188_v10 }
 0x967   : > { %v1190_v12 = vadd.f32 1e-05, %v1189_v11 }
 0x969   : > { %1457 = vrsqrt.f32 %v1190_v12 }
 0x976   : > { %v1458_v14 = vpop.eup %1457 }
 0x977   : > { %v1192_v15 = vmul.f32 %v1458_v14, %v1184_v6 }
 0x979   : > { %v1199_v17 = vmul.f32 %v1285_v7, %v1192_v15 }
 0x97b   : > { %v1206_v18 = vadd.f32 %v1286_v16, %v1199_v17 }
 0x97d   : > { %1207 = vst.msk [vmem:[%s435_s17] sm:$0xff] %vm452_vm1, %v1206_v18 }
 0x97e PF: > { %s23_s25 = sadd.s32 1, %s1465_s25  }
 0x97f   : > { %p20_p4 = scmp.ge.s32.totalorder %s23_s25, 4  }
 0x981   :  { %22 = sbr.rel (!%p20_p4) target bundleno = 1 (0x1), region = 102 }

// kernel: transformer_forward.11
= control target key start
LH: loop header
LB: loop body
LE: loop exit
PB: predicated region body
PF: predicated region fallthrough
CT: control target
= control target key end

     0   :  { %10 = vsyncpa [#allocation3], 0  ;;  %s677_s0 = inlined_call_operand.vmem [shape: f32[2,8,32], index: 0, kind: input, shape index: {}]   ;;  %s678_s1 = inlined_call_operand.vmem [shape: f32[1,32], index: 1, kind: input, shape index: {}]   ;;  %s679_s2 = inlined_call_operand.vmem [shape: f32[1,32], index: 2, kind: input, shape index: {}]   ;;  %s680_s3 = inlined_call_operand.vmem [shape: f32[32,16], index: 3, kind: input, shape index: {}]   ;;  %s681_s4 = inlined_call_operand.vmem [shape: f32[1,16], index: 4, kind: input, shape index: {}]   ;;  %s682_s5 = inlined_call_operand.hbm [shape: f32[2,8,16], index: 5, kind: output, shape index: {}]  }
   0x1   :  { %12 = vsyncpa [#allocation3 + $0x1], 0  ;;  %s563_s18 = smov 0   ;;  %s565_s19 = smov 0  }
   0x2   :  { %s567_s20 = smov 0   ;;  %s569_s21 = smov 0  }
   0x3 LB: > { %s584_s22 = sadd.s32 4294967295, %s528_s21   ;;  %s396_s23 = sadd.s32 4294967294, %s528_s21   ;;  %s528_s21 = sphi %s569_s21, %s688_s21   ;;  %s524_s20 = sphi %s567_s20, %s687_s20   ;;  %s520_s19 = sphi %s565_s19, %s686_s19   ;;  %s516_s18 = sphi %s563_s18, %s685_s18  }
   0x4   : > { %s588_s24 = sadd.s32 1, %s528_s21   ;;  %s135_s25 = sadd.s32 1, %s524_s20 }
   0x5   : > { %s132_s26 = ssub.s32 %s528_s21, %s588_s24  ;;  %p145_p0 = scmp.ne.s32.totalorder %s524_s20, %s520_s19 }
   0x6   : > { %p133_p1 = scmp.eq.s32.totalorder %s132_s26, 0  ;;  %p146_p2 = scmp.eq.s32.totalorder %s584_s22, 1 }
   0x7   : > { %p151_p3 = scmp.ne.s32.totalorder %s520_s19, %s516_s18  ;;  %p152_p4 = scmp.eq.s32.totalorder %s396_s23, 1 }
   0x8   : > { %s599_s27 = scalar_select %p133_p1, %s524_s20, %s135_s25  }
   0x9   : > { %p601_p5 = por %p146_p2, %p145_p0  ;;  %p605_p6 = por %p152_p4, %p151_p3 }
   0xa   : > { %p399_p7 = scmp.ge.s32.totalorder %s528_s21, 1  ;;  %p189_p8 = scmp.lt.s32.totalorder %s528_s21, 3 }
   0xc   : > { %p190_p9 = pnand %p399_p7, %p189_p8 }
   0xd   : > { %p216_p10 = scmp.lt.s32.totalorder (!%p190_p9), %s584_s22, 1  ;;  %s213_s8 = sand.u32 (!%p190_p9), 1, %s520_s19  }
   0xe   : > { %193 = sbr.rel (%p190_p9) target bundleno = 854 (0x356), region = 40  ;;  %s407_s10 = sshll.u32 (!%p190_p9), %s584_s22, 7 }
   0xf   : > { %s335_s15 = scalar_lea.hbm (!%p190_p9), %s682_s5, %s407_s10  ;;  %s324_s16 = scalar_lea.sflag (!%p190_p9), [#allocation3], %s213_s8 }
  0x10   : > { %s532_s23 = smov (!%p190_p9), [#allocation2]  }
  0x11   : > { %s472_s25 = sshll.u32 (!%p190_p9), %s532_s23, 4  ;;  %s473_s25 = int_to_ptr.vmem [resolvable:$false] %s472_s25 }
  0x13   : > { %s217_s30 = scalar_select %p216_p10, %s584_s22, 1  ;;  %vm224_vm0 = vcmask 261120   ;;  %v255_v7 = vld [vmem:[%s680_s3 + $0x10] sm:$0xff]  ;;  %v256_v8 = vld [vmem:[%s680_s3 + $0x18] sm:$0xff]  ;;  %v253_v9 = vld [vmem:[%s680_s3] sm:$0xff]  ;;  %v530_v10 = vmov 0.0  }
  0x14   : > { %413 = vmatprep.subr.bf16.mxu0 %v530_v10  ;;  %v259_v11 = vpack.c.bf16 %v256_v8, %v255_v7  ;;  %v254_v12 = vld [vmem:[%s680_s3 + $0x8] sm:$0xff]  ;;  %vm531_vm1 = vmmov 0   ;;  %v402_v18 = vld [vmem:[%s678_s1] ss:$0 sm:$0xff]  ;;  %vm310_vm2 = vcmask 130048   ;;  %s474_s22 = scalar_lea.vmem %s473_s25, 256 }
  0x15   : > { %s401_s6 = sshll.u32 %s217_s30, 3  ;;  %417 = vmatprep.mubr.msk.bf16.mxu0 %vm531_vm1, %v530_v10  ;;  %v258_v13 = vpack.c.bf16 %v254_v12, %v253_v9  ;;  %v403_v20 = vld [vmem:[%s679_s2] ss:$0 sm:$0xff] }
  0x16   : > { %s219_s9 = scalar_lea.vmem %s677_s0, %s401_s6  ;;  %414 = vmatpush3.bf16.msra.mxu0 %v259_v11  ;;  %v404_v24 = vld [vmem:[%s681_s4] ss:$0 sm:$0xff] }
  0x17   : > { %v221_v0 = vld [vmem:[%s219_s9] sm:$0xff]  ;;  %415 = vmatprep.subr.bf16.mxu0 %v530_v10  ;;  %s400_s9 = sshll.u32 %s213_s8, 3 }
  0x18   : > { %v225_v1 = vsel %vm224_vm0, %v221_v0, 0.0  ;;  %s215_s11 = scalar_lea.vmem [#allocation2], %s400_s9 }
  0x19   : > { %226 = vadd.xlane.f32.xlu0 %v225_v1  ;;  %s337_s12 = sshll.u32 %s215_s11, 4  ;;  %s338_s12 = int_to_ptr.vmem [resolvable:$true] %s337_s12 }
  0x1a   : > { %416 = vmatpush3.bf16.msra.mxu0 %v258_v13  ;;  %s468_s17 = scalar_lea.vmem %s338_s12, 128  ;;  %p475_p0 = scmp.lt.s32.totalorder %s338_s12, %s473_s25 }
  0x1b   : > { %p469_p11 = scmp.ne.s32.totalorder %s338_s12, %s468_s17  ;;  %p476_p1 = scmp.lt.s32.totalorder %s474_s22, %s468_s17 }
  0x1d   : > { %p470_p12 = pnand %p469_p11, %p601_p5  ;;  %p477_p2 = por %p476_p1, %p475_p0 }
  0x1f   : > { %p471_p13 = pneg %p470_p12 }
  0x21   : > { %p478_p3 = pnand %p477_p2, %p471_p13 }
  0xa2   : > { %v227_v2 = vpop.xlane.xlu0 %226 }
  0xa3   : > { %v229_v3 = vmul.f32 0.03125, %v227_v2 }
  0xa5   : > { %v230_v4 = vsub.f32 %v221_v0, %v229_v3 }
  0xa7   : > { %v231_v5 = vmul.f32 %v230_v4, %v230_v4 }
  0xa9   : > { %v232_v6 = vsel %vm224_vm0, %v231_v5, 0.0 }
  0xaa   : > { %233 = vadd.xlane.f32.xlu0 %v232_v6 }
 0x133   : > { %v234_v14 = vpop.xlane.xlu0 %233 }
 0x134   : > { %v235_v15 = vmul.f32 0.03125, %v234_v14 }
 0x136   : > { %v236_v16 = vadd.f32 1e-05, %v235_v15 }
 0x138   : > { %462 = vrsqrt.f32 %v236_v16 }
 0x145   : > { %v463_v17 = vpop.eup %462 }
 0x146   : > { %v238_v19 = vmul.f32 %v463_v17, %v230_v4 }
 0x148   : > { %v245_v21 = vmul.f32 %v402_v18, %v238_v19 }
 0x14a   : > { %v252_v22 = vadd.f32 %v403_v20, %v245_v21 }
 0x14c   : > { %v257_v23 = vpack.c.bf16 %v252_v22, %v252_v22 }
 0x14e   : > { %418 = vmatmul.mubr.msk.bf16.vlgmr.msra.gmra.mxu0 %vm224_vm0, %v257_v23 }
 0x20e   : > { %v304_v25 = vpop.f32.mrf.mxu0 }
 0x20f   : > { %v305_v26 = vadd.f32 %v404_v24, %v304_v25 }
 0x210   : > { %v419_v27 = vpop.f32.mrf.mxu0 }
 0x211   : > { %v311_v28 = vsel %vm310_vm2, %v305_v26, -inf }
 0x212   : > { %312 = vmax.xlane.f32.xlu1 %v311_v28  ;;  %v307_v29 = vpop.f32.mrf.mxu0 }
 0x214   : > { %v420_v30 = vpop.f32.mrf.mxu0 }
 0x29b   : > { %v313_v31 = vpop.xlane.xlu1 %312 }
 0x29c   : > { %v314_v32 = vsub.f32 %v305_v26, %v313_v31 }
 0x29e   : > { %v315_v33 = vmul.f32 1.442695, %v314_v32 }
 0x2a0   : > { %464 = vpow2.f32 %v315_v33 }
 0x2ad   : > { %v465_v34 = vpop.eup %464 }
 0x2ae   : > { %v317_v35 = vsel %vm310_vm2, %v465_v34, 0.0 }
 0x2af   : > { %318 = vadd.xlane.f32.xlu1 %v317_v35 }
 0x338   : > { %v319_v36 = vpop.xlane.xlu1 %318 }
 0x339   : > { %466 = vrcp.f32 %v319_v36 }
 0x346   : > { %v467_v37 = vpop.eup %466 }
 0x347   : > { %v321_v38 = vmul.f32 %v467_v37, %v465_v34 }
 0x349   : > { %322 = vst.msk [vmem:[%s215_s11] sm:$0xff] %vm310_vm2, %v321_v38 }
 0x34a   : > { %481 = shalt.err (!%p478_p3)
}
 0x34b   : > { %s482_s26 = scalar_lea.hbm %s335_s15, 128  ;;  %s486_s7 = scalar_lea.hbm %s682_s5, 256 }
 0x34c   : > { %p483_p4 = scmp.ne.s32.totalorder %s335_s15, %s482_s26  ;;  %p487_p9 = scmp.lt.s32.totalorder %s335_s15, %s682_s5 }
 0x34d   : > { %p488_p10 = scmp.lt.s32.totalorder %s486_s7, %s482_s26 }
 0x34e   : > { %p484_p7 = pnand %p483_p4, %p601_p5 }
 0x34f   : > { %p489_p11 = por %p488_p10, %p487_p9 }
 0x350   : > { %p485_p8 = pneg %p484_p7 }
 0x352   : > { %p490_p12 = pnand %p489_p11, %p485_p8 }
 0x354   : > { %493 = shalt.err (!%p490_p12)
}
 0x355   : > { %421 = dma.vmem_to_hbm [thread:$0]  (%p601_p5), %s338_s12, 128, %s335_s15, %s324_s16  }
 0x356 PF: > { %p427_p13 = scmp.ge.s32.totalorder %s528_s21, 2  ;;  %s349_s10 = sand.u32 1, %s516_s18  }
 0x357   : > { %s350_s11 = scalar_lea.sflag [#allocation3], %s349_s10 }
 0x358   : > { %p424_p0 = pnand %p427_p13, %p605_p6 }
 0x35a   : > { %p425_p1 = pneg %p424_p0 }
 0x35c   : > { %511 = dma.done.wait (%p425_p1), %s350_s11, 128  }
 0x35d   : > { %513 = vsyncadd (%p425_p1), %s350_s11, 4294967168  ;;  %p15_p2 = scmp.ge.s32.totalorder %s588_s24, 4   ;;  %s685_s18 = smov %s520_s19 }
 0x35e   : > { %s686_s19 = smov %s524_s20  ;;  %s687_s20 = smov %s599_s27 }
 0x35f   : > { %s688_s21 = smov %s588_s24  ;;  %17 = sbr.rel (!%p15_p2) target bundleno = 3 (0x3), region = 75 }
 0x364   :  { %355 = vsyncpa [#allocation3], 1 }
 0x365   :  { %357 = vsyncpa [#allocation3 + $0x1], 1 }

// kernel: transformer_forward.9
= control target key start
LH: loop header
LB: loop body
LE: loop exit
PB: predicated region body
PF: predicated region fallthrough
CT: control target
= control target key end

     0   :  { %s3102_s0 = inlined_call_operand.vmem [shape: f32[2,8,32], index: 0, kind: input, shape index: {}]   ;;  %s3103_s1 = inlined_call_operand.vmem [shape: f32[2,8,32], index: 1, kind: input, shape index: {}]   ;;  %s3104_s2 = inlined_call_operand.vmem [shape: f32[8,8], index: 2, kind: input, shape index: {}]   ;;  %s3105_s3 = inlined_call_operand.vmem [shape: f32[32,96], index: 3, kind: input, shape index: {}]   ;;  %s3106_s4 = inlined_call_operand.vmem [shape: f32[1,96], index: 4, kind: input, shape index: {}]   ;;  %s3107_s5 = inlined_call_operand.vmem [shape: f32[32,32], index: 5, kind: input, shape index: {}]   ;;  %s3108_s6 = inlined_call_operand.vmem [shape: f32[1,32], index: 6, kind: input, shape index: {}]   ;;  %s3109_s7 = inlined_call_operand.vmem [shape: f32[1,32], index: 7, kind: input, shape index: {}]   ;;  %s3110_s8 = inlined_call_operand.vmem [shape: f32[1,32], index: 8, kind: input, shape index: {}]   ;;  %s3111_s9 = inlined_call_operand.vmem [shape: f32[32,32], index: 9, kind: input, shape index: {}]   ;;  %s3112_s10 = inlined_call_operand.vmem [shape: f32[1,32], index: 10, kind: input, shape index: {}]   ;;  %s3113_s11 = inlined_call_operand.vmem [shape: f32[32,64], index: 11, kind: input, shape index: {}]   ;;  %s3114_s12 = inlined_call_operand.vmem [shape: f32[1,64], index: 12, kind: input, shape index: {}]   ;;  %s3115_s13 = inlined_call_operand.vmem [shape: f32[32,32], index: 13, kind: input, shape index: {}]   ;;  %s3116_s14 = inlined_call_operand.vmem [shape: f32[1,32], index: 14, kind: input, shape index: {}]   ;;  %s3117_s15 = inlined_call_operand.vmem [shape: f32[1,32], index: 15, kind: input, shape index: {}]   ;;  %s3118_s16 = inlined_call_operand.vmem [shape: f32[1,32], index: 16, kind: input, shape index: {}]   ;;  %s3119_s17 = inlined_call_operand.vmem [shape: f32[32,128], index: 17, kind: input, shape index: {}]   ;;  %s3120_s18 = inlined_call_operand.vmem [shape: f32[1,128], index: 18, kind: input, shape index: {}]   ;;  %s3121_s19 = inlined_call_operand.vmem [shape: f32[128,32], index: 19, kind: input, shape index: {}]   ;;  %s3122_s20 = inlined_call_operand.vmem [shape: f32[1,32], index: 20, kind: input, shape index: {}]   ;;  %s3123_s21 = inlined_call_operand.vmem [shape: f32[1,32], index: 21, kind: input, shape index: {}]   ;;  %s3124_s22 = inlined_call_operand.vmem [shape: f32[1,32], index: 22, kind: input, shape index: {}]   ;;  %s3125_s23 = inlined_call_operand.vmem [shape: f32[2,8,32], index: 23, kind: output, shape index: {}]  }
   0x1   :  { %3139 = sst [smem:[#allocation2_spill]] %s3102_s0 }
   0x2   :  { %3140 = sst [smem:[#allocation3_spill]] %s3103_s1 }
   0x3   :  { %3141 = sst [smem:[#allocation4_spill]] %s3104_s2 }
   0x4   :  { %3142 = sst [smem:[#allocation5_spill]] %s3105_s3 }
   0x5   :  { %3143 = sst [smem:[#allocation6_spill]] %s3106_s4  ;;  %s2700_s4 = smov 0  }
   0x6   :  { %3144 = sst [smem:[#allocation7_spill]] %s3107_s5 }
   0x7   :  { %3145 = sst [smem:[#allocation8_spill]] %s3108_s6 }
   0x8   :  { %3146 = sst [smem:[#allocation9_spill]] %s3109_s7 }
   0x9 LB: > { %s2226_s30 = sadd.s32 4294967295, %s2562_s4   ;;  %p2230_p0 = scmp.ge.s32.totalorder %s2562_s4, 1  ;;  %s2562_s4 = sphi %s2700_s4, %s33_s4  }
   0xa   : > { %p645_p1 = scmp.lt.s32.totalorder %s2562_s4, 3 }
   0xc   : > { %p646_p2 = pnand %p2230_p0, %p645_p1 }
   0xd   : > { %s3147_s5 = sld [smem:[#allocation5_spill]] (!%p646_p2)  ;;  %p711_p3 = scmp.lt.s32.totalorder (!%p646_p2), %s2226_s30, 1 }
   0xe   : > { %649 = sbr.rel (%p646_p2) target bundleno = 4624 (0x1210), region = 112  ;;  %s3148_s0 = sld [smem:[#allocation2_spill]] (!%p646_p2) }
   0xf   : > { %s3149_s1 = sld [smem:[#allocation6_spill]] (!%p646_p2)  ;;  %s2566_s26 = smov (!%p646_p2), 64  }
  0x10   : > { %s3132_s2 = smov (!%p646_p2), 96   ;;  %s3128_s6 = smov (!%p646_p2), 88  }
  0x11   : > { %s3150_s29 = sld [smem:[#allocation4_spill]] (!%p646_p2)  ;;  %s3129_s3 = smov (!%p646_p2), 72  }
  0x12   : > { %s3135_s25 = smov (!%p646_p2), 104   ;;  %s2576_s27 = smov (!%p646_p2), 40  }
  0x13   : > { %v727_v0 = vld [vmem:[%s3147_s5 + $0x10] sm:$0xff]  ;;  %v728_v1 = vld [vmem:[%s3147_s5 + $0x18] sm:$0xff]  ;;  %v725_v2 = vld [vmem:[%s3147_s5] sm:$0xff]  ;;  %v2564_v3 = vmov 0.0   ;;  %vm2565_vm0 = vmmov 0   ;;  %s3165_s30 = smov (!%p711_p3, %s2226_s30), 1 }
  0x14   : > { %2330 = vmatprep.subr.bf16.mxu1 %v2564_v3  ;;  %v731_v4 = vpack.c.bf16 %v728_v1, %v727_v0  ;;  %v726_v5 = vld [vmem:[%s3147_s5 + $0x8] sm:$0xff]  ;;  %2334 = vmatprep.mubr.msk.bf16.mxu1 %vm2565_vm0, %v2564_v3  ;;  %s2727_s28 = sshll.u32 %s3165_s30, 3  ;;  %vm739_vm1 = vcmask 261120   ;;  %vm788_vm2 = vcmask 64512   ;;  %vm854_vm3 = vcmask 1043456   ;;  %s3137_s30 = smov 112  }
  0x15   : > { %2356 = vmatprep.subr.bf16.mxu0 %v2564_v3  ;;  %2358 = vmatprep.mubr.msk.bf16.mxu0 %vm2565_vm0, %v2564_v3  ;;  %v730_v6 = vpack.c.bf16 %v726_v5, %v725_v2  ;;  %s714_s24 = scalar_lea.vmem %s3148_s0, %s2727_s28  ;;  %v2234_v9 = vld [vmem:[%s3149_s1] ss:$0 sm:$0xff]  ;;  %s2570_s0 = smov 120   ;;  %vm1247_vm4 = vcmask 130048   ;;  %vm1249_vm5 = vcmask 195584  }
  0x16   : > { %2331 = vmatpush3.bf16.msra.mxu1 %v731_v4  ;;  %v2733_v7 = vld [vmem:[%s714_s24] sm:$0xff]  ;;  %s3130_s24 = smov 80   ;;  %s2574_s1 = smov 56  }
  0x17   : > { %2332 = vmatprep.subr.bf16.mxu1 %v2564_v3  ;;  %v729_v8 = vpack.c.bf16 %v2733_v7, %v2733_v7  ;;  %v2762_v21 = vld [vmem:[%s3150_s29] sm:$0xff]  ;;  %s3131_s7 = smov 8   ;;  %s3134_s29 = smov 16  }
  0x1a   : > { %2333 = vmatpush3.bf16.msra.mxu1 %v730_v6 }
  0x1b   : > { %2338 = vmatprep.subr.bf16.mxu1 %v2564_v3 }
  0x1d   : > { %2335 = vmatmul.mubr.msk.bf16.vlgmr.msra.gmra.mxu1 %vm739_vm1, %v729_v8 }
  0x1e   : > { %2340 = vmatprep.mubr.msk.bf16.mxu1 %vm2565_vm0, %v2564_v3 }
  0xdd   : > { %v777_v10 = vpop.f32.mrf.mxu1 }
  0xde   : > { %v778_v11 = vadd.f32 %v2234_v9, %v777_v10 }
  0xdf   : > { %v2336_v12 = vpop.f32.mrf.mxu1 }
  0xe0   : > { %v2744_v13 = vpack.c.bf16 %v778_v11, %v778_v11 }
  0xe1   : > { %v780_v14 = vpop.f32.mrf.mxu1 }
  0xe2   : > { %849 = vrot.lane.b32.xlu1 %v2744_v13, %s2566_s26  ;;  %786 = vrot.lane.b32.xlu0 %v2744_v13, %s3132_s2  ;;  %s2575_s26 = smov 48   ;;  %s3160_s2 = smov 88  }
  0xe3   : > { %v2337_v15 = vpop.f32.mrf.mxu1 }
  0xe6   : > { %900 = vrot.lane.b32.xlu1 %v2744_v13, %s3128_s6  ;;  %s3133_s6 = smov 24  }
 0x154   : > { %v787_v16 = vpop.permute.xlu0 %786  ;;  %v850_v18 = vpop.permute.xlu1 %849 }
 0x155   : > { %v793_v17 = vsel %vm788_vm2, %v787_v16, 0  ;;  %v856_v19 = vsel %vm854_vm3, %v850_v18, 0 }
 0x156   : > { %2339 = vmatpush3.bf16.xpose.msra.mxu1 %v793_v17 }
 0x157   : > { %2344 = vmatprep.subr.bf16.mxu1 %v2564_v3 }
 0x158   : > { %v901_v33 = vpop.permute.xlu1 %900 }
 0x159   : > { %v906_v39 = vsel %vm788_vm2, %v901_v33, 0 }
 0x15d   : > { %2341 = vmatmul.mubr.msk.bf16.vlgmr.msra.gmra.mxu1 %vm788_vm2, %v2744_v13 }
 0x15e   : > { %2345 = vmatpush3.bf16.msra.mxu1 %v856_v19  ;;  %2346 = vmatprep.mubr.msk.bf16.mxu1 %vm2565_vm0, %v2564_v3 }
 0x15f   : > { %2350 = vmatprep.subr.bf16.mxu1 %v2564_v3 }
 0x21d   : > { %v829_v20 = vpop.f32.mrf.mxu1 }
 0x21e   : > { %v835_v22 = vmul.f32 0.35355338, %v829_v20 }
 0x21f   : > { %v2342_v23 = vpop.f32.mrf.mxu1 }
 0x220   : > { %v836_v24 = vadd.f32 %v835_v22, %v2762_v21 }
 0x221   : > { %v832_v25 = vpop.f32.mrf.mxu1 }
 0x222   : > { %v837_v26 = vsel %vm788_vm2, %v836_v24, -inf }
 0x223   : > { %838 = vmax.xlane.f32.xlu0 %v837_v26  ;;  %v2343_v27 = vpop.f32.mrf.mxu1 }
 0x239   : > { %1124 = vrot.lane.b32.xlu0 %v2744_v13, %s3129_s3  ;;  %s3155_s3 = smov 112  }
 0x2ac   : > { %v839_v28 = vpop.xlane.xlu0 %838 }
 0x2ad   : > { %v840_v29 = vsub.f32 %v836_v24, %v839_v28 }
 0x2af   : > { %v841_v30 = vmul.f32 1.442695, %v840_v29 }
 0x2b0   : > { %v1125_v42 = vpop.permute.xlu0 %1124 }
 0x2b1   : > { %2518 = vpow2.f32 %v841_v30  ;;  %v1130_v44 = vsel %vm788_vm2, %v1125_v42, 0 }
 0x2be   : > { %v2519_v31 = vpop.eup %2518 }
 0x2bf   : > { %v843_v32 = vsel %vm788_vm2, %v2519_v31, 0.0 }
 0x2c0   : > { %844 = vadd.xlane.f32.xlu1 %v843_v32 }
 0x2d1   : > { %898 = vrot.lane.b32.xlu1 %v2744_v13, %s2570_s0 }
 0x2d5   : > { %1012 = vrot.lane.b32.xlu1 %v2744_v13, %s3130_s24  ;;  %s3152_s24 = sld [smem:[#allocation8_spill]] }
 0x2d9   : > { %1010 = vrot.lane.b32.xlu1 %v2744_v13, %s3137_s30 }
 0x2dd   : > { %1122 = vrot.lane.b32.xlu1 %v2744_v13, %s3135_s25 }
 0x349   : > { %v845_v34 = vpop.xlane.xlu1 %844 }
 0x34a   : > { %2520 = vrcp.f32 %v845_v34 }
 0x34d   : > { %v899_v38 = vpop.permute.xlu1 %898 }
 0x351   : > { %v1013_v40 = vpop.permute.xlu1 %1012 }
 0x352   : > { %v1018_v41 = vsel %vm788_vm2, %v1013_v40, 0 }
 0x355   : > { %v1011_v43 = vpop.permute.xlu1 %1010 }
 0x357   : > { %v2521_v35 = vpop.eup %2520 }
 0x358   : > { %v847_v36 = vmul.f32 %v2521_v35, %v2519_v31 }
 0x359   : > { %v1123_v45 = vpop.permute.xlu1 %1122 }
 0x35a   : > { %v848_v37 = vpack.c.bf16 %v847_v36, %v847_v36 }
 0x35c   : > { %2347 = vmatmul.mubr.msk.bf16.vlgmr.msra.gmra.mxu1 %vm788_vm2, %v848_v37 }
 0x35d   : > { %2351 = vmatpush3.bf16.xpose.msra.mxu1 %v906_v39  ;;  %2352 = vmatprep.mubr.msk.bf16.mxu1 %vm2565_vm0, %v2564_v3 }
 0x35e   : > { %2362 = vmatprep.subr.bf16.mxu1 %v2564_v3 }
 0x364   : > { %2353 = vmatmul.mubr.msk.bf16.vlgmr.msra.gmra.mxu1 %vm788_vm2, %v899_v38 }
 0x365   : > { %2363 = vmatpush3.bf16.xpose.msra.mxu1 %v1018_v41  ;;  %2364 = vmatprep.mubr.msk.bf16.mxu1 %vm2565_vm0, %v2564_v3 }
 0x366   : > { %2374 = vmatprep.subr.bf16.mxu1 %v2564_v3 }
 0x36c   : > { %2365 = vmatmul.mubr.msk.bf16.vlgmr.msra.gmra.mxu1 %vm788_vm2, %v1011_v43 }
 0x36d   : > { %2375 = vmatpush3.bf16.xpose.msra.mxu1 %v1130_v44  ;;  %2376 = vmatprep.mubr.msk.bf16.mxu1 %vm2565_vm0, %v2564_v3 }
 0x36e   : > { %2386 = vmatprep.subr.bf16.mxu1 %v2564_v3 }
 0x374   : > { %2377 = vmatmul.mubr.msk.bf16.vlgmr.msra.gmra.mxu1 %vm788_vm2, %v1123_v45 }
 0x375   : > { %2390 = vmatprep.mubr.msk.bf16.mxu1 %vm2565_vm0, %v2564_v3 }
 0x41c   : > { %v2795_v46 = vpop.f32.mrf.mxu1 }
 0x41e   : > { %v2348_v47 = vpop.f32.mrf.mxu1 }
 0x420   : > { %v895_v48 = vpop.f32.mrf.mxu1 }
 0x422   : > { %v2349_v49 = vpop.f32.mrf.mxu1 }
 0x424   : > { %v942_v50 = vpop.f32.mrf.mxu1 }
 0x425   : > { %v948_v51 = vmul.f32 0.35355338, %v942_v50 }
 0x426   : > { %v2354_v52 = vpop.f32.mrf.mxu1 }
 0x427   : > { %v949_v53 = vadd.f32 %v948_v51, %v2762_v21 }
 0x428   : > { %v945_v54 = vpop.f32.mrf.mxu1 }
 0x429   : > { %v950_v55 = vsel %vm788_vm2, %v949_v53, -inf }
 0x42a   : > { %951 = vmax.xlane.f32.xlu1 %v950_v55  ;;  %v2355_v56 = vpop.f32.mrf.mxu1 }
 0x42c   : > { %v1054_v57 = vpop.f32.mrf.mxu1 }
 0x42d   : > { %v1060_v58 = vmul.f32 0.35355338, %v1054_v57 }
 0x42e   : > { %v2366_v59 = vpop.f32.mrf.mxu1 }
 0x42f   : > { %v1061_v60 = vadd.f32 %v1060_v58, %v2762_v21 }
 0x430   : > { %v1057_v61 = vpop.f32.mrf.mxu1 }
 0x431   : > { %v1062_v62 = vsel %vm788_vm2, %v1061_v60, -inf }
 0x432   : > { %1063 = vmax.xlane.f32.xlu0 %v1062_v62  ;;  %v2367_v63 = vpop.f32.mrf.mxu1 }
 0x434   : > { %v1166_v0 = vpop.f32.mrf.mxu1 }
 0x435   : > { %v1172_v1 = vmul.f32 0.35355338, %v1166_v0 }
 0x436   : > { %v2378_v2 = vpop.f32.mrf.mxu1 }
 0x437   : > { %v1173_v4 = vadd.f32 %v1172_v1, %v2762_v21 }
 0x438   : > { %v1169_v5 = vpop.f32.mrf.mxu1 }
 0x439   : > { %v1174_v6 = vsel %vm788_vm2, %v1173_v4, -inf  ;;  %v2244_v5 = vld [vmem:[%s3152_s24] ss:$0 sm:$0xff] }
 0x43a   : > { %1175 = vmax.xlane.f32.xlu1 %v1174_v6  ;;  %v2379_v8 = vpop.f32.mrf.mxu1 }
 0x4b3   : > { %v952_v9 = vpop.xlane.xlu1 %951 }
 0x4b4   : > { %v953_v10 = vsub.f32 %v949_v53, %v952_v9 }
 0x4b6   : > { %v954_v11 = vmul.f32 1.442695, %v953_v10 }
 0x4b8   : > { %2522 = vpow2.f32 %v954_v11 }
 0x4bb   : > { %v1064_v20 = vpop.xlane.xlu0 %1063 }
 0x4bc   : > { %v1065_v21 = vsub.f32 %v1061_v60, %v1064_v20 }
 0x4be   : > { %v1066_v22 = vmul.f32 1.442695, %v1065_v21  ;;  %v1397_v21 = vld [vmem:[%s3113_s11] sm:$0xff] }
 0x4c3   : > { %v1176_v12 = vpop.xlane.xlu1 %1175 }
 0x4c4   : > { %v1177_v14 = vsub.f32 %v1173_v4, %v1176_v12 }
 0x4c5   : > { %v2523_v15 = vpop.eup %2522 }
 0x4c6   : > { %v1178_v16 = vmul.f32 1.442695, %v1177_v14  ;;  %v956_v17 = vsel %vm788_vm2, %v2523_v15, 0.0 }
 0x4c7   : > { %957 = vadd.xlane.f32.xlu1 %v956_v17 }
 0x4c8   : > { %2524 = vpow2.f32 %v1178_v16 }
 0x4c9   : > { %2526 = vpow2.f32 %v1066_v22  ;;  %v1398_v22 = vld [vmem:[%s3113_s11 + $0x8] sm:$0xff] }
 0x4d5   : > { %v2525_v18 = vpop.eup %2524 }
 0x4d6   : > { %v1180_v19 = vsel %vm788_vm2, %v2525_v18, 0.0  ;;  %v2527_v23 = vpop.eup %2526 }
 0x4d7   : > { %1181 = vadd.xlane.f32.xlu0 %v1180_v19  ;;  %v1068_v24 = vsel %vm788_vm2, %v2527_v23, 0.0  ;;  %v1399_v19 = vld [vmem:[%s3113_s11 + $0x10] sm:$0xff] }
 0x4d8   : > { %962 = vrot.lane.b32.xlu1 %v2744_v13, %s2574_s1  ;;  %s3153_s1 = sld [smem:[#allocation3_spill]] }
 0x4de   : > { %s718_s30 = scalar_lea.vmem %s3153_s1, %s2727_s28  ;;  %s3158_s1 = smov 80  }
 0x4ed   : > { %1074 = vrot.lane.b32.xlu0 %v2744_v13, %s2575_s26  ;;  %s3151_s26 = sld [smem:[#allocation7_spill]] }
 0x4f3   : > { %v1253_v47 = vld [vmem:[%s3151_s26 + $0x10] sm:$0xff]  ;;  %v1254_v48 = vld [vmem:[%s3151_s26 + $0x18] sm:$0xff]  ;;  %v1251_v50 = vld [vmem:[%s3151_s26] sm:$0xff] }
 0x4f4   : > { %v1257_v49 = vpack.c.bf16 %v1254_v48, %v1253_v47  ;;  %v1252_v51 = vld [vmem:[%s3151_s26 + $0x8] sm:$0xff] }
 0x4f5   : > { %v1256_v52 = vpack.c.bf16 %v1252_v51, %v1251_v50  ;;  %v2248_v50 = vld [vmem:[%s3112_s10] ss:$0 sm:$0xff] }
 0x4f6   : > { %2387 = vmatpush3.bf16.msra.mxu1 %v1257_v49 }
 0x4f7   : > { %2388 = vmatprep.subr.bf16.mxu1 %v2564_v3 }
 0x4fa   : > { %2389 = vmatpush3.bf16.msra.mxu1 %v1256_v52 }
 0x4fb   : > { %2402 = vmatprep.subr.bf16.mxu1 %v2564_v3 }
 0x4fc   : > { %1069 = vadd.xlane.f32.xlu1 %v1068_v24  ;;  %v1339_v24 = vld [vmem:[%s718_s30] sm:$0xff]  ;;  %s3156_s30 = smov 104  }
 0x50d   : > { %1186 = vrot.lane.b32.xlu1 %v2744_v13, %s2576_s27  ;;  %s3154_s27 = sld [smem:[#allocation9_spill]] }
 0x550   : > { %v958_v25 = vpop.xlane.xlu1 %957 }
 0x551   : > { %2528 = vrcp.f32 %v958_v25  ;;  %v1401_v25 = vpack.c.bf16 %v1339_v24, %v1339_v24 }
 0x554   : > { %v963_v26 = vpop.permute.xlu1 %962 }
 0x555   : > { %v968_v27 = vsel %vm854_vm3, %v963_v26, 0  ;;  %v1342_v26 = vld [vmem:[%s3111_s9 + $0x10] sm:$0xff] }
 0x556   : > { %2357 = vmatpush3.bf16.msra.mxu0 %v968_v27  ;;  %v1343_v27 = vld [vmem:[%s3111_s9 + $0x18] sm:$0xff] }
 0x557   : > { %2368 = vmatprep.subr.bf16.mxu0 %v2564_v3 }
 0x55e   : > { %v2529_v28 = vpop.eup %2528 }
 0x55f   : > { %v960_v29 = vmul.f32 %v2529_v28, %v2523_v15  ;;  %v1346_v28 = vpack.c.bf16 %v1343_v27, %v1342_v26 }
 0x560   : > { %v1182_v30 = vpop.xlane.xlu0 %1181 }
 0x561   : > { %v961_v31 = vpack.c.bf16 %v960_v29, %v960_v29  ;;  %v1340_v29 = vld [vmem:[%s3111_s9] sm:$0xff] }
 0x563   : > { %2359 = vmatmul.mubr.msk.bf16.vlgmr.msra.gmra.mxu0 %vm788_vm2, %v961_v31 }
 0x564   : > { %v1075_v32 = vpop.permute.xlu0 %1074  ;;  %2370 = vmatprep.mubr.msk.bf16.mxu0 %vm2565_vm0, %v2564_v3 }
 0x565   : > { %v1080_v13 = vsel %vm854_vm3, %v1075_v32, 0 }
 0x566   : > { %2369 = vmatpush3.bf16.msra.mxu0 %v1080_v13 }
 0x567   : > { %2380 = vmatprep.subr.bf16.mxu0 %v2564_v3 }
 0x585   : > { %v1070_v33 = vpop.xlane.xlu1 %1069 }
 0x586   : > { %2530 = vrcp.f32 %v1070_v33 }
 0x587   : > { %2532 = vrcp.f32 %v1182_v30  ;;  %v1341_v30 = vld [vmem:[%s3111_s9 + $0x8] sm:$0xff] }
 0x588   : > { %v1345_v31 = vpack.c.bf16 %v1341_v30, %v1340_v29 }
 0x589   : > { %v1187_v36 = vpop.permute.xlu1 %1186 }
 0x58a   : > { %v1192_v39 = vsel %vm854_vm3, %v1187_v36, 0 }
 0x593   : > { %v2531_v34 = vpop.eup %2530 }
 0x594   : > { %v1072_v35 = vmul.f32 %v2531_v34, %v2527_v23  ;;  %v2533_v38 = vpop.eup %2532  ;;  %v1402_v23 = vpack.c.bf16 %v1398_v22, %v1397_v21 }
 0x595   : > { %v1184_v40 = vmul.f32 %v2533_v38, %v2525_v18 }
 0x596   : > { %v1073_v37 = vpack.c.bf16 %v1072_v35, %v1072_v35  ;;  %v2246_v35 = vld [vmem:[%s3154_s27] ss:$0 sm:$0xff]  ;;  %s3159_s27 = smov 72  }
 0x597   : > { %v1185_v41 = vpack.c.bf16 %v1184_v40, %v1184_v40 }
 0x598   : > { %2371 = vmatmul.mubr.msk.bf16.vlgmr.msra.gmra.mxu0 %vm788_vm2, %v1073_v37  ;;  %v2247_v37 = vld [vmem:[%s3110_s8] ss:$0 sm:$0xff] }
 0x599   : > { %2381 = vmatpush3.bf16.msra.mxu0 %v1192_v39  ;;  %2382 = vmatprep.mubr.msk.bf16.mxu0 %vm2565_vm0, %v2564_v3 }
 0x59a   : > { %2394 = vmatprep.subr.bf16.mxu0 %v2564_v3 }
 0x5a0   : > { %2383 = vmatmul.mubr.msk.bf16.vlgmr.msra.gmra.mxu0 %vm788_vm2, %v1185_v41  ;;  %v2250_v41 = vld [vmem:[%s3114_s12] ss:$0 sm:$0xff] }
 0x5a1   : > { %2398 = vmatprep.mubr.msk.bf16.mxu0 %vm2565_vm0, %v2564_v3  ;;  %2395 = vmatpush3.bf16.msra.mxu0 %v1346_v28 }
 0x5a2   : > { %2396 = vmatprep.subr.bf16.mxu0 %v2564_v3 }
 0x5a5   : > { %2397 = vmatpush3.bf16.msra.mxu0 %v1345_v31 }
 0x5a6   : > { %2410 = vmatprep.subr.bf16.mxu0 %v2564_v3 }
 0x623   : > { %v1004_v42 = vpop.f32.mrf.mxu0 }
 0x624   : > { %1235 = vrot.lane.b32.xlu1 %v1004_v42, %s3131_s7 }
 0x625   : > { %v2360_v43 = vpop.f32.mrf.mxu0 }
 0x627   : > { %v1007_v44 = vpop.f32.mrf.mxu0 }
 0x629   : > { %v2361_v45 = vpop.f32.mrf.mxu0 }
 0x658   : > { %v1116_v53 = vpop.f32.mrf.mxu0 }
 0x659   : > { %1239 = vrot.lane.b32.xlu0 %v1116_v53, %s3134_s29 }
 0x65a   : > { %v2372_v54 = vpop.f32.mrf.mxu0 }
 0x65c   : > { %v1119_v55 = vpop.f32.mrf.mxu0 }
 0x65e   : > { %v2373_v56 = vpop.f32.mrf.mxu0 }
 0x660   : > { %v1228_v57 = vpop.f32.mrf.mxu0 }
 0x661   : > { %1243 = vrot.lane.b32.xlu1 %v1228_v57, %s3133_s6  ;;  %s722_s6 = scalar_lea.vmem %s3125_s23, %s2727_s28 }
 0x662   : > { %v2384_v58 = vpop.f32.mrf.mxu0 }
 0x664   : > { %v1231_v59 = vpop.f32.mrf.mxu0 }
 0x666   : > { %v2385_v60 = vpop.f32.mrf.mxu0 }
 0x696   : > { %v1236_v61 = vpop.permute.xlu1 %1235 }
 0x697   : > { %v1246_v63 = vsel %vm788_vm2, %v2795_v46, %v1236_v61 }
 0x6cb   : > { %v1240_v62 = vpop.permute.xlu0 %1239 }
 0x6cc   : > { %v1248_v0 = vsel %vm1247_vm4, %v1246_v63, %v1240_v62 }
 0x6d3   : > { %v1244_v1 = vpop.permute.xlu1 %1243 }
 0x6d4   : > { %v1250_v2 = vsel %vm1249_vm5, %v1248_v0, %v1244_v1 }
 0x6d5   : > { %v1255_v4 = vpack.c.bf16 %v1250_v2, %v1250_v2 }
 0x6d7   : > { %2391 = vmatmul.mubr.msk.bf16.vlgmr.msra.gmra.mxu1 %vm739_vm1, %v1255_v4 }
 0x6d8   : > { %2406 = vmatprep.mubr.msk.bf16.mxu1 %vm2565_vm0, %v2564_v3 }
 0x797   : > { %v1302_v6 = vpop.f32.mrf.mxu1 }
 0x798   : > { %v1303_v8 = vadd.f32 %v2244_v5, %v1302_v6 }
 0x799   : > { %v2392_v9 = vpop.f32.mrf.mxu1 }
 0x79a   : > { %v1308_v46 = vadd.f32 %v1303_v8, %v2733_v7  ;;  %v1400_v7 = vld [vmem:[%s3113_s11 + $0x18] sm:$0xff] }
 0x79b   : > { %v1305_v10 = vpop.f32.mrf.mxu1  ;;  %v1403_v20 = vpack.c.bf16 %v1400_v7, %v1399_v19 }
 0x79c   : > { %v1311_v11 = vsel %vm739_vm1, %v1308_v46, 0.0 }
 0x79d   : > { %1312 = vadd.xlane.f32.xlu0 %v1311_v11  ;;  %v2393_v12 = vpop.f32.mrf.mxu1  ;;  %2403 = vmatpush3.bf16.msra.mxu1 %v1403_v20 }
 0x79e   : > { %2404 = vmatprep.subr.bf16.mxu1 %v2564_v3 }
 0x7a1   : > { %2405 = vmatpush3.bf16.msra.mxu1 %v1402_v23 }
 0x7a2   : > { %2416 = vmatprep.subr.bf16.mxu1 %v2564_v3 }
 0x7a4   : > { %2407 = vmatmul.mubr.msk.bf16.vlgmr.msra.gmra.mxu1 %vm739_vm1, %v1401_v25 }
 0x7a5   : > { %2418 = vmatprep.mubr.msk.bf16.mxu1 %vm2565_vm0, %v2564_v3 }
 0x826   : > { %v1313_v14 = vpop.xlane.xlu0 %1312 }
 0x827   : > { %v1315_v15 = vmul.f32 0.03125, %v1313_v14 }
 0x829   : > { %v1316_v16 = vsub.f32 %v1308_v46, %v1315_v15 }
 0x82b   : > { %v1317_v17 = vmul.f32 %v1316_v16, %v1316_v16 }
 0x82d   : > { %v1318_v18 = vsel %vm739_vm1, %v1317_v17, 0.0 }
 0x82e   : > { %1319 = vadd.xlane.f32.xlu1 %v1318_v18 }
 0x864   : > { %v1448_v42 = vpop.f32.mrf.mxu1 }
 0x865   : > { %v1449_v43 = vadd.f32 %v2250_v41, %v1448_v42 }
 0x866   : > { %v2408_v44 = vpop.f32.mrf.mxu1 }
 0x867   : > { %v2905_v45 = vpack.c.bf16 %v1449_v43, %v1449_v43 }
 0x868   : > { %v1451_v47 = vpop.f32.mrf.mxu1 }
 0x869   : > { %1567 = vrot.lane.b32.xlu0 %v2905_v45, %s2570_s0  ;;  %v1460_v48 = vsel %vm788_vm2, %v2905_v45, 0 }
 0x86a   : > { %v2409_v49 = vpop.f32.mrf.mxu1 }
 0x86d   : > { %1678 = vrot.lane.b32.xlu0 %v2905_v45, %s3155_s3 }
 0x871   : > { %1789 = vrot.lane.b32.xlu0 %v2905_v45, %s3156_s30 }
 0x8b7   : > { %v1320_v32 = vpop.xlane.xlu1 %1319 }
 0x8b8   : > { %v1321_v13 = vmul.f32 0.03125, %v1320_v32 }
 0x8ba   : > { %v1322_v33 = vadd.f32 1e-05, %v1321_v13 }
 0x8bc   : > { %2534 = vrsqrt.f32 %v1322_v33 }
 0x8c9   : > { %v2535_v34 = vpop.eup %2534 }
 0x8ca   : > { %v1324_v36 = vmul.f32 %v2535_v34, %v1316_v16 }
 0x8cc   : > { %v1331_v38 = vmul.f32 %v2246_v35, %v1324_v36 }
 0x8ce   : > { %v2895_v39 = vadd.f32 %v2247_v37, %v1331_v38 }
 0x8d0   : > { %v1344_v40 = vpack.c.bf16 %v2895_v39, %v2895_v39 }
 0x8d2   : > { %2399 = vmatmul.mubr.msk.bf16.vlgmr.msra.gmra.mxu0 %vm739_vm1, %v1344_v40 }
 0x8d3   : > { %2412 = vmatprep.mubr.msk.bf16.mxu0 %vm2565_vm0, %v2564_v3  ;;  %2411 = vmatpush3.bf16.xpose.msra.mxu0 %v1460_v48 }
 0x8d4   : > { %2422 = vmatprep.subr.bf16.mxu0 %v2564_v3 }
 0x8db   : > { %v1568_v54 = vpop.permute.xlu0 %1567 }
 0x8dc   : > { %v1573_v56 = vsel %vm788_vm2, %v1568_v54, 0 }
 0x8df   : > { %v1679_v59 = vpop.permute.xlu0 %1678 }
 0x8e0   : > { %v1684_v61 = vsel %vm788_vm2, %v1679_v59, 0 }
 0x8e3   : > { %v1790_v62 = vpop.permute.xlu0 %1789 }
 0x8e4   : > { %v1795_v0 = vsel %vm788_vm2, %v1790_v62, 0 }
 0x992   : > { %v1391_v51 = vpop.f32.mrf.mxu0 }
 0x993   : > { %v1392_v52 = vadd.f32 %v2248_v50, %v1391_v51 }
 0x994   : > { %v2400_v53 = vpop.f32.mrf.mxu0 }
 0x995   : > { %v1454_v55 = vpack.c.bf16 %v1392_v52, %v1392_v52 }
 0x996   : > { %v1394_v57 = vpop.f32.mrf.mxu0 }
 0x997   : > { %1565 = vrot.lane.b32.xlu1 %v1454_v55, %s2570_s0  ;;  %2413 = vmatmul.mubr.msk.bf16.vlgmr.msra.gmra.mxu0 %vm788_vm2, %v1454_v55  ;;  %s3157_s0 = smov 96  }
 0x998   : > { %v2401_v58 = vpop.f32.mrf.mxu0  ;;  %2423 = vmatpush3.bf16.xpose.msra.mxu0 %v1573_v56  ;;  %2424 = vmatprep.mubr.msk.bf16.mxu0 %vm2565_vm0, %v2564_v3 }
 0x999   : > { %2434 = vmatprep.subr.bf16.mxu0 %v2564_v3 }
 0x99b   : > { %1676 = vrot.lane.b32.xlu1 %v1454_v55, %s3155_s3 }
 0x99f   : > { %1787 = vrot.lane.b32.xlu1 %v1454_v55, %s3156_s30  ;;  %s3161_s30 = smov 8  }
 0xa09   : > { %v1566_v60 = vpop.permute.xlu1 %1565 }
 0xa0a   : > { %2425 = vmatmul.mubr.msk.bf16.vlgmr.msra.gmra.mxu0 %vm788_vm2, %v1566_v60 }
 0xa0b   : > { %2435 = vmatpush3.bf16.xpose.msra.mxu0 %v1684_v61  ;;  %2436 = vmatprep.mubr.msk.bf16.mxu0 %vm2565_vm0, %v2564_v3 }
 0xa0c   : > { %2446 = vmatprep.subr.bf16.mxu0 %v2564_v3 }
 0xa0d   : > { %v1677_v63 = vpop.permute.xlu1 %1676 }
 0xa11   : > { %v1788_v1 = vpop.permute.xlu1 %1787 }
 0xa12   : > { %2437 = vmatmul.mubr.msk.bf16.vlgmr.msra.gmra.mxu0 %vm788_vm2, %v1677_v63 }
 0xa13   : > { %2447 = vmatpush3.bf16.xpose.msra.mxu0 %v1795_v0  ;;  %2448 = vmatprep.mubr.msk.bf16.mxu0 %vm2565_vm0, %v2564_v3 }
 0xa14   : > { %2458 = vmatprep.subr.bf16.mxu0 %v2564_v3 }
 0xa1a   : > { %2449 = vmatmul.mubr.msk.bf16.vlgmr.msra.gmra.mxu0 %vm788_vm2, %v1788_v1 }
 0xa1b   : > { %2462 = vmatprep.mubr.msk.bf16.mxu0 %vm2565_vm0, %v2564_v3 }
 0xa57   : > { %v1496_v2 = vpop.f32.mrf.mxu0 }
 0xa58   : > { %v1502_v4 = vmul.f32 0.35355338, %v1496_v2 }
 0xa59   : > { %v2414_v5 = vpop.f32.mrf.mxu0 }
 0xa5a   : > { %v1503_v6 = vsel %vm788_vm2, %v1502_v4, -inf }
 0xa5b   : > { %1504 = vmax.xlane.f32.xlu0 %v1503_v6  ;;  %v1499_v8 = vpop.f32.mrf.mxu0 }
 0xa5d   : > { %v2415_v9 = vpop.f32.mrf.mxu0 }
 0xaca   : > { %v1609_v46 = vpop.f32.mrf.mxu0 }
 0xacb   : > { %v1615_v10 = vmul.f32 0.35355338, %v1609_v46 }
 0xacc   : > { %v2426_v11 = vpop.f32.mrf.mxu0 }
 0xacd   : > { %v1616_v12 = vsel %vm788_vm2, %v1615_v10, -inf }
 0xace   : > { %1617 = vmax.xlane.f32.xlu1 %v1616_v12  ;;  %v1612_v14 = vpop.f32.mrf.mxu0 }
 0xacf   : > { %v1915_v14 = vld [vmem:[%s3115_s13 + $0x10] sm:$0xff] }
 0xad0   : > { %v2427_v15 = vpop.f32.mrf.mxu0 }
 0xad1   : > { %v1916_v15 = vld [vmem:[%s3115_s13 + $0x18] sm:$0xff] }
 0xad2   : > { %v1720_v16 = vpop.f32.mrf.mxu0 }
 0xad3   : > { %v1726_v17 = vmul.f32 0.35355338, %v1720_v16  ;;  %v1919_v16 = vpack.c.bf16 %v1916_v15, %v1915_v14 }
 0xad4   : > { %v2438_v18 = vpop.f32.mrf.mxu0 }
 0xad5   : > { %v1727_v19 = vsel %vm788_vm2, %v1726_v17, -inf  ;;  %2459 = vmatpush3.bf16.msra.mxu0 %v1919_v16 }
 0xad6   : > { %1728 = vmax.xlane.f32.xlu0 %v1727_v19  ;;  %v1723_v7 = vpop.f32.mrf.mxu0  ;;  %2460 = vmatprep.subr.bf16.mxu0 %v2564_v3  ;;  %v1913_v19 = vld [vmem:[%s3115_s13] sm:$0xff] }
 0xad7   : > { %v1914_v7 = vld [vmem:[%s3115_s13 + $0x8] sm:$0xff] }
 0xad8   : > { %v2439_v20 = vpop.f32.mrf.mxu0 }
 0xad9   : > { %v1918_v20 = vpack.c.bf16 %v1914_v7, %v1913_v19  ;;  %v2263_v19 = vld [vmem:[%s3118_s16] ss:$0 sm:$0xff] }
 0xada   : > { %v1831_v21 = vpop.f32.mrf.mxu0 }
 0xadb   : > { %v1837_v22 = vmul.f32 0.35355338, %v1831_v21  ;;  %2461 = vmatpush3.bf16.msra.mxu0 %v1918_v20 }
 0xadc   : > { %v2450_v23 = vpop.f32.mrf.mxu0  ;;  %2474 = vmatprep.subr.bf16.mxu0 %v2564_v3 }
 0xadd   : > { %v1838_v24 = vsel %vm788_vm2, %v1837_v22, -inf }
 0xade   : > { %1839 = vmax.xlane.f32.xlu0 %v1838_v24  ;;  %v1834_v25 = vpop.f32.mrf.mxu0 }
 0xae0   : > { %v2451_v26 = vpop.f32.mrf.mxu0 }
 0xae4   : > { %v1505_v27 = vpop.xlane.xlu0 %1504 }
 0xae5   : > { %v1506_v28 = vsub.f32 %v1502_v4, %v1505_v27 }
 0xae7   : > { %v1507_v29 = vmul.f32 1.442695, %v1506_v28 }
 0xae9   : > { %2536 = vpow2.f32 %v1507_v29 }
 0xaf6   : > { %v2537_v30 = vpop.eup %2536 }
 0xaf7   : > { %v1509_v31 = vsel %vm788_vm2, %v2537_v30, 0.0 }
 0xaf8   : > { %1510 = vadd.xlane.f32.xlu1 %v1509_v31 }
 0xb09   : > { %1516 = vrot.lane.b32.xlu1 %v2905_v45, %s3157_s0 }
 0xb57   : > { %v1618_v32 = vpop.xlane.xlu1 %1617 }
 0xb58   : > { %v1619_v13 = vsub.f32 %v1615_v10, %v1618_v32 }
 0xb5a   : > { %v1620_v33 = vmul.f32 1.442695, %v1619_v13 }
 0xb5c   : > { %2538 = vpow2.f32 %v1620_v33 }
 0xb5f   : > { %v1729_v34 = vpop.xlane.xlu0 %1728 }
 0xb60   : > { %v1730_v35 = vsub.f32 %v1726_v17, %v1729_v34 }
 0xb62   : > { %v1731_v36 = vmul.f32 1.442695, %v1730_v35 }
 0xb64   : > { %2540 = vpow2.f32 %v1731_v36 }
 0xb67   : > { %v1840_v37 = vpop.xlane.xlu0 %1839 }
 0xb68   : > { %v1841_v38 = vsub.f32 %v1837_v22, %v1840_v37  ;;  %v2260_v37 = vld [vmem:[%s3116_s14] ss:$0 sm:$0xff] }
 0xb69   : > { %v2539_v40 = vpop.eup %2538 }
 0xb6a   : > { %v1842_v41 = vmul.f32 1.442695, %v1841_v38  ;;  %v1622_v42 = vsel %vm788_vm2, %v2539_v40, 0.0 }
 0xb6b   : > { %1623 = vadd.xlane.f32.xlu0 %v1622_v42 }
 0xb6c   : > { %2542 = vpow2.f32 %v1842_v41 }
 0xb71   : > { %v2541_v43 = vpop.eup %2540 }
 0xb72   : > { %v1733_v44 = vsel %vm788_vm2, %v2541_v43, 0.0 }
 0xb73   : > { %1734 = vadd.xlane.f32.xlu1 %v1733_v44 }
 0xb79   : > { %v2543_v47 = vpop.eup %2542 }
 0xb7a   : > { %v1844_v48 = vsel %vm788_vm2, %v2543_v47, 0.0 }
 0xb7b   : > { %1845 = vadd.xlane.f32.xlu0 %v1844_v48 }
 0xb81   : > { %v1511_v49 = vpop.xlane.xlu1 %1510 }
 0xb82   : > { %2544 = vrcp.f32 %v1511_v49 }
 0xb84   : > { %1739 = vrot.lane.b32.xlu1 %v2905_v45, %s3158_s1 }
 0xb85   : > { %v1517_v50 = vpop.permute.xlu1 %1516 }
 0xb86   : > { %v1522_v51 = vsel %vm854_vm3, %v1517_v50, 0 }
 0xb87   : > { %2417 = vmatpush3.bf16.msra.mxu1 %v1522_v51 }
 0xb88   : > { %1850 = vrot.lane.b32.xlu1 %v2905_v45, %s3159_s27  ;;  %2428 = vmatprep.subr.bf16.mxu1 %v2564_v3  ;;  %s3162_s27 = smov 16  }
 0xb8f   : > { %v2545_v52 = vpop.eup %2544 }
 0xb90   : > { %v1513_v53 = vmul.f32 %v2545_v52, %v2537_v30 }
 0xb91   : > { %1628 = vrot.lane.b32.xlu0 %v2905_v45, %s3160_s2  ;;  %s3163_s2 = smov 24  }
 0xb92   : > { %v1514_v54 = vpack.c.bf16 %v1513_v53, %v1513_v53  ;;  %v2002_v53 = vld [vmem:[%s3119_s17 + $0x10] sm:$0xff] }
 0xb94   : > { %2419 = vmatmul.mubr.msk.bf16.vlgmr.msra.gmra.mxu1 %vm788_vm2, %v1514_v54 }
 0xb95   : > { %2430 = vmatprep.mubr.msk.bf16.mxu1 %vm2565_vm0, %v2564_v3 }
 0xbf4   : > { %v1624_v55 = vpop.xlane.xlu0 %1623 }
 0xbf5   : > { %2546 = vrcp.f32 %v1624_v55  ;;  %v2000_v55 = vld [vmem:[%s3119_s17] sm:$0xff] }
 0xbfc   : > { %v1735_v56 = vpop.xlane.xlu1 %1734 }
 0xbfd   : > { %2548 = vrcp.f32 %v1735_v56  ;;  %v2001_v56 = vld [vmem:[%s3119_s17 + $0x8] sm:$0xff] }
 0xc00   : > { %v1740_v62 = vpop.permute.xlu1 %1739 }
 0xc01   : > { %v1745_v0 = vsel %vm854_vm3, %v1740_v62, 0  ;;  %v2071_v62 = vld [vmem:[%s3121_s19 + $0x68] sm:$0xff] }
 0xc02   : > { %v2547_v57 = vpop.eup %2546 }
 0xc03   : > { %v1626_v59 = vmul.f32 %v2547_v57, %v2539_v40  ;;  %v2005_v57 = vpack.c.bf16 %v2001_v56, %v2000_v55  ;;  %v2268_v55 = vld [vmem:[%s3124_s22] ss:$0 sm:$0xff] }
 0xc04   : > { %v1846_v58 = vpop.xlane.xlu0 %1845  ;;  %v1851_v2 = vpop.permute.xlu1 %1850 }
 0xc05   : > { %2550 = vrcp.f32 %v1846_v58  ;;  %v1627_v45 = vpack.c.bf16 %v1626_v59, %v1626_v59  ;;  %v1856_v6 = vsel %vm854_vm3, %v1851_v2, 0  ;;  %v2072_v58 = vld [vmem:[%s3121_s19 + $0x70] sm:$0xff]  ;;  %v2073_v59 = vld [vmem:[%s3121_s19 + $0x78] sm:$0xff]  ;;  %v2066_v2 = vld [vmem:[%s3121_s19 + $0x40] sm:$0xff] }
 0xc08   : > { %v1629_v60 = vpop.permute.xlu0 %1628 }
 0xc09   : > { %v1634_v61 = vsel %vm854_vm3, %v1629_v60, 0  ;;  %v2070_v60 = vld [vmem:[%s3121_s19 + $0x60] sm:$0xff] }
 0xc0a   : > { %2429 = vmatpush3.bf16.msra.mxu1 %v1634_v61  ;;  %v2549_v63 = vpop.eup %2548  ;;  %v2082_v61 = vpack.c.bf16 %v2073_v59, %v2072_v58 }
 0xc0b   : > { %2440 = vmatprep.subr.bf16.mxu1 %v2564_v3  ;;  %v1737_v1 = vmul.f32 %v2549_v63, %v2541_v43  ;;  %v2068_v63 = vld [vmem:[%s3121_s19 + $0x50] sm:$0xff] }
 0xc0d   : > { %2431 = vmatmul.mubr.msk.bf16.vlgmr.msra.gmra.mxu1 %vm788_vm2, %v1627_v45  ;;  %v1738_v4 = vpack.c.bf16 %v1737_v1, %v1737_v1  ;;  %v2081_v45 = vpack.c.bf16 %v2071_v62, %v2070_v60 }
 0xc0e   : > { %2441 = vmatpush3.bf16.msra.mxu1 %v1745_v0  ;;  %2442 = vmatprep.mubr.msk.bf16.mxu1 %vm2565_vm0, %v2564_v3  ;;  %v2069_v0 = vld [vmem:[%s3121_s19 + $0x58] sm:$0xff] }
 0xc0f   : > { %2452 = vmatprep.subr.bf16.mxu1 %v2564_v3  ;;  %v2080_v1 = vpack.c.bf16 %v2069_v0, %v2068_v63 }
 0xc12   : > { %v2551_v5 = vpop.eup %2550 }
 0xc13   : > { %v1848_v8 = vmul.f32 %v2551_v5, %v2543_v47 }
 0xc15   : > { %2443 = vmatmul.mubr.msk.bf16.vlgmr.msra.gmra.mxu1 %vm788_vm2, %v1738_v4  ;;  %v1849_v9 = vpack.c.bf16 %v1848_v8, %v1848_v8  ;;  %v2067_v4 = vld [vmem:[%s3121_s19 + $0x48] sm:$0xff]  ;;  %v2065_v8 = vld [vmem:[%s3121_s19 + $0x38] sm:$0xff] }
 0xc16   : > { %2453 = vmatpush3.bf16.msra.mxu1 %v1856_v6  ;;  %2454 = vmatprep.mubr.msk.bf16.mxu1 %vm2565_vm0, %v2564_v3  ;;  %v2079_v5 = vpack.c.bf16 %v2067_v4, %v2066_v2  ;;  %v2064_v6 = vld [vmem:[%s3121_s19 + $0x30] sm:$0xff] }
 0xc17   : > { %2466 = vmatprep.subr.bf16.mxu1 %v2564_v3 }
 0xc1d   : > { %2455 = vmatmul.mubr.msk.bf16.vlgmr.msra.gmra.mxu1 %vm788_vm2, %v1849_v9  ;;  %v2078_v9 = vpack.c.bf16 %v2065_v8, %v2064_v6 }
 0xc1e   : > { %2470 = vmatprep.mubr.msk.bf16.mxu1 %vm2565_vm0, %v2564_v3 }
 0xc54   : > { %v1558_v46 = vpop.f32.mrf.mxu1 }
 0xc56   : > { %v2420_v10 = vpop.f32.mrf.mxu1 }
 0xc57   : > { %v2063_v10 = vld [vmem:[%s3121_s19 + $0x28] sm:$0xff] }
 0xc58   : > { %v1561_v11 = vpop.f32.mrf.mxu1 }
 0xc5a   : > { %v2421_v12 = vpop.f32.mrf.mxu1 }
 0xccd   : > { %v1670_v17 = vpop.f32.mrf.mxu1 }
 0xcce   : > { %1899 = vrot.lane.b32.xlu0 %v1670_v17, %s3161_s30  ;;  %v2262_v17 = vld [vmem:[%s3117_s15] ss:$0 sm:$0xff] }
 0xccf   : > { %v2432_v18 = vpop.f32.mrf.mxu1 }
 0xcd1   : > { %v1673_v21 = vpop.f32.mrf.mxu1 }
 0xcd3   : > { %v2433_v22 = vpop.f32.mrf.mxu1 }
 0xcd4   : > { %v2060_v22 = vld [vmem:[%s3121_s19 + $0x10] sm:$0xff] }
 0xcd5   : > { %v1781_v23 = vpop.f32.mrf.mxu1 }
 0xcd6   : > { %1903 = vrot.lane.b32.xlu1 %v1781_v23, %s3162_s27  ;;  %v2061_v23 = vld [vmem:[%s3121_s19 + $0x18] sm:$0xff] }
 0xcd7   : > { %v2444_v24 = vpop.f32.mrf.mxu1 }
 0xcd8   : > { %v2076_v24 = vpack.c.bf16 %v2061_v23, %v2060_v22 }
 0xcd9   : > { %v1784_v25 = vpop.f32.mrf.mxu1 }
 0xcda   : > { %v2058_v25 = vld [vmem:[%s3121_s19] sm:$0xff] }
 0xcdb   : > { %v2445_v26 = vpop.f32.mrf.mxu1 }
 0xcdc   : > { %v2059_v26 = vld [vmem:[%s3121_s19 + $0x8] sm:$0xff] }
 0xcdd   : > { %v1892_v27 = vpop.f32.mrf.mxu1 }
 0xcde   : > { %1907 = vrot.lane.b32.xlu0 %v1892_v27, %s3163_s2  ;;  %v2075_v27 = vpack.c.bf16 %v2059_v26, %v2058_v25 }
 0xcdf   : > { %v2456_v28 = vpop.f32.mrf.mxu1 }
 0xce0   : > { %v2264_v28 = vld [vmem:[%s3120_s18] ss:$0 sm:$0xff] }
 0xce1   : > { %v1895_v29 = vpop.f32.mrf.mxu1 }
 0xce3   : > { %v2457_v30 = vpop.f32.mrf.mxu1 }
 0xd40   : > { %v1900_v31 = vpop.permute.xlu0 %1899 }
 0xd41   : > { %v1910_v13 = vsel %vm788_vm2, %v1558_v46, %v1900_v31  ;;  %v2062_v46 = vld [vmem:[%s3121_s19 + $0x20] sm:$0xff] }
 0xd42   : > { %v2077_v11 = vpack.c.bf16 %v2063_v10, %v2062_v46 }
 0xd48   : > { %v1904_v32 = vpop.permute.xlu1 %1903 }
 0xd49   : > { %v1911_v33 = vsel %vm1247_vm4, %v1910_v13, %v1904_v32 }
 0xd50   : > { %v1908_v34 = vpop.permute.xlu0 %1907 }
 0xd51   : > { %v1912_v35 = vsel %vm1249_vm5, %v1911_v33, %v1908_v34  ;;  %v2266_v34 = vld [vmem:[%s3122_s20] ss:$0 sm:$0xff] }
 0xd52   : > { %v1917_v36 = vpack.c.bf16 %v1912_v35, %v1912_v35 }
 0xd54   : > { %2463 = vmatmul.mubr.msk.bf16.vlgmr.msra.gmra.mxu0 %vm739_vm1, %v1917_v36 }
 0xd55   : > { %2490 = vmatprep.mubr.msk.bf16.mxu0 %vm2565_vm0, %v2564_v3  ;;  %2475 = vmatpush3.bf16.msra.mxu0 %v2082_v61 }
 0xd56   : > { %2476 = vmatprep.subr.bf16.mxu0 %v2564_v3 }
 0xd59   : > { %2477 = vmatpush3.bf16.msra.mxu0 %v2081_v45 }
 0xd5a   : > { %2478 = vmatprep.subr.bf16.mxu0 %v2564_v3 }
 0xd5d   : > { %2479 = vmatpush3.bf16.msra.mxu0 %v2080_v1 }
 0xd5e   : > { %2480 = vmatprep.subr.bf16.mxu0 %v2564_v3 }
 0xd61   : > { %2481 = vmatpush3.bf16.msra.mxu0 %v2079_v5 }
 0xd62   : > { %2482 = vmatprep.subr.bf16.mxu0 %v2564_v3 }
 0xd65   : > { %2483 = vmatpush3.bf16.msra.mxu0 %v2078_v9 }
 0xd66   : > { %2484 = vmatprep.subr.bf16.mxu0 %v2564_v3 }
 0xd69   : > { %2485 = vmatpush3.bf16.msra.mxu0 %v2077_v11 }
 0xd6a   : > { %2486 = vmatprep.subr.bf16.mxu0 %v2564_v3 }
 0xd6d   : > { %2487 = vmatpush3.bf16.msra.mxu0 %v2076_v24 }
 0xd6e   : > { %2488 = vmatprep.subr.bf16.mxu0 %v2564_v3 }
 0xd71   : > { %2489 = vmatpush3.bf16.msra.mxu0 %v2075_v27 }
 0xe14   : > { %v1964_v38 = vpop.f32.mrf.mxu0 }
 0xe15   : > { %v1965_v40 = vadd.f32 %v2260_v37, %v1964_v38 }
 0xe16   : > { %v2464_v41 = vpop.f32.mrf.mxu0 }
 0xe17   : > { %v1970_v42 = vadd.f32 %v1965_v40, %v2895_v39  ;;  %v2003_v39 = vld [vmem:[%s3119_s17 + $0x18] sm:$0xff] }
 0xe18   : > { %v1967_v43 = vpop.f32.mrf.mxu0  ;;  %v2006_v54 = vpack.c.bf16 %v2003_v39, %v2002_v53  ;;  %v2267_v39 = vld [vmem:[%s3123_s21] ss:$0 sm:$0xff] }
 0xe19   : > { %v1973_v44 = vsel %vm739_vm1, %v1970_v42, 0.0 }
 0xe1a   : > { %1974 = vadd.xlane.f32.xlu1 %v1973_v44  ;;  %v2465_v47 = vpop.f32.mrf.mxu0  ;;  %2467 = vmatpush3.bf16.msra.mxu1 %v2006_v54 }
 0xe1b   : > { %2468 = vmatprep.subr.bf16.mxu1 %v2564_v3 }
 0xe1e   : > { %2469 = vmatpush3.bf16.msra.mxu1 %v2005_v57 }
 0xea3   : > { %v1975_v48 = vpop.xlane.xlu1 %1974 }
 0xea4   : > { %v1976_v49 = vmul.f32 0.03125, %v1975_v48 }
 0xea6   : > { %v1977_v50 = vsub.f32 %v1970_v42, %v1976_v49 }
 0xea8   : > { %v1978_v51 = vmul.f32 %v1977_v50, %v1977_v50 }
 0xeaa   : > { %v1979_v52 = vsel %vm739_vm1, %v1978_v51, 0.0 }
 0xeab   : > { %1980 = vadd.xlane.f32.xlu0 %v1979_v52 }
 0xf34   : > { %v1981_v12 = vpop.xlane.xlu0 %1980 }
 0xf35   : > { %v1982_v14 = vmul.f32 0.03125, %v1981_v12 }
 0xf37   : > { %v1983_v15 = vadd.f32 1e-05, %v1982_v14 }
 0xf39   : > { %2552 = vrsqrt.f32 %v1983_v15 }
 0xf46   : > { %v2553_v16 = vpop.eup %2552 }
 0xf47   : > { %v1985_v18 = vmul.f32 %v2553_v16, %v1977_v50 }
 0xf49   : > { %v1992_v7 = vmul.f32 %v2262_v17, %v1985_v18 }
 0xf4b   : > { %v1999_v20 = vadd.f32 %v2263_v19, %v1992_v7 }
 0xf4d   : > { %v2004_v21 = vpack.c.bf16 %v1999_v20, %v1999_v20 }
 0xf4f   : > { %2471 = vmatmul.mubr.msk.bf16.vlgmr.msra.gmra.mxu1 %vm739_vm1, %v2004_v21 }
0x100f   : > { %v2051_v29 = vpop.f32.mrf.mxu1 }
0x1010   : > { %v2052_v30 = vadd.f32 %v2264_v28, %v2051_v29 }
0x1011   : > { %v2472_v31 = vpop.f32.mrf.mxu1 }
0x1012   : > { %v2057_v32 = vmax.f32 %v2052_v30, 0.0 }
0x1013   : > { %v2054_v13 = vpop.f32.mrf.mxu1 }
0x1014   : > { %v2074_v3 = vpack.c.bf16 %v2057_v32, %v2057_v32 }
0x1015   : > { %v2473_v33 = vpop.f32.mrf.mxu1 }
0x1016   : > { %2491 = vmatmul.mubr.bf16.vlgmr.msra.gmra.mxu0 %v2074_v3 }
0x10d6   : > { %v2124_v35 = vpop.f32.mrf.mxu0 }
0x10d7   : > { %v2125_v36 = vadd.f32 %v2266_v34, %v2124_v35 }
0x10d8   : > { %v2492_v37 = vpop.f32.mrf.mxu0 }
0x10d9   : > { %v2130_v38 = vadd.f32 %v2125_v36, %v1999_v20 }
0x10da   : > { %v2127_v40 = vpop.f32.mrf.mxu0 }
0x10db   : > { %v2133_v41 = vsel %vm739_vm1, %v2130_v38, 0.0 }
0x10dc   : > { %2134 = vadd.xlane.f32.xlu0 %v2133_v41  ;;  %v2493_v42 = vpop.f32.mrf.mxu0 }
0x1165   : > { %v2135_v43 = vpop.xlane.xlu0 %2134 }
0x1166   : > { %v2136_v44 = vmul.f32 0.03125, %v2135_v43 }
0x1168   : > { %v2137_v47 = vsub.f32 %v2130_v38, %v2136_v44 }
0x116a   : > { %v2138_v48 = vmul.f32 %v2137_v47, %v2137_v47 }
0x116c   : > { %v2139_v49 = vsel %vm739_vm1, %v2138_v48, 0.0 }
0x116d   : > { %2140 = vadd.xlane.f32.xlu1 %v2139_v49 }
0x11f6   : > { %v2141_v50 = vpop.xlane.xlu1 %2140 }
0x11f7   : > { %v2142_v51 = vmul.f32 0.03125, %v2141_v50 }
0x11f9   : > { %v2143_v52 = vadd.f32 1e-05, %v2142_v51 }
0x11fb   : > { %2554 = vrsqrt.f32 %v2143_v52 }
0x1208   : > { %v2555_v53 = vpop.eup %2554 }
0x1209   : > { %v2145_v54 = vmul.f32 %v2555_v53, %v2137_v47 }
0x120b   : > { %v2152_v56 = vmul.f32 %v2267_v39, %v2145_v54 }
0x120d   : > { %v2159_v57 = vadd.f32 %v2268_v55, %v2152_v56 }
0x120f   : > { %2160 = vst.msk [vmem:[%s722_s6] sm:$0xff] %vm739_vm1, %v2159_v57 }
0x1210 PF: > { %s33_s4 = sadd.s32 1, %s2562_s4  }
0x1211   : > { %p30_p4 = scmp.ge.s32.totalorder %s33_s4, 4  }
0x1213   :  { %32 = sbr.rel (!%p30_p4) target bundleno = 9 (0x9), region = 145 }

// kernel: transformer_forward.10
= control target key start
LH: loop header
LB: loop body
LE: loop exit
PB: predicated region body
PF: predicated region fallthrough
CT: control target
= control target key end

     0   :  { %s3349_s0 = inlined_call_operand.vmem [shape: f32[2,8,32], index: 0, kind: input, shape index: {}]   ;;  %s3350_s1 = inlined_call_operand.vmem [shape: f32[2,8,32], index: 1, kind: input, shape index: {}]   ;;  %s3351_s2 = inlined_call_operand.vmem [shape: f32[8,8], index: 2, kind: input, shape index: {}]   ;;  %s3352_s3 = inlined_call_operand.vmem [shape: f32[32,96], index: 3, kind: input, shape index: {}]   ;;  %s3353_s4 = inlined_call_operand.vmem [shape: f32[1,96], index: 4, kind: input, shape index: {}]   ;;  %s3354_s5 = inlined_call_operand.vmem [shape: f32[32,32], index: 5, kind: input, shape index: {}]   ;;  %s3355_s6 = inlined_call_operand.vmem [shape: f32[1,32], index: 6, kind: input, shape index: {}]   ;;  %s3356_s7 = inlined_call_operand.vmem [shape: f32[1,32], index: 7, kind: input, shape index: {}]   ;;  %s3357_s8 = inlined_call_operand.vmem [shape: f32[1,32], index: 8, kind: input, shape index: {}]   ;;  %s3358_s9 = inlined_call_operand.vmem [shape: f32[32,32], index: 9, kind: input, shape index: {}]   ;;  %s3359_s10 = inlined_call_operand.vmem [shape: f32[1,32], index: 10, kind: input, shape index: {}]   ;;  %s3360_s11 = inlined_call_operand.vmem [shape: f32[32,64], index: 11, kind: input, shape index: {}]   ;;  %s3361_s12 = inlined_call_operand.vmem [shape: f32[1,64], index: 12, kind: input, shape index: {}]   ;;  %s3362_s13 = inlined_call_operand.vmem [shape: f32[32,32], index: 13, kind: input, shape index: {}]   ;;  %s3363_s14 = inlined_call_operand.vmem [shape: f32[1,32], index: 14, kind: input, shape index: {}]   ;;  %s3364_s15 = inlined_call_operand.vmem [shape: f32[1,32], index: 15, kind: input, shape index: {}]   ;;  %s3365_s16 = inlined_call_operand.vmem [shape: f32[1,32], index: 16, kind: input, shape index: {}]   ;;  %s3366_s17 = inlined_call_operand.vmem [shape: f32[32,128], index: 17, kind: input, shape index: {}]   ;;  %s3367_s18 = inlined_call_operand.vmem [shape: f32[1,128], index: 18, kind: input, shape index: {}]   ;;  %s3368_s19 = inlined_call_operand.vmem [shape: f32[128,32], index: 19, kind: input, shape index: {}]   ;;  %s3369_s20 = inlined_call_operand.hbm [shape: f32[1,32], index: 20, kind: input, shape index: {}]   ;;  %s3370_s21 = inlined_call_operand.hbm [shape: f32[1,32], index: 21, kind: input, shape index: {}]   ;;  %s3371_s22 = inlined_call_operand.hbm [shape: f32[1,32], index: 22, kind: input, shape index: {}]   ;;  %s3372_s23 = inlined_call_operand.vmem [shape: f32[2,8,32], index: 23, kind: output, shape index: {}]  }
   0x1   :  { %3387 = sst [smem:[#allocation9_spill]] %s3349_s0 }
   0x2   :  { %3388 = sst [smem:[#allocation10_spill]] %s3350_s1 }
   0x3   :  { %3389 = sst [smem:[#allocation11_spill]] %s3351_s2 }
   0x4   :  { %3390 = sst [smem:[#allocation12_spill]] %s3352_s3 }
   0x5   :  { %3391 = sst [smem:[#allocation13_spill]] %s3353_s4 }
   0x6   :  { %3392 = sst [smem:[#allocation14_spill]] %s3354_s5 }
   0x7   :  { %3393 = sst [smem:[#allocation15_spill]] %s3355_s6 }
   0x8   :  { %3394 = sst [smem:[#allocation16_spill]] %s3356_s7 }
   0x9   :  { %28 = vsyncpa [#allocation3], 0 }
   0xa   :  { %29 = vsyncpa [#allocation5], 0  ;;  %s2895_s4 = smov 0  }
   0xb LB: > { %s2901_s30 = sadd.s32 4294967295, %s2754_s4   ;;  %p2297_p0 = scmp.ge.s32.totalorder %s2754_s4, 1  ;;  %s2754_s4 = sphi %s2895_s4, %s35_s4  }
   0xc   : > { %p559_p1 = scmp.lt.s32.totalorder %s2754_s4, 3  ;;  %p3375_p2 = scmp.eq.s32.totalorder %s2901_s30, 0 }
   0xd   : > { %s2756_s25 = smov [#allocation4]   ;;  %s2757_s1 = smov [#allocation2]  }
   0xe   : > { %p2906_p3 = pnand %p2297_p0, %p559_p1  ;;  %s637_s5 = sshll.u32 %s2756_s25, 4  ;;  %s638_s5 = int_to_ptr.vmem [resolvable:$true] %s637_s5 }
   0xf   : > { %s626_s26 = sshll.u32 %s2757_s1, 4  ;;  %s2758_s2 = smov [#allocation6]   ;;  %s627_s26 = int_to_ptr.vmem [resolvable:$true] %s626_s26 }
  0x10   : > { %p2581_p4 = pneg %p2906_p3  ;;  %s648_s6 = sshll.u32 %s2758_s2, 4  ;;  %s2918_s6 = int_to_ptr.vmem [resolvable:$true] %s648_s6 }
  0x11   : > { %s2673_s7 = scalar_lea.vmem %s638_s5, 16  ;;  %s2680_s28 = scalar_lea.vmem %s638_s5, 32 }
  0x12   : > { %p2914_p5 = pnand %p3375_p2, %p2581_p4  ;;  %p2674_p7 = scmp.ne.s32.totalorder %s638_s5, %s2673_s7 }
  0x13   : > { %p2681_p10 = scmp.lt.s32.totalorder %s638_s5, %s638_s5  ;;  %p2682_p11 = scmp.lt.s32.totalorder %s2680_s28, %s2673_s7 }
  0x14   : > { %p2664_p6 = pneg %p2914_p5 }
  0x15   : > { %p2683_p12 = por %p2682_p11, %p2681_p10 }
  0x16   : > { %p2676_p8 = pnand %p2674_p7, %p2664_p6 }
  0x18   : > { %p2677_p9 = pneg %p2676_p8 }
  0x1a   : > { %p2684_p13 = pnand %p2683_p12, %p2677_p9 }
  0x1c   : > { %2687 = shalt.err (!%p2684_p13)
}
  0x1d   : > { %2587 = dma.hbm_to_vmem [thread:$0]  (!%p2914_p5), %s3370_s21, 16, %s638_s5, [#allocation5]  }
  0x1e   : > { %s2699_s0 = scalar_lea.vmem %s627_s26, 16  ;;  %s2706_s25 = scalar_lea.vmem %s627_s26, 32 }
  0x1f   : > { %p2700_p0 = scmp.ne.s32.totalorder %s627_s26, %s2699_s0  ;;  %p2707_p7 = scmp.lt.s32.totalorder %s627_s26, %s627_s26 }
  0x20   : > { %p2708_p8 = scmp.lt.s32.totalorder %s2706_s25, %s2699_s0 }
  0x21   : > { %p2702_p1 = pnand %p2700_p0, %p2664_p6 }
  0x22   : > { %p2709_p2 = por %p2708_p8, %p2707_p7 }
  0x23   : > { %p2703_p4 = pneg %p2702_p1 }
  0x25   : > { %p2710_p10 = pnand %p2709_p2, %p2703_p4 }
  0x27   : > { %2713 = shalt.err (!%p2710_p10)
}
  0x28   : > { %2584 = dma.hbm_to_vmem [thread:$0]  (!%p2914_p5), %s3369_s20, 16, %s627_s26, [#allocation3]  }
  0x29   : > { %s2725_s5 = scalar_lea.vmem %s2918_s6, 16  ;;  %s2732_s7 = scalar_lea.vmem %s2918_s6, 32 }
  0x2a   : > { %p2726_p9 = scmp.ne.s32.totalorder %s2918_s6, %s2725_s5  ;;  %p2733_p2 = scmp.lt.s32.totalorder %s2918_s6, %s2918_s6 }
  0x2b   : > { %p2734_p13 = scmp.lt.s32.totalorder %s2732_s7, %s2725_s5 }
  0x2c   : > { %p2728_p11 = pnand %p2726_p9, %p2664_p6 }
  0x2d   : > { %p2735_p0 = por %p2734_p13, %p2733_p2 }
  0x2e   : > { %p2729_p12 = pneg %p2728_p11 }
  0x30   : > { %p2736_p1 = pnand %p2735_p0, %p2729_p12 }
  0x32   : > { %2739 = shalt.err (!%p2736_p1)
}
  0x33   : > { %2590 = dma.hbm_to_vmem [thread:$0]  (!%p2914_p5), %s3371_s22, 16, %s2918_s6, [#allocation5]  }
  0x34   : > { %675 = sbr.rel (%p2906_p3) target bundleno = 4673 (0x1241), region = 112  ;;  %p3397_p6 = scmp.eq.s32.totalorder (!%p2906_p3), %s2901_s30, 0 }
  0x39   : > { %2745 = dma.done.wait (%p3397_p6), [#allocation3], 16   ;;  %p3398_p4 = pmov %p3397_p6 }
  0x3b   : > { %2747 = vsyncadd (%p3398_p4), [#allocation3], 4294967280  ;;  %p3399_p7 = pmov %p3398_p4 }
  0x3c   : > { %p3400_p8 = pmov %p3398_p4 }
  0x3d   : > { %2749 = dma.done.wait (%p3399_p7), [#allocation5], 32  }
  0x3e   : > { %2751 = vsyncadd (%p3400_p8), [#allocation5], 4294967264  ;;  %p749_p10 = scmp.lt.s32.totalorder %s2901_s30, 1  ;;  %v2759_v0 = vmov 0.0   ;;  %vm2760_vm0 = vmmov 0   ;;  %s3401_s27 = sld [smem:[#allocation12_spill]] }
  0x3f   : > { %2405 = vmatprep.subr.bf16.mxu1 %v2759_v0  ;;  %2409 = vmatprep.mubr.msk.bf16.mxu1 %vm2760_vm0, %v2759_v0  ;;  %s3402_s7 = sld [smem:[#allocation9_spill]]  ;;  %vm777_vm1 = vcmask 261120   ;;  %s2761_s0 = smov 64   ;;  %vm826_vm2 = vcmask 64512   ;;  %vm892_vm3 = vcmask 1043456   ;;  %vm1285_vm4 = vcmask 130048  }
  0x40   : > { %s3419_s30 = smov (!%p749_p10, %s2901_s30), 1  ;;  %2431 = vmatprep.subr.bf16.mxu0 %v2759_v0  ;;  %2433 = vmatprep.mubr.msk.bf16.mxu0 %vm2760_vm0, %v2759_v0  ;;  %s3403_s3 = sld [smem:[#allocation13_spill]]  ;;  %vm1287_vm5 = vcmask 195584  }
  0x41   : > { %s2970_s24 = sshll.u32 %s3419_s30, 3  ;;  %s3380_s25 = smov 96  }
  0x42   : > { %s3376_s1 = smov 88   ;;  %s2765_s30 = smov 120  }
  0x43   : > { %s3378_s29 = smov 80   ;;  %s3385_s26 = smov 112  }
  0x44   : > { %v765_v1 = vld [vmem:[%s3401_s27 + $0x10] sm:$0xff]  ;;  %v766_v2 = vld [vmem:[%s3401_s27 + $0x18] sm:$0xff]  ;;  %v763_v3 = vld [vmem:[%s3401_s27] sm:$0xff]  ;;  %s3383_s6 = smov 104   ;;  %s2771_s2 = smov 40  }
  0x45   : > { %s752_s28 = scalar_lea.vmem %s3402_s7, %s2970_s24  ;;  %v769_v4 = vpack.c.bf16 %v766_v2, %v765_v1  ;;  %v764_v5 = vld [vmem:[%s3401_s27 + $0x8] sm:$0xff]  ;;  %s3404_s7 = sld [smem:[#allocation11_spill]] }
  0x46   : > { %v768_v6 = vpack.c.bf16 %v764_v5, %v763_v3  ;;  %v2988_v7 = vld [vmem:[%s752_s28] sm:$0xff]  ;;  %s3377_s28 = smov 72   ;;  %s3379_s5 = smov 8  }
  0x47   : > { %2406 = vmatpush3.bf16.msra.mxu1 %v769_v4  ;;  %v767_v8 = vpack.c.bf16 %v2988_v7, %v2988_v7  ;;  %v2309_v9 = vld [vmem:[%s3403_s3] ss:$0 sm:$0xff]  ;;  %s2769_s3 = smov 56  }
  0x48   : > { %2407 = vmatprep.subr.bf16.mxu1 %v2759_v0 }
  0x4b   : > { %2408 = vmatpush3.bf16.msra.mxu1 %v768_v6  ;;  %v3018_v21 = vld [vmem:[%s3404_s7] sm:$0xff]  ;;  %s3382_s7 = smov 16  }
  0x4c   : > { %2413 = vmatprep.subr.bf16.mxu1 %v2759_v0 }
  0x4e   : > { %2410 = vmatmul.mubr.msk.bf16.vlgmr.msra.gmra.mxu1 %vm777_vm1, %v767_v8 }
  0x4f   : > { %2415 = vmatprep.mubr.msk.bf16.mxu1 %vm2760_vm0, %v2759_v0 }
 0x10e   : > { %v815_v10 = vpop.f32.mrf.mxu1 }
 0x10f   : > { %v816_v11 = vadd.f32 %v2309_v9, %v815_v10 }
 0x110   : > { %v2411_v12 = vpop.f32.mrf.mxu1 }
 0x111   : > { %v3000_v13 = vpack.c.bf16 %v816_v11, %v816_v11 }
 0x112   : > { %v818_v14 = vpop.f32.mrf.mxu1 }
 0x113   : > { %887 = vrot.lane.b32.xlu1 %v3000_v13, %s2761_s0  ;;  %824 = vrot.lane.b32.xlu0 %v3000_v13, %s3380_s25  ;;  %s2770_s0 = smov 48   ;;  %s3414_s25 = smov 88  }
 0x114   : > { %v2412_v15 = vpop.f32.mrf.mxu1 }
 0x117   : > { %938 = vrot.lane.b32.xlu1 %v3000_v13, %s3376_s1  ;;  %s3381_s1 = smov 24  }
 0x185   : > { %v825_v16 = vpop.permute.xlu0 %824  ;;  %v888_v18 = vpop.permute.xlu1 %887 }
 0x186   : > { %v831_v17 = vsel %vm826_vm2, %v825_v16, 0  ;;  %v894_v19 = vsel %vm892_vm3, %v888_v18, 0 }
 0x187   : > { %2414 = vmatpush3.bf16.xpose.msra.mxu1 %v831_v17 }
 0x188   : > { %2419 = vmatprep.subr.bf16.mxu1 %v2759_v0 }
 0x189   : > { %v939_v33 = vpop.permute.xlu1 %938 }
 0x18a   : > { %v944_v39 = vsel %vm826_vm2, %v939_v33, 0 }
 0x18e   : > { %2416 = vmatmul.mubr.msk.bf16.vlgmr.msra.gmra.mxu1 %vm826_vm2, %v3000_v13 }
 0x18f   : > { %2420 = vmatpush3.bf16.msra.mxu1 %v894_v19  ;;  %2421 = vmatprep.mubr.msk.bf16.mxu1 %vm2760_vm0, %v2759_v0 }
 0x190   : > { %2425 = vmatprep.subr.bf16.mxu1 %v2759_v0 }
 0x24e   : > { %v867_v20 = vpop.f32.mrf.mxu1 }
 0x24f   : > { %v873_v22 = vmul.f32 0.35355338, %v867_v20 }
 0x250   : > { %v2417_v23 = vpop.f32.mrf.mxu1 }
 0x251   : > { %v874_v24 = vadd.f32 %v873_v22, %v3018_v21 }
 0x252   : > { %v870_v25 = vpop.f32.mrf.mxu1 }
 0x253   : > { %v875_v26 = vsel %vm826_vm2, %v874_v24, -inf }
 0x254   : > { %876 = vmax.xlane.f32.xlu0 %v875_v26  ;;  %v2418_v27 = vpop.f32.mrf.mxu1 }
 0x26a   : > { %1162 = vrot.lane.b32.xlu0 %v3000_v13, %s3377_s28  ;;  %s3409_s28 = smov 112  }
 0x2dd   : > { %v877_v28 = vpop.xlane.xlu0 %876 }
 0x2de   : > { %v878_v29 = vsub.f32 %v874_v24, %v877_v28 }
 0x2e0   : > { %v879_v30 = vmul.f32 1.442695, %v878_v29 }
 0x2e1   : > { %v1163_v42 = vpop.permute.xlu0 %1162 }
 0x2e2   : > { %2624 = vpow2.f32 %v879_v30  ;;  %v1168_v44 = vsel %vm826_vm2, %v1163_v42, 0 }
 0x2ef   : > { %v2625_v31 = vpop.eup %2624 }
 0x2f0   : > { %v881_v32 = vsel %vm826_vm2, %v2625_v31, 0.0 }
 0x2f1   : > { %882 = vadd.xlane.f32.xlu1 %v881_v32 }
 0x302   : > { %936 = vrot.lane.b32.xlu1 %v3000_v13, %s2765_s30 }
 0x306   : > { %1050 = vrot.lane.b32.xlu1 %v3000_v13, %s3378_s29  ;;  %s3406_s29 = sld [smem:[#allocation15_spill]] }
 0x30a   : > { %1048 = vrot.lane.b32.xlu1 %v3000_v13, %s3385_s26 }
 0x30e   : > { %1160 = vrot.lane.b32.xlu1 %v3000_v13, %s3383_s6 }
 0x37a   : > { %v883_v34 = vpop.xlane.xlu1 %882 }
 0x37b   : > { %2626 = vrcp.f32 %v883_v34 }
 0x37e   : > { %v937_v38 = vpop.permute.xlu1 %936 }
 0x382   : > { %v1051_v40 = vpop.permute.xlu1 %1050 }
 0x383   : > { %v1056_v41 = vsel %vm826_vm2, %v1051_v40, 0 }
 0x386   : > { %v1049_v43 = vpop.permute.xlu1 %1048 }
 0x388   : > { %v2627_v35 = vpop.eup %2626 }
 0x389   : > { %v885_v36 = vmul.f32 %v2627_v35, %v2625_v31 }
 0x38a   : > { %v1161_v45 = vpop.permute.xlu1 %1160 }
 0x38b   : > { %v886_v37 = vpack.c.bf16 %v885_v36, %v885_v36 }
 0x38d   : > { %2422 = vmatmul.mubr.msk.bf16.vlgmr.msra.gmra.mxu1 %vm826_vm2, %v886_v37 }
 0x38e   : > { %2426 = vmatpush3.bf16.xpose.msra.mxu1 %v944_v39  ;;  %2427 = vmatprep.mubr.msk.bf16.mxu1 %vm2760_vm0, %v2759_v0 }
 0x38f   : > { %2437 = vmatprep.subr.bf16.mxu1 %v2759_v0 }
 0x395   : > { %2428 = vmatmul.mubr.msk.bf16.vlgmr.msra.gmra.mxu1 %vm826_vm2, %v937_v38 }
 0x396   : > { %2438 = vmatpush3.bf16.xpose.msra.mxu1 %v1056_v41  ;;  %2439 = vmatprep.mubr.msk.bf16.mxu1 %vm2760_vm0, %v2759_v0 }
 0x397   : > { %2449 = vmatprep.subr.bf16.mxu1 %v2759_v0 }
 0x39d   : > { %2440 = vmatmul.mubr.msk.bf16.vlgmr.msra.gmra.mxu1 %vm826_vm2, %v1049_v43 }
 0x39e   : > { %2450 = vmatpush3.bf16.xpose.msra.mxu1 %v1168_v44  ;;  %2451 = vmatprep.mubr.msk.bf16.mxu1 %vm2760_vm0, %v2759_v0 }
 0x39f   : > { %2461 = vmatprep.subr.bf16.mxu1 %v2759_v0 }
 0x3a5   : > { %2452 = vmatmul.mubr.msk.bf16.vlgmr.msra.gmra.mxu1 %vm826_vm2, %v1161_v45 }
 0x3a6   : > { %2465 = vmatprep.mubr.msk.bf16.mxu1 %vm2760_vm0, %v2759_v0 }
 0x44d   : > { %v3051_v46 = vpop.f32.mrf.mxu1 }
 0x44f   : > { %v2423_v47 = vpop.f32.mrf.mxu1 }
 0x451   : > { %v933_v48 = vpop.f32.mrf.mxu1 }
 0x453   : > { %v2424_v49 = vpop.f32.mrf.mxu1 }
 0x455   : > { %v980_v50 = vpop.f32.mrf.mxu1 }
 0x456   : > { %v986_v51 = vmul.f32 0.35355338, %v980_v50 }
 0x457   : > { %v2429_v52 = vpop.f32.mrf.mxu1 }
 0x458   : > { %v987_v53 = vadd.f32 %v986_v51, %v3018_v21 }
 0x459   : > { %v983_v54 = vpop.f32.mrf.mxu1 }
 0x45a   : > { %v988_v55 = vsel %vm826_vm2, %v987_v53, -inf }
 0x45b   : > { %989 = vmax.xlane.f32.xlu1 %v988_v55  ;;  %v2430_v56 = vpop.f32.mrf.mxu1 }
 0x45d   : > { %v1092_v57 = vpop.f32.mrf.mxu1 }
 0x45e   : > { %v1098_v58 = vmul.f32 0.35355338, %v1092_v57 }
 0x45f   : > { %v2441_v59 = vpop.f32.mrf.mxu1 }
 0x460   : > { %v1099_v60 = vadd.f32 %v1098_v58, %v3018_v21 }
 0x461   : > { %v1095_v61 = vpop.f32.mrf.mxu1 }
 0x462   : > { %v1100_v62 = vsel %vm826_vm2, %v1099_v60, -inf }
 0x463   : > { %1101 = vmax.xlane.f32.xlu0 %v1100_v62  ;;  %v2442_v63 = vpop.f32.mrf.mxu1 }
 0x465   : > { %v1204_v1 = vpop.f32.mrf.mxu1 }
 0x466   : > { %v1210_v2 = vmul.f32 0.35355338, %v1204_v1 }
 0x467   : > { %v2453_v3 = vpop.f32.mrf.mxu1 }
 0x468   : > { %v1211_v4 = vadd.f32 %v1210_v2, %v3018_v21 }
 0x469   : > { %v1207_v5 = vpop.f32.mrf.mxu1 }
 0x46a   : > { %v1212_v6 = vsel %vm826_vm2, %v1211_v4, -inf  ;;  %v2319_v5 = vld [vmem:[%s3406_s29] ss:$0 sm:$0xff] }
 0x46b   : > { %1213 = vmax.xlane.f32.xlu1 %v1212_v6  ;;  %v2454_v8 = vpop.f32.mrf.mxu1 }
 0x4e4   : > { %v990_v9 = vpop.xlane.xlu1 %989 }
 0x4e5   : > { %v991_v10 = vsub.f32 %v987_v53, %v990_v9 }
 0x4e7   : > { %v992_v11 = vmul.f32 1.442695, %v991_v10 }
 0x4e9   : > { %2628 = vpow2.f32 %v992_v11 }
 0x4ec   : > { %v1102_v20 = vpop.xlane.xlu0 %1101 }
 0x4ed   : > { %v1103_v21 = vsub.f32 %v1099_v60, %v1102_v20 }
 0x4ef   : > { %v1104_v22 = vmul.f32 1.442695, %v1103_v21  ;;  %v1435_v21 = vld [vmem:[%s3360_s11] sm:$0xff] }
 0x4f4   : > { %v1214_v12 = vpop.xlane.xlu1 %1213 }
 0x4f5   : > { %v1215_v14 = vsub.f32 %v1211_v4, %v1214_v12 }
 0x4f6   : > { %v2629_v15 = vpop.eup %2628 }
 0x4f7   : > { %v1216_v16 = vmul.f32 1.442695, %v1215_v14  ;;  %v994_v17 = vsel %vm826_vm2, %v2629_v15, 0.0 }
 0x4f8   : > { %995 = vadd.xlane.f32.xlu1 %v994_v17 }
 0x4f9   : > { %2630 = vpow2.f32 %v1216_v16 }
 0x4fa   : > { %2632 = vpow2.f32 %v1104_v22  ;;  %v1436_v22 = vld [vmem:[%s3360_s11 + $0x8] sm:$0xff] }
 0x506   : > { %v2631_v18 = vpop.eup %2630 }
 0x507   : > { %v1218_v19 = vsel %vm826_vm2, %v2631_v18, 0.0  ;;  %v2633_v23 = vpop.eup %2632 }
 0x508   : > { %1219 = vadd.xlane.f32.xlu0 %v1218_v19  ;;  %v1106_v24 = vsel %vm826_vm2, %v2633_v23, 0.0  ;;  %v1437_v19 = vld [vmem:[%s3360_s11 + $0x10] sm:$0xff] }
 0x509   : > { %1000 = vrot.lane.b32.xlu1 %v3000_v13, %s2769_s3  ;;  %s3407_s3 = sld [smem:[#allocation10_spill]] }
 0x50f   : > { %s756_s26 = scalar_lea.vmem %s3407_s3, %s2970_s24  ;;  %s3412_s3 = smov 80  }
 0x51e   : > { %1112 = vrot.lane.b32.xlu0 %v3000_v13, %s2770_s0  ;;  %s3405_s0 = sld [smem:[#allocation14_spill]] }
 0x524   : > { %v1291_v47 = vld [vmem:[%s3405_s0 + $0x10] sm:$0xff]  ;;  %v1292_v48 = vld [vmem:[%s3405_s0 + $0x18] sm:$0xff]  ;;  %v1289_v50 = vld [vmem:[%s3405_s0] sm:$0xff] }
 0x525   : > { %v1295_v49 = vpack.c.bf16 %v1292_v48, %v1291_v47  ;;  %v1290_v51 = vld [vmem:[%s3405_s0 + $0x8] sm:$0xff] }
 0x526   : > { %v1294_v52 = vpack.c.bf16 %v1290_v51, %v1289_v50  ;;  %v2323_v50 = vld [vmem:[%s3359_s10] ss:$0 sm:$0xff] }
 0x527   : > { %2462 = vmatpush3.bf16.msra.mxu1 %v1295_v49 }
 0x528   : > { %2463 = vmatprep.subr.bf16.mxu1 %v2759_v0 }
 0x52b   : > { %2464 = vmatpush3.bf16.msra.mxu1 %v1294_v52 }
 0x52c   : > { %2477 = vmatprep.subr.bf16.mxu1 %v2759_v0 }
 0x52d   : > { %1107 = vadd.xlane.f32.xlu1 %v1106_v24  ;;  %v1377_v24 = vld [vmem:[%s756_s26] sm:$0xff]  ;;  %s3410_s26 = smov 104  }
 0x53e   : > { %1224 = vrot.lane.b32.xlu1 %v3000_v13, %s2771_s2  ;;  %s3408_s2 = sld [smem:[#allocation16_spill]] }
 0x581   : > { %v996_v25 = vpop.xlane.xlu1 %995 }
 0x582   : > { %2634 = vrcp.f32 %v996_v25  ;;  %v1439_v25 = vpack.c.bf16 %v1377_v24, %v1377_v24 }
 0x585   : > { %v1001_v26 = vpop.permute.xlu1 %1000 }
 0x586   : > { %v1006_v27 = vsel %vm892_vm3, %v1001_v26, 0  ;;  %v1380_v26 = vld [vmem:[%s3358_s9 + $0x10] sm:$0xff] }
 0x587   : > { %2432 = vmatpush3.bf16.msra.mxu0 %v1006_v27  ;;  %v1381_v27 = vld [vmem:[%s3358_s9 + $0x18] sm:$0xff] }
 0x588   : > { %2443 = vmatprep.subr.bf16.mxu0 %v2759_v0 }
 0x58f   : > { %v2635_v28 = vpop.eup %2634 }
 0x590   : > { %v998_v29 = vmul.f32 %v2635_v28, %v2629_v15  ;;  %v1384_v28 = vpack.c.bf16 %v1381_v27, %v1380_v26 }
 0x591   : > { %v1220_v30 = vpop.xlane.xlu0 %1219 }
 0x592   : > { %v999_v31 = vpack.c.bf16 %v998_v29, %v998_v29  ;;  %v1378_v29 = vld [vmem:[%s3358_s9] sm:$0xff] }
 0x594   : > { %2434 = vmatmul.mubr.msk.bf16.vlgmr.msra.gmra.mxu0 %vm826_vm2, %v999_v31 }
 0x595   : > { %v1113_v32 = vpop.permute.xlu0 %1112  ;;  %2445 = vmatprep.mubr.msk.bf16.mxu0 %vm2760_vm0, %v2759_v0 }
 0x596   : > { %v1118_v13 = vsel %vm892_vm3, %v1113_v32, 0 }
 0x597   : > { %2444 = vmatpush3.bf16.msra.mxu0 %v1118_v13 }
 0x598   : > { %2455 = vmatprep.subr.bf16.mxu0 %v2759_v0 }
 0x5b6   : > { %v1108_v33 = vpop.xlane.xlu1 %1107 }
 0x5b7   : > { %2636 = vrcp.f32 %v1108_v33 }
 0x5b8   : > { %2638 = vrcp.f32 %v1220_v30  ;;  %v1379_v30 = vld [vmem:[%s3358_s9 + $0x8] sm:$0xff] }
 0x5b9   : > { %v1383_v31 = vpack.c.bf16 %v1379_v30, %v1378_v29 }
 0x5ba   : > { %v1225_v36 = vpop.permute.xlu1 %1224 }
 0x5bb   : > { %v1230_v39 = vsel %vm892_vm3, %v1225_v36, 0 }
 0x5c4   : > { %v2637_v34 = vpop.eup %2636 }
 0x5c5   : > { %v1110_v35 = vmul.f32 %v2637_v34, %v2633_v23  ;;  %v2639_v38 = vpop.eup %2638  ;;  %v1440_v23 = vpack.c.bf16 %v1436_v22, %v1435_v21 }
 0x5c6   : > { %v1222_v40 = vmul.f32 %v2639_v38, %v2631_v18 }
 0x5c7   : > { %v1111_v37 = vpack.c.bf16 %v1110_v35, %v1110_v35  ;;  %v2321_v35 = vld [vmem:[%s3408_s2] ss:$0 sm:$0xff]  ;;  %s3413_s2 = smov 72  }
 0x5c8   : > { %v1223_v41 = vpack.c.bf16 %v1222_v40, %v1222_v40 }
 0x5c9   : > { %2446 = vmatmul.mubr.msk.bf16.vlgmr.msra.gmra.mxu0 %vm826_vm2, %v1111_v37  ;;  %v2322_v37 = vld [vmem:[%s3357_s8] ss:$0 sm:$0xff] }
 0x5ca   : > { %2456 = vmatpush3.bf16.msra.mxu0 %v1230_v39  ;;  %2457 = vmatprep.mubr.msk.bf16.mxu0 %vm2760_vm0, %v2759_v0 }
 0x5cb   : > { %2469 = vmatprep.subr.bf16.mxu0 %v2759_v0 }
 0x5d1   : > { %2458 = vmatmul.mubr.msk.bf16.vlgmr.msra.gmra.mxu0 %vm826_vm2, %v1223_v41  ;;  %v2325_v41 = vld [vmem:[%s3361_s12] ss:$0 sm:$0xff] }
 0x5d2   : > { %2473 = vmatprep.mubr.msk.bf16.mxu0 %vm2760_vm0, %v2759_v0  ;;  %2470 = vmatpush3.bf16.msra.mxu0 %v1384_v28 }
 0x5d3   : > { %2471 = vmatprep.subr.bf16.mxu0 %v2759_v0 }
 0x5d6   : > { %2472 = vmatpush3.bf16.msra.mxu0 %v1383_v31 }
 0x5d7   : > { %2485 = vmatprep.subr.bf16.mxu0 %v2759_v0 }
 0x654   : > { %v1042_v42 = vpop.f32.mrf.mxu0 }
 0x655   : > { %1273 = vrot.lane.b32.xlu1 %v1042_v42, %s3379_s5  ;;  %s760_s5 = scalar_lea.vmem %s3372_s23, %s2970_s24 }
 0x656   : > { %v2435_v43 = vpop.f32.mrf.mxu0 }
 0x658   : > { %v1045_v44 = vpop.f32.mrf.mxu0 }
 0x65a   : > { %v2436_v45 = vpop.f32.mrf.mxu0 }
 0x689   : > { %v1154_v53 = vpop.f32.mrf.mxu0 }
 0x68a   : > { %1277 = vrot.lane.b32.xlu0 %v1154_v53, %s3382_s7 }
 0x68b   : > { %v2447_v54 = vpop.f32.mrf.mxu0 }
 0x68d   : > { %v1157_v55 = vpop.f32.mrf.mxu0 }
 0x68f   : > { %v2448_v56 = vpop.f32.mrf.mxu0 }
 0x691   : > { %v1266_v57 = vpop.f32.mrf.mxu0 }
 0x692   : > { %1281 = vrot.lane.b32.xlu1 %v1266_v57, %s3381_s1 }
 0x693   : > { %v2459_v58 = vpop.f32.mrf.mxu0 }
 0x695   : > { %v1269_v59 = vpop.f32.mrf.mxu0 }
 0x697   : > { %v2460_v60 = vpop.f32.mrf.mxu0 }
 0x6c7   : > { %v1274_v61 = vpop.permute.xlu1 %1273 }
 0x6c8   : > { %v1284_v63 = vsel %vm826_vm2, %v3051_v46, %v1274_v61 }
 0x6fc   : > { %v1278_v62 = vpop.permute.xlu0 %1277 }
 0x6fd   : > { %v1286_v1 = vsel %vm1285_vm4, %v1284_v63, %v1278_v62 }
 0x704   : > { %v1282_v2 = vpop.permute.xlu1 %1281 }
 0x705   : > { %v1288_v3 = vsel %vm1287_vm5, %v1286_v1, %v1282_v2 }
 0x706   : > { %v1293_v4 = vpack.c.bf16 %v1288_v3, %v1288_v3 }
 0x708   : > { %2466 = vmatmul.mubr.msk.bf16.vlgmr.msra.gmra.mxu1 %vm777_vm1, %v1293_v4 }
 0x709   : > { %2481 = vmatprep.mubr.msk.bf16.mxu1 %vm2760_vm0, %v2759_v0 }
 0x7c8   : > { %v1340_v6 = vpop.f32.mrf.mxu1 }
 0x7c9   : > { %v1341_v8 = vadd.f32 %v2319_v5, %v1340_v6 }
 0x7ca   : > { %v2467_v9 = vpop.f32.mrf.mxu1 }
 0x7cb   : > { %v1346_v46 = vadd.f32 %v1341_v8, %v2988_v7  ;;  %v1438_v7 = vld [vmem:[%s3360_s11 + $0x18] sm:$0xff] }
 0x7cc   : > { %v1343_v10 = vpop.f32.mrf.mxu1  ;;  %v1441_v20 = vpack.c.bf16 %v1438_v7, %v1437_v19 }
 0x7cd   : > { %v1349_v11 = vsel %vm777_vm1, %v1346_v46, 0.0 }
 0x7ce   : > { %1350 = vadd.xlane.f32.xlu0 %v1349_v11  ;;  %v2468_v12 = vpop.f32.mrf.mxu1  ;;  %2478 = vmatpush3.bf16.msra.mxu1 %v1441_v20 }
 0x7cf   : > { %2479 = vmatprep.subr.bf16.mxu1 %v2759_v0 }
 0x7d2   : > { %2480 = vmatpush3.bf16.msra.mxu1 %v1440_v23 }
 0x7d3   : > { %2491 = vmatprep.subr.bf16.mxu1 %v2759_v0 }
 0x7d5   : > { %2482 = vmatmul.mubr.msk.bf16.vlgmr.msra.gmra.mxu1 %vm777_vm1, %v1439_v25 }
 0x7d6   : > { %2493 = vmatprep.mubr.msk.bf16.mxu1 %vm2760_vm0, %v2759_v0 }
 0x857   : > { %v1351_v14 = vpop.xlane.xlu0 %1350 }
 0x858   : > { %v1353_v15 = vmul.f32 0.03125, %v1351_v14 }
 0x85a   : > { %v1354_v16 = vsub.f32 %v1346_v46, %v1353_v15 }
 0x85c   : > { %v1355_v17 = vmul.f32 %v1354_v16, %v1354_v16 }
 0x85e   : > { %v1356_v18 = vsel %vm777_vm1, %v1355_v17, 0.0 }
 0x85f   : > { %1357 = vadd.xlane.f32.xlu1 %v1356_v18 }
 0x895   : > { %v1486_v42 = vpop.f32.mrf.mxu1 }
 0x896   : > { %v1487_v43 = vadd.f32 %v2325_v41, %v1486_v42 }
 0x897   : > { %v2483_v44 = vpop.f32.mrf.mxu1 }
 0x898   : > { %v3161_v45 = vpack.c.bf16 %v1487_v43, %v1487_v43 }
 0x899   : > { %v1489_v47 = vpop.f32.mrf.mxu1 }
 0x89a   : > { %1605 = vrot.lane.b32.xlu0 %v3161_v45, %s2765_s30  ;;  %v1498_v48 = vsel %vm826_vm2, %v3161_v45, 0 }
 0x89b   : > { %v2484_v49 = vpop.f32.mrf.mxu1 }
 0x89e   : > { %1716 = vrot.lane.b32.xlu0 %v3161_v45, %s3409_s28 }
 0x8a2   : > { %1827 = vrot.lane.b32.xlu0 %v3161_v45, %s3410_s26 }
 0x8e8   : > { %v1358_v32 = vpop.xlane.xlu1 %1357 }
 0x8e9   : > { %v1359_v13 = vmul.f32 0.03125, %v1358_v32 }
 0x8eb   : > { %v1360_v33 = vadd.f32 1e-05, %v1359_v13 }
 0x8ed   : > { %2640 = vrsqrt.f32 %v1360_v33 }
 0x8fa   : > { %v2641_v34 = vpop.eup %2640 }
 0x8fb   : > { %v1362_v36 = vmul.f32 %v2641_v34, %v1354_v16 }
 0x8fd   : > { %v1369_v38 = vmul.f32 %v2321_v35, %v1362_v36 }
 0x8ff   : > { %v3151_v39 = vadd.f32 %v2322_v37, %v1369_v38 }
 0x901   : > { %v1382_v40 = vpack.c.bf16 %v3151_v39, %v3151_v39 }
 0x903   : > { %2474 = vmatmul.mubr.msk.bf16.vlgmr.msra.gmra.mxu0 %vm777_vm1, %v1382_v40 }
 0x904   : > { %2487 = vmatprep.mubr.msk.bf16.mxu0 %vm2760_vm0, %v2759_v0  ;;  %2486 = vmatpush3.bf16.xpose.msra.mxu0 %v1498_v48 }
 0x905   : > { %2497 = vmatprep.subr.bf16.mxu0 %v2759_v0 }
 0x90c   : > { %v1606_v54 = vpop.permute.xlu0 %1605 }
 0x90d   : > { %v1611_v56 = vsel %vm826_vm2, %v1606_v54, 0 }
 0x910   : > { %v1717_v59 = vpop.permute.xlu0 %1716 }
 0x911   : > { %v1722_v61 = vsel %vm826_vm2, %v1717_v59, 0 }
 0x914   : > { %v1828_v62 = vpop.permute.xlu0 %1827 }
 0x915   : > { %v1833_v1 = vsel %vm826_vm2, %v1828_v62, 0 }
 0x9c3   : > { %v1429_v51 = vpop.f32.mrf.mxu0 }
 0x9c4   : > { %v1430_v52 = vadd.f32 %v2323_v50, %v1429_v51 }
 0x9c5   : > { %v2475_v53 = vpop.f32.mrf.mxu0 }
 0x9c6   : > { %v1492_v55 = vpack.c.bf16 %v1430_v52, %v1430_v52 }
 0x9c7   : > { %v1432_v57 = vpop.f32.mrf.mxu0 }
 0x9c8   : > { %1603 = vrot.lane.b32.xlu1 %v1492_v55, %s2765_s30  ;;  %2488 = vmatmul.mubr.msk.bf16.vlgmr.msra.gmra.mxu0 %vm826_vm2, %v1492_v55  ;;  %s3411_s30 = smov 96  }
 0x9c9   : > { %v2476_v58 = vpop.f32.mrf.mxu0  ;;  %2498 = vmatpush3.bf16.xpose.msra.mxu0 %v1611_v56  ;;  %2499 = vmatprep.mubr.msk.bf16.mxu0 %vm2760_vm0, %v2759_v0 }
 0x9ca   : > { %2509 = vmatprep.subr.bf16.mxu0 %v2759_v0 }
 0x9cc   : > { %1714 = vrot.lane.b32.xlu1 %v1492_v55, %s3409_s28 }
 0x9d0   : > { %1825 = vrot.lane.b32.xlu1 %v1492_v55, %s3410_s26  ;;  %s3415_s26 = smov 8  }
 0xa3a   : > { %v1604_v60 = vpop.permute.xlu1 %1603 }
 0xa3b   : > { %2500 = vmatmul.mubr.msk.bf16.vlgmr.msra.gmra.mxu0 %vm826_vm2, %v1604_v60 }
 0xa3c   : > { %2510 = vmatpush3.bf16.xpose.msra.mxu0 %v1722_v61  ;;  %2511 = vmatprep.mubr.msk.bf16.mxu0 %vm2760_vm0, %v2759_v0 }
 0xa3d   : > { %2521 = vmatprep.subr.bf16.mxu0 %v2759_v0 }
 0xa3e   : > { %v1715_v63 = vpop.permute.xlu1 %1714 }
 0xa42   : > { %v1826_v2 = vpop.permute.xlu1 %1825 }
 0xa43   : > { %2512 = vmatmul.mubr.msk.bf16.vlgmr.msra.gmra.mxu0 %vm826_vm2, %v1715_v63 }
 0xa44   : > { %2522 = vmatpush3.bf16.xpose.msra.mxu0 %v1833_v1  ;;  %2523 = vmatprep.mubr.msk.bf16.mxu0 %vm2760_vm0, %v2759_v0 }
 0xa45   : > { %2533 = vmatprep.subr.bf16.mxu0 %v2759_v0 }
 0xa4b   : > { %2524 = vmatmul.mubr.msk.bf16.vlgmr.msra.gmra.mxu0 %vm826_vm2, %v1826_v2 }
 0xa4c   : > { %2537 = vmatprep.mubr.msk.bf16.mxu0 %vm2760_vm0, %v2759_v0 }
 0xa88   : > { %v1534_v3 = vpop.f32.mrf.mxu0 }
 0xa89   : > { %v1540_v4 = vmul.f32 0.35355338, %v1534_v3 }
 0xa8a   : > { %v2489_v5 = vpop.f32.mrf.mxu0 }
 0xa8b   : > { %v1541_v6 = vsel %vm826_vm2, %v1540_v4, -inf }
 0xa8c   : > { %1542 = vmax.xlane.f32.xlu0 %v1541_v6  ;;  %v1537_v8 = vpop.f32.mrf.mxu0 }
 0xa8e   : > { %v2490_v9 = vpop.f32.mrf.mxu0 }
 0xafb   : > { %v1647_v46 = vpop.f32.mrf.mxu0 }
 0xafc   : > { %v1653_v10 = vmul.f32 0.35355338, %v1647_v46 }
 0xafd   : > { %v2501_v11 = vpop.f32.mrf.mxu0 }
 0xafe   : > { %v1654_v12 = vsel %vm826_vm2, %v1653_v10, -inf }
 0xaff   : > { %1655 = vmax.xlane.f32.xlu1 %v1654_v12  ;;  %v1650_v14 = vpop.f32.mrf.mxu0 }
 0xb00   : > { %v1953_v14 = vld [vmem:[%s3362_s13 + $0x10] sm:$0xff] }
 0xb01   : > { %v2502_v15 = vpop.f32.mrf.mxu0 }
 0xb02   : > { %v1954_v15 = vld [vmem:[%s3362_s13 + $0x18] sm:$0xff] }
 0xb03   : > { %v1758_v16 = vpop.f32.mrf.mxu0 }
 0xb04   : > { %v1764_v17 = vmul.f32 0.35355338, %v1758_v16  ;;  %v1957_v16 = vpack.c.bf16 %v1954_v15, %v1953_v14 }
 0xb05   : > { %v2513_v18 = vpop.f32.mrf.mxu0 }
 0xb06   : > { %v1765_v19 = vsel %vm826_vm2, %v1764_v17, -inf  ;;  %2534 = vmatpush3.bf16.msra.mxu0 %v1957_v16 }
 0xb07   : > { %1766 = vmax.xlane.f32.xlu0 %v1765_v19  ;;  %v1761_v7 = vpop.f32.mrf.mxu0  ;;  %2535 = vmatprep.subr.bf16.mxu0 %v2759_v0  ;;  %v1951_v19 = vld [vmem:[%s3362_s13] sm:$0xff] }
 0xb08   : > { %v1952_v7 = vld [vmem:[%s3362_s13 + $0x8] sm:$0xff] }
 0xb09   : > { %v2514_v20 = vpop.f32.mrf.mxu0 }
 0xb0a   : > { %v1956_v20 = vpack.c.bf16 %v1952_v7, %v1951_v19  ;;  %v2338_v19 = vld [vmem:[%s3365_s16] ss:$0 sm:$0xff] }
 0xb0b   : > { %v1869_v21 = vpop.f32.mrf.mxu0 }
 0xb0c   : > { %v1875_v22 = vmul.f32 0.35355338, %v1869_v21  ;;  %2536 = vmatpush3.bf16.msra.mxu0 %v1956_v20 }
 0xb0d   : > { %v2525_v23 = vpop.f32.mrf.mxu0  ;;  %2549 = vmatprep.subr.bf16.mxu0 %v2759_v0 }
 0xb0e   : > { %v1876_v24 = vsel %vm826_vm2, %v1875_v22, -inf }
 0xb0f   : > { %1877 = vmax.xlane.f32.xlu0 %v1876_v24  ;;  %v1872_v25 = vpop.f32.mrf.mxu0 }
 0xb11   : > { %v2526_v26 = vpop.f32.mrf.mxu0 }
 0xb15   : > { %v1543_v27 = vpop.xlane.xlu0 %1542 }
 0xb16   : > { %v1544_v28 = vsub.f32 %v1540_v4, %v1543_v27 }
 0xb18   : > { %v1545_v29 = vmul.f32 1.442695, %v1544_v28 }
 0xb1a   : > { %2642 = vpow2.f32 %v1545_v29 }
 0xb27   : > { %v2643_v30 = vpop.eup %2642 }
 0xb28   : > { %v1547_v31 = vsel %vm826_vm2, %v2643_v30, 0.0 }
 0xb29   : > { %1548 = vadd.xlane.f32.xlu1 %v1547_v31 }
 0xb3a   : > { %1554 = vrot.lane.b32.xlu1 %v3161_v45, %s3411_s30 }
 0xb88   : > { %v1656_v32 = vpop.xlane.xlu1 %1655 }
 0xb89   : > { %v1657_v13 = vsub.f32 %v1653_v10, %v1656_v32 }
 0xb8b   : > { %v1658_v33 = vmul.f32 1.442695, %v1657_v13 }
 0xb8d   : > { %2644 = vpow2.f32 %v1658_v33 }
 0xb90   : > { %v1767_v34 = vpop.xlane.xlu0 %1766 }
 0xb91   : > { %v1768_v35 = vsub.f32 %v1764_v17, %v1767_v34 }
 0xb93   : > { %v1769_v36 = vmul.f32 1.442695, %v1768_v35 }
 0xb95   : > { %2646 = vpow2.f32 %v1769_v36 }
 0xb98   : > { %v1878_v37 = vpop.xlane.xlu0 %1877 }
 0xb99   : > { %v1879_v38 = vsub.f32 %v1875_v22, %v1878_v37  ;;  %v2335_v37 = vld [vmem:[%s3363_s14] ss:$0 sm:$0xff] }
 0xb9a   : > { %v2645_v40 = vpop.eup %2644 }
 0xb9b   : > { %v1880_v41 = vmul.f32 1.442695, %v1879_v38  ;;  %v1660_v42 = vsel %vm826_vm2, %v2645_v40, 0.0 }
 0xb9c   : > { %1661 = vadd.xlane.f32.xlu0 %v1660_v42 }
 0xb9d   : > { %2648 = vpow2.f32 %v1880_v41 }
 0xba2   : > { %v2647_v43 = vpop.eup %2646 }
 0xba3   : > { %v1771_v44 = vsel %vm826_vm2, %v2647_v43, 0.0 }
 0xba4   : > { %1772 = vadd.xlane.f32.xlu1 %v1771_v44 }
 0xbaa   : > { %v2649_v47 = vpop.eup %2648 }
 0xbab   : > { %v1882_v48 = vsel %vm826_vm2, %v2649_v47, 0.0 }
 0xbac   : > { %1883 = vadd.xlane.f32.xlu0 %v1882_v48 }
 0xbb2   : > { %v1549_v49 = vpop.xlane.xlu1 %1548 }
 0xbb3   : > { %2650 = vrcp.f32 %v1549_v49 }
 0xbb5   : > { %1777 = vrot.lane.b32.xlu1 %v3161_v45, %s3412_s3 }
 0xbb6   : > { %v1555_v50 = vpop.permute.xlu1 %1554 }
 0xbb7   : > { %v1560_v51 = vsel %vm892_vm3, %v1555_v50, 0 }
 0xbb8   : > { %2492 = vmatpush3.bf16.msra.mxu1 %v1560_v51 }
 0xbb9   : > { %1888 = vrot.lane.b32.xlu1 %v3161_v45, %s3413_s2  ;;  %2503 = vmatprep.subr.bf16.mxu1 %v2759_v0  ;;  %s3416_s2 = smov 16  }
 0xbc0   : > { %v2651_v52 = vpop.eup %2650 }
 0xbc1   : > { %v1551_v53 = vmul.f32 %v2651_v52, %v2643_v30 }
 0xbc2   : > { %1666 = vrot.lane.b32.xlu0 %v3161_v45, %s3414_s25  ;;  %s3417_s25 = smov 24  }
 0xbc3   : > { %v1552_v54 = vpack.c.bf16 %v1551_v53, %v1551_v53  ;;  %v2040_v53 = vld [vmem:[%s3366_s17 + $0x10] sm:$0xff] }
 0xbc5   : > { %2494 = vmatmul.mubr.msk.bf16.vlgmr.msra.gmra.mxu1 %vm826_vm2, %v1552_v54 }
 0xbc6   : > { %2505 = vmatprep.mubr.msk.bf16.mxu1 %vm2760_vm0, %v2759_v0 }
 0xc25   : > { %v1662_v55 = vpop.xlane.xlu0 %1661 }
 0xc26   : > { %2652 = vrcp.f32 %v1662_v55  ;;  %v2038_v55 = vld [vmem:[%s3366_s17] sm:$0xff] }
 0xc2d   : > { %v1773_v56 = vpop.xlane.xlu1 %1772 }
 0xc2e   : > { %2654 = vrcp.f32 %v1773_v56  ;;  %v2039_v56 = vld [vmem:[%s3366_s17 + $0x8] sm:$0xff] }
 0xc31   : > { %v1778_v62 = vpop.permute.xlu1 %1777 }
 0xc32   : > { %v1783_v1 = vsel %vm892_vm3, %v1778_v62, 0  ;;  %v2109_v62 = vld [vmem:[%s3368_s19 + $0x68] sm:$0xff] }
 0xc33   : > { %v2653_v57 = vpop.eup %2652 }
 0xc34   : > { %v1664_v59 = vmul.f32 %v2653_v57, %v2645_v40  ;;  %v2043_v57 = vpack.c.bf16 %v2039_v56, %v2038_v55  ;;  %v2343_v55 = vld [vmem:[#allocation6] ss:$0 sm:$0xff] }
 0xc35   : > { %v1884_v58 = vpop.xlane.xlu0 %1883  ;;  %v1889_v3 = vpop.permute.xlu1 %1888 }
 0xc36   : > { %2656 = vrcp.f32 %v1884_v58  ;;  %v1665_v45 = vpack.c.bf16 %v1664_v59, %v1664_v59  ;;  %v1894_v6 = vsel %vm892_vm3, %v1889_v3, 0  ;;  %v2110_v58 = vld [vmem:[%s3368_s19 + $0x70] sm:$0xff]  ;;  %v2111_v59 = vld [vmem:[%s3368_s19 + $0x78] sm:$0xff]  ;;  %v2104_v3 = vld [vmem:[%s3368_s19 + $0x40] sm:$0xff] }
 0xc39   : > { %v1667_v60 = vpop.permute.xlu0 %1666 }
 0xc3a   : > { %v1672_v61 = vsel %vm892_vm3, %v1667_v60, 0  ;;  %v2108_v60 = vld [vmem:[%s3368_s19 + $0x60] sm:$0xff] }
 0xc3b   : > { %2504 = vmatpush3.bf16.msra.mxu1 %v1672_v61  ;;  %v2655_v63 = vpop.eup %2654  ;;  %v2120_v61 = vpack.c.bf16 %v2111_v59, %v2110_v58 }
 0xc3c   : > { %2515 = vmatprep.subr.bf16.mxu1 %v2759_v0  ;;  %v1775_v2 = vmul.f32 %v2655_v63, %v2647_v43  ;;  %v2106_v63 = vld [vmem:[%s3368_s19 + $0x50] sm:$0xff] }
 0xc3e   : > { %2506 = vmatmul.mubr.msk.bf16.vlgmr.msra.gmra.mxu1 %vm826_vm2, %v1665_v45  ;;  %v1776_v4 = vpack.c.bf16 %v1775_v2, %v1775_v2  ;;  %v2119_v45 = vpack.c.bf16 %v2109_v62, %v2108_v60 }
 0xc3f   : > { %2516 = vmatpush3.bf16.msra.mxu1 %v1783_v1  ;;  %2517 = vmatprep.mubr.msk.bf16.mxu1 %vm2760_vm0, %v2759_v0  ;;  %v2107_v1 = vld [vmem:[%s3368_s19 + $0x58] sm:$0xff] }
 0xc40   : > { %2527 = vmatprep.subr.bf16.mxu1 %v2759_v0  ;;  %v2118_v2 = vpack.c.bf16 %v2107_v1, %v2106_v63 }
 0xc43   : > { %v2657_v5 = vpop.eup %2656 }
 0xc44   : > { %v1886_v8 = vmul.f32 %v2657_v5, %v2649_v47 }
 0xc46   : > { %2518 = vmatmul.mubr.msk.bf16.vlgmr.msra.gmra.mxu1 %vm826_vm2, %v1776_v4  ;;  %v1887_v9 = vpack.c.bf16 %v1886_v8, %v1886_v8  ;;  %v2105_v4 = vld [vmem:[%s3368_s19 + $0x48] sm:$0xff]  ;;  %v2103_v8 = vld [vmem:[%s3368_s19 + $0x38] sm:$0xff] }
 0xc47   : > { %2528 = vmatpush3.bf16.msra.mxu1 %v1894_v6  ;;  %2529 = vmatprep.mubr.msk.bf16.mxu1 %vm2760_vm0, %v2759_v0  ;;  %v2117_v5 = vpack.c.bf16 %v2105_v4, %v2104_v3  ;;  %v2102_v6 = vld [vmem:[%s3368_s19 + $0x30] sm:$0xff] }
 0xc48   : > { %2541 = vmatprep.subr.bf16.mxu1 %v2759_v0 }
 0xc4e   : > { %2530 = vmatmul.mubr.msk.bf16.vlgmr.msra.gmra.mxu1 %vm826_vm2, %v1887_v9  ;;  %v2116_v9 = vpack.c.bf16 %v2103_v8, %v2102_v6 }
 0xc4f   : > { %2545 = vmatprep.mubr.msk.bf16.mxu1 %vm2760_vm0, %v2759_v0 }
 0xc85   : > { %v1596_v46 = vpop.f32.mrf.mxu1 }
 0xc87   : > { %v2495_v10 = vpop.f32.mrf.mxu1 }
 0xc88   : > { %v2101_v10 = vld [vmem:[%s3368_s19 + $0x28] sm:$0xff] }
 0xc89   : > { %v1599_v11 = vpop.f32.mrf.mxu1 }
 0xc8b   : > { %v2496_v12 = vpop.f32.mrf.mxu1 }
 0xcfe   : > { %v1708_v17 = vpop.f32.mrf.mxu1 }
 0xcff   : > { %1937 = vrot.lane.b32.xlu0 %v1708_v17, %s3415_s26  ;;  %v2337_v17 = vld [vmem:[%s3364_s15] ss:$0 sm:$0xff] }
 0xd00   : > { %v2507_v18 = vpop.f32.mrf.mxu1 }
 0xd02   : > { %v1711_v21 = vpop.f32.mrf.mxu1 }
 0xd04   : > { %v2508_v22 = vpop.f32.mrf.mxu1 }
 0xd05   : > { %v2098_v22 = vld [vmem:[%s3368_s19 + $0x10] sm:$0xff] }
 0xd06   : > { %v1819_v23 = vpop.f32.mrf.mxu1 }
 0xd07   : > { %1941 = vrot.lane.b32.xlu1 %v1819_v23, %s3416_s2  ;;  %v2099_v23 = vld [vmem:[%s3368_s19 + $0x18] sm:$0xff] }
 0xd08   : > { %v2519_v24 = vpop.f32.mrf.mxu1 }
 0xd09   : > { %v2114_v24 = vpack.c.bf16 %v2099_v23, %v2098_v22 }
 0xd0a   : > { %v1822_v25 = vpop.f32.mrf.mxu1 }
 0xd0b   : > { %v2096_v25 = vld [vmem:[%s3368_s19] sm:$0xff] }
 0xd0c   : > { %v2520_v26 = vpop.f32.mrf.mxu1 }
 0xd0d   : > { %v2097_v26 = vld [vmem:[%s3368_s19 + $0x8] sm:$0xff] }
 0xd0e   : > { %v1930_v27 = vpop.f32.mrf.mxu1 }
 0xd0f   : > { %1945 = vrot.lane.b32.xlu0 %v1930_v27, %s3417_s25  ;;  %v2113_v27 = vpack.c.bf16 %v2097_v26, %v2096_v25 }
 0xd10   : > { %v2531_v28 = vpop.f32.mrf.mxu1 }
 0xd11   : > { %v2339_v28 = vld [vmem:[%s3367_s18] ss:$0 sm:$0xff] }
 0xd12   : > { %v1933_v29 = vpop.f32.mrf.mxu1 }
 0xd14   : > { %v2532_v30 = vpop.f32.mrf.mxu1 }
 0xd71   : > { %v1938_v31 = vpop.permute.xlu0 %1937 }
 0xd72   : > { %v1948_v13 = vsel %vm826_vm2, %v1596_v46, %v1938_v31  ;;  %v2100_v46 = vld [vmem:[%s3368_s19 + $0x20] sm:$0xff] }
 0xd73   : > { %v2115_v11 = vpack.c.bf16 %v2101_v10, %v2100_v46 }
 0xd79   : > { %v1942_v32 = vpop.permute.xlu1 %1941 }
 0xd7a   : > { %v1949_v33 = vsel %vm1285_vm4, %v1948_v13, %v1942_v32 }
 0xd81   : > { %v1946_v34 = vpop.permute.xlu0 %1945 }
 0xd82   : > { %v1950_v35 = vsel %vm1287_vm5, %v1949_v33, %v1946_v34  ;;  %v2341_v34 = vld [vmem:[#allocation2] ss:$0 sm:$0xff] }
 0xd83   : > { %v1955_v36 = vpack.c.bf16 %v1950_v35, %v1950_v35 }
 0xd85   : > { %2538 = vmatmul.mubr.msk.bf16.vlgmr.msra.gmra.mxu0 %vm777_vm1, %v1955_v36 }
 0xd86   : > { %2565 = vmatprep.mubr.msk.bf16.mxu0 %vm2760_vm0, %v2759_v0  ;;  %2550 = vmatpush3.bf16.msra.mxu0 %v2120_v61 }
 0xd87   : > { %2551 = vmatprep.subr.bf16.mxu0 %v2759_v0 }
 0xd8a   : > { %2552 = vmatpush3.bf16.msra.mxu0 %v2119_v45 }
 0xd8b   : > { %2553 = vmatprep.subr.bf16.mxu0 %v2759_v0 }
 0xd8e   : > { %2554 = vmatpush3.bf16.msra.mxu0 %v2118_v2 }
 0xd8f   : > { %2555 = vmatprep.subr.bf16.mxu0 %v2759_v0 }
 0xd92   : > { %2556 = vmatpush3.bf16.msra.mxu0 %v2117_v5 }
 0xd93   : > { %2557 = vmatprep.subr.bf16.mxu0 %v2759_v0 }
 0xd96   : > { %2558 = vmatpush3.bf16.msra.mxu0 %v2116_v9 }
 0xd97   : > { %2559 = vmatprep.subr.bf16.mxu0 %v2759_v0 }
 0xd9a   : > { %2560 = vmatpush3.bf16.msra.mxu0 %v2115_v11 }
 0xd9b   : > { %2561 = vmatprep.subr.bf16.mxu0 %v2759_v0 }
 0xd9e   : > { %2562 = vmatpush3.bf16.msra.mxu0 %v2114_v24 }
 0xd9f   : > { %2563 = vmatprep.subr.bf16.mxu0 %v2759_v0 }
 0xda2   : > { %2564 = vmatpush3.bf16.msra.mxu0 %v2113_v27 }
 0xe45   : > { %v2002_v38 = vpop.f32.mrf.mxu0 }
 0xe46   : > { %v2003_v40 = vadd.f32 %v2335_v37, %v2002_v38 }
 0xe47   : > { %v2539_v41 = vpop.f32.mrf.mxu0 }
 0xe48   : > { %v2008_v42 = vadd.f32 %v2003_v40, %v3151_v39  ;;  %v2041_v39 = vld [vmem:[%s3366_s17 + $0x18] sm:$0xff] }
 0xe49   : > { %v2005_v43 = vpop.f32.mrf.mxu0  ;;  %v2044_v54 = vpack.c.bf16 %v2041_v39, %v2040_v53  ;;  %v2342_v39 = vld [vmem:[#allocation4] ss:$0 sm:$0xff] }
 0xe4a   : > { %v2011_v44 = vsel %vm777_vm1, %v2008_v42, 0.0 }
 0xe4b   : > { %2012 = vadd.xlane.f32.xlu1 %v2011_v44  ;;  %v2540_v47 = vpop.f32.mrf.mxu0  ;;  %2542 = vmatpush3.bf16.msra.mxu1 %v2044_v54 }
 0xe4c   : > { %2543 = vmatprep.subr.bf16.mxu1 %v2759_v0 }
 0xe4f   : > { %2544 = vmatpush3.bf16.msra.mxu1 %v2043_v57 }
 0xed4   : > { %v2013_v48 = vpop.xlane.xlu1 %2012 }
 0xed5   : > { %v2014_v49 = vmul.f32 0.03125, %v2013_v48 }
 0xed7   : > { %v2015_v50 = vsub.f32 %v2008_v42, %v2014_v49 }
 0xed9   : > { %v2016_v51 = vmul.f32 %v2015_v50, %v2015_v50 }
 0xedb   : > { %v2017_v52 = vsel %vm777_vm1, %v2016_v51, 0.0 }
 0xedc   : > { %2018 = vadd.xlane.f32.xlu0 %v2017_v52 }
 0xf65   : > { %v2019_v12 = vpop.xlane.xlu0 %2018 }
 0xf66   : > { %v2020_v14 = vmul.f32 0.03125, %v2019_v12 }
 0xf68   : > { %v2021_v15 = vadd.f32 1e-05, %v2020_v14 }
 0xf6a   : > { %2658 = vrsqrt.f32 %v2021_v15 }
 0xf77   : > { %v2659_v16 = vpop.eup %2658 }
 0xf78   : > { %v2023_v18 = vmul.f32 %v2659_v16, %v2015_v50 }
 0xf7a   : > { %v2030_v7 = vmul.f32 %v2337_v17, %v2023_v18 }
 0xf7c   : > { %v2037_v20 = vadd.f32 %v2338_v19, %v2030_v7 }
 0xf7e   : > { %v2042_v21 = vpack.c.bf16 %v2037_v20, %v2037_v20 }
 0xf80   : > { %2546 = vmatmul.mubr.msk.bf16.vlgmr.msra.gmra.mxu1 %vm777_vm1, %v2042_v21 }
0x1040   : > { %v2089_v29 = vpop.f32.mrf.mxu1 }
0x1041   : > { %v2090_v30 = vadd.f32 %v2339_v28, %v2089_v29 }
0x1042   : > { %v2547_v31 = vpop.f32.mrf.mxu1 }
0x1043   : > { %v2095_v32 = vmax.f32 %v2090_v30, 0.0 }
0x1044   : > { %v2092_v13 = vpop.f32.mrf.mxu1 }
0x1045   : > { %v2112_v0 = vpack.c.bf16 %v2095_v32, %v2095_v32 }
0x1046   : > { %v2548_v33 = vpop.f32.mrf.mxu1 }
0x1047   : > { %2566 = vmatmul.mubr.bf16.vlgmr.msra.gmra.mxu0 %v2112_v0 }
0x1107   : > { %v2162_v35 = vpop.f32.mrf.mxu0 }
0x1108   : > { %v2163_v36 = vadd.f32 %v2341_v34, %v2162_v35 }
0x1109   : > { %v2567_v37 = vpop.f32.mrf.mxu0 }
0x110a   : > { %v2168_v38 = vadd.f32 %v2163_v36, %v2037_v20 }
0x110b   : > { %v2165_v40 = vpop.f32.mrf.mxu0 }
0x110c   : > { %v2171_v41 = vsel %vm777_vm1, %v2168_v38, 0.0 }
0x110d   : > { %2172 = vadd.xlane.f32.xlu0 %v2171_v41  ;;  %v2568_v42 = vpop.f32.mrf.mxu0 }
0x1196   : > { %v2173_v43 = vpop.xlane.xlu0 %2172 }
0x1197   : > { %v2174_v44 = vmul.f32 0.03125, %v2173_v43 }
0x1199   : > { %v2175_v47 = vsub.f32 %v2168_v38, %v2174_v44 }
0x119b   : > { %v2176_v48 = vmul.f32 %v2175_v47, %v2175_v47 }
0x119d   : > { %v2177_v49 = vsel %vm777_vm1, %v2176_v48, 0.0 }
0x119e   : > { %2178 = vadd.xlane.f32.xlu1 %v2177_v49 }
0x1227   : > { %v2179_v50 = vpop.xlane.xlu1 %2178 }
0x1228   : > { %v2180_v51 = vmul.f32 0.03125, %v2179_v50 }
0x122a   : > { %v2181_v52 = vadd.f32 1e-05, %v2180_v51 }
0x122c   : > { %2660 = vrsqrt.f32 %v2181_v52 }
0x1239   : > { %v2661_v53 = vpop.eup %2660 }
0x123a   : > { %v2183_v54 = vmul.f32 %v2661_v53, %v2175_v47 }
0x123c   : > { %v2190_v56 = vmul.f32 %v2342_v39, %v2183_v54 }
0x123e   : > { %v2197_v57 = vadd.f32 %v2343_v55, %v2190_v56 }
0x1240   : > { %2198 = vst.msk [vmem:[%s760_s5] sm:$0xff] %vm777_vm1, %v2197_v57 }
0x1241 PF: > { %s35_s4 = sadd.s32 1, %s2754_s4  }
0x1242   : > { %p32_p3 = scmp.ge.s32.totalorder %s35_s4, 4  }
0x1244   :  { %34 = sbr.rel (!%p32_p3) target bundleno = 11 (0xb), region = 158 }
0x1249   :  { %2218 = vsyncpa [#allocation3], 1 }
0x124a   :  { %2220 = vsyncpa [#allocation3 + $0x1], 1 }
0x124b   :  { %2221 = vsyncpa [#allocation5], 1 }

</bundles_post_ra>
